<compile_context>
chip_gen: v7x
topology: tpu7x:2x2x1
jax: 0.10.0
libtpu: 0.0.40
codegen_flags: <defaults>
</compile_context>

<pallas_src>
import jax
import jax.numpy as jnp
from jax import lax
from jax.experimental import pallas as pl
from jax.experimental.pallas import tpu as pltpu


def _round_up(v, m):
    return ((v + m - 1) // m) * m


# ----------------------------- kernel ---------------------------------------


def _make_encoder_kernel(T, Bp, Hp):
    """Builds the encoder kernel for static (T, Bp, Hp)."""

    def kernel(x_ref,          # (T*Bp, D+1)   bf16, time-major rows, ones column
               wih_ref,        # (D+1, 6*Hp)   bf16, [fwd gates | bwd gates], bias row folded
               whh_ref,        # (2*Hp, 3*Hp)  bf16, vstack(W_hh_f, W_hh_b)
               bhhn_ref,       # (2, Hp)       f32,  b_hh_n for fwd / bwd
               wl_ref,         # (2*Hp, Ep)    bf16, linear head
               blin_ref,       # (1, Ep)       f32
               out_ref,        # (Bp, Ep)      f32
               gx_scr,         # (T, Bp, 6*Hp) f32 scratch (input projections)
               hc_scr):        # (2*Bp, 2*Hp)  f32 scratch (block-diag hidden LHS)
        # ---- 1) hoisted input projections: ONE matmul for both directions,
        #         b_ih (+ b_hh_{r,z}) folded in via the ones column ----
        gx = jnp.dot(x_ref[...], wih_ref[...],
                     preferred_element_type=jnp.float32)          # (T*Bp, 6*Hp)
        gx_scr[...] = gx.reshape(T, Bp, 6 * Hp)

        # hoisted n-gate hidden biases (the only biases left per step)
        bhhn_f = bhhn_ref[0:1, :]                                  # (1, Hp)
        bhhn_b = bhhn_ref[1:2, :]

        # persistent block-diagonal LHS: zero off-diagonal blocks written once
        hc_scr[...] = jnp.zeros_like(hc_scr)

        def gates(gx_t, gh_t, bhhn, h):
            # gx_t/gh_t: (Bp, 3*Hp) f32; lane-aligned gate slices (no XLU work)
            r = jax.nn.sigmoid(gx_t[:, 0:Hp] + gh_t[:, 0:Hp])
            z = jax.nn.sigmoid(gx_t[:, Hp:2 * Hp] + gh_t[:, Hp:2 * Hp])
            n = jnp.tanh(gx_t[:, 2 * Hp:3 * Hp] +
                         r * (gh_t[:, 2 * Hp:3 * Hp] + bhhn))
            return (1.0 - z) * n + z * h

        # ---- 2) fused bidirectional recurrence: one block-diagonal MXU
        #         matmul per step covers both directions ----
        def step(t, carry):
            h_f, h_b = carry
            # rewrite only the diagonal h blocks of the persistent LHS
            hc_scr[0:Bp, 0:Hp] = h_f
            hc_scr[Bp:2 * Bp, Hp:2 * Hp] = h_b
            gh = jnp.dot(hc_scr[...].astype(jnp.bfloat16), whh_ref[...],
                         preferred_element_type=jnp.float32)       # (2*Bp, 3*Hp)
            gx_t = gx_scr[t]                                       # (Bp, 6*Hp)
            gx_rt = gx_scr[T - 1 - t]
            h_f = gates(gx_t[:, 0:3 * Hp], gh[0:Bp], bhhn_f, h_f)
            h_b = gates(gx_rt[:, 3 * Hp:6 * Hp], gh[Bp:2 * Bp], bhhn_b, h_b)
            return h_f, h_b

        h0 = jnp.zeros((Bp, Hp), jnp.float32)
        h_f, h_b = lax.fori_loop(0, T, step, (h0, h0), unroll=True)

        # ---- 3) linear head: layout-free lane concat + one matmul ----
        h_cat = jnp.concatenate([h_f, h_b], axis=1).astype(jnp.bfloat16)
        out = jnp.dot(h_cat, wl_ref[...], preferred_element_type=jnp.float32)
        out_ref[...] = out + blin_ref[...]

    return kernel


# ------------------------ parameter packing ---------------------------------


def _pack_gate_matrix(w, Hp, rows, bias=None):
    """PyTorch gate-major (3H, K) weight -> (rows, 3*Hp); each gate's W^T sits
    in the top-left of its own 128-lane block (zero padding).  If `bias`
    (3H,) is given it is folded into row K (ones-column trick)."""
    H = w.shape[0] // 3
    K = w.shape[1]
    out = jnp.zeros((rows, 3 * Hp), jnp.float32)
    for g in range(3):
        out = out.at[:K, g * Hp:g * Hp + H].set(w[g * H:(g + 1) * H, :].T)
        if bias is not None:
            out = out.at[K, g * Hp:g * Hp + H].set(bias[g * H:(g + 1) * H])
    return out


# ------------------------------ wrapper --------------------------------------


def encoder_forward(x_btd, p):
    """x_btd: (B, T, D) float32. p: dict of PyTorch-shaped parameters."""
    B, T, D = x_btd.shape
    H = p["w_hh_f"].shape[1]
    E = p["w_lin"].shape[0]

    Bp = _round_up(B, 8)       # full sublane group
    Hp = _round_up(H, 128)     # each gate gets its own 128-lane block
    Ep = _round_up(E, 128)     # lane-dense output store

    # time-major, zero-padded batch, ones column appended (bias folding),
    # flattened to (T*Bp, D+1) rows, bf16 matmul operand
    x_tbd = jnp.transpose(x_btd, (1, 0, 2)).astype(jnp.float32)
    x_pad = jnp.zeros((T, Bp, D + 1), jnp.float32)
    x_pad = x_pad.at[:, :B, :D].set(x_tbd)
    x_pad = x_pad.at[:, :, D].set(1.0)
    x2d = x_pad.reshape(T * Bp, D + 1).astype(jnp.bfloat16)

    # b_ih plus the r/z parts of b_hh fold straight into the projection;
    # only b_hh_n must stay separate (it is scaled by r inside the n gate).
    zeros_h = jnp.zeros((H,), jnp.float32)
    bfold_f = p["b_ih_f"] + jnp.concatenate([p["b_hh_f"][:2 * H], zeros_h])
    bfold_b = p["b_ih_b"] + jnp.concatenate([p["b_hh_b"][:2 * H], zeros_h])

    wih_comb = jnp.concatenate(
        [_pack_gate_matrix(p["w_ih_f"], Hp, D + 1, bias=bfold_f),
         _pack_gate_matrix(p["w_ih_b"], Hp, D + 1, bias=bfold_b)],
        axis=1).astype(jnp.bfloat16)                    # (D+1, 6*Hp)

    whh_comb = jnp.concatenate(
        [_pack_gate_matrix(p["w_hh_f"], Hp, Hp),
         _pack_gate_matrix(p["w_hh_b"], Hp, Hp)],
        axis=0).astype(jnp.bfloat16)                    # (2*Hp, 3*Hp)

    bhhn = jnp.zeros((2, Hp), jnp.float32)
    bhhn = bhhn.at[0, :H].set(p["b_hh_f"][2 * H:])
    bhhn = bhhn.at[1, :H].set(p["b_hh_b"][2 * H:])

    # linear head: single (2*Hp, Ep) weight, fwd rows then bwd rows
    wl = p["w_lin"].astype(jnp.float32)                 # (E, 2H)
    wl_comb = jnp.zeros((2 * Hp, Ep), jnp.float32)
    wl_comb = wl_comb.at[:H, :E].set(wl[:, :H].T)
    wl_comb = wl_comb.at[Hp:Hp + H, :E].set(wl[:, H:].T)
    wl_comb = wl_comb.astype(jnp.bfloat16)
    blin = jnp.zeros((1, Ep), jnp.float32).at[0, :E].set(
        p["b_lin"].astype(jnp.float32))

    args = (x2d, wih_comb, whh_comb, bhhn, wl_comb, blin)

    kernel = _make_encoder_kernel(T, Bp, Hp)
    vmem = pl.BlockSpec(memory_space=pltpu.MemorySpace.VMEM)
    out_pad = pl.pallas_call(
        kernel,
        out_shape=jax.ShapeDtypeStruct((Bp, Ep), jnp.float32),
        in_specs=[vmem] * len(args),
        out_specs=vmem,
        scratch_shapes=[pltpu.VMEM((T, Bp, 6 * Hp), jnp.float32),
                        pltpu.VMEM((2 * Bp, 2 * Hp), jnp.float32)],
    )(*args)
    return out_pad[:B, :E]


# ---------------- pure-JAX reference (PyTorch semantics) ----------------


def _gru_cell_ref(x_t, h, w_ih, w_hh, b_ih, b_hh):
    H = h.shape[1]
    gx = x_t @ w_ih.T + b_ih
    gh = h @ w_hh.T + b_hh
    r = jax.nn.sigmoid(gx[:, :H] + gh[:, :H])
    z = jax.nn.sigmoid(gx[:, H:2 * H] + gh[:, H:2 * H])
    n = jnp.tanh(gx[:, 2 * H:] + r * gh[:, 2 * H:])
    return (1.0 - z) * n + z * h


def encoder_ref(x_btd, p):
    B, T, _ = x_btd.shape
    H = p["w_hh_f"].shape[1]
    h_f = jnp.zeros((B, H), jnp.float32)
    for t in range(T):
        h_f = _gru_cell_ref(x_btd[:, t], h_f,
                            p["w_ih_f"], p["w_hh_f"], p["b_ih_f"], p["b_hh_f"])
    h_b = jnp.zeros((B, H), jnp.float32)
    for t in range(T - 1, -1, -1):
        h_b = _gru_cell_ref(x_btd[:, t], h_b,
                            p["w_ih_b"], p["w_hh_b"], p["b_ih_b"], p["b_hh_b"])
    h = jnp.concatenate([h_f, h_b], axis=1)
    return h @ p["w_lin"].T + p["b_lin"]


if __name__ == "__main__":
    B, T, D, H, E = 2, 8, 4, 32, 16  # batch, seq, input_dim, hidden_dim, embedding_dim

    key = jax.random.PRNGKey(0)
    keys = jax.random.split(key, 12)

    def u(k, shape, bound):
        return jax.random.uniform(k, shape, jnp.float32, -bound, bound)

    kg = 1.0 / float(jnp.sqrt(H))          # PyTorch GRU init bound
    kl = 1.0 / float(jnp.sqrt(2 * H))      # PyTorch Linear init bound

    params = {
        # forward direction (PyTorch: weight_ih_l0 etc.)
        "w_ih_f": u(keys[0], (3 * H, D), kg),
        "w_hh_f": u(keys[1], (3 * H, H), kg),
        "b_ih_f": u(keys[2], (3 * H,), kg),
        "b_hh_f": u(keys[3], (3 * H,), kg),
        # backward direction (PyTorch: *_l0_reverse)
        "w_ih_b": u(keys[4], (3 * H, D), kg),
        "w_hh_b": u(keys[5], (3 * H, H), kg),
        "b_ih_b": u(keys[6], (3 * H,), kg),
        "b_hh_b": u(keys[7], (3 * H,), kg),
        # linear head
        "w_lin": u(keys[8], (E, 2 * H), kl),
        "b_lin": u(keys[9], (E,), kl),
    }

    x = jax.random.normal(keys[10], (B, T, D), jnp.float32)

    out = encoder_forward(x, params)
    out = jax.block_until_ready(out)

    ref = encoder_ref(x, params)
    assert out.shape == (B, E)
    # bf16 matmul inputs (f32 accumulation) -> looser tolerance than pure f32
    assert jnp.allclose(out, ref, atol=3e-2, rtol=3e-2), \
        f"max abs diff {float(jnp.max(jnp.abs(out - ref)))}"

    print("KERNEL_OK")
</pallas_src>

<mosaic_0001>
module attributes {stable_mosaic.version = 11 : i64} {
  func.func @kernel(%arg0: memref<64x5xbf16, #tpu.memory_space<vmem>>, %arg1: memref<5x768xbf16, #tpu.memory_space<vmem>>, %arg2: memref<256x384xbf16, #tpu.memory_space<vmem>>, %arg3: memref<2x128xf32, #tpu.memory_space<vmem>>, %arg4: memref<256x128xbf16, #tpu.memory_space<vmem>>, %arg5: memref<1x128xf32, #tpu.memory_space<vmem>>, %arg6: memref<8x128xf32, #tpu.memory_space<vmem>>, %arg7: memref<8x8x768xf32, #tpu.memory_space<vmem>>, %arg8: memref<16x256xf32, #tpu.memory_space<vmem>>) attributes {dimension_semantics = [], scalar_prefetch = 0 : i64, scratch_operands = 2 : i64, tpu.core_type = #tpu.core_type<tc>} {
    %c0 = arith.constant 0 : index
    %c0_0 = arith.constant 0 : index
    %0 = vector.load %arg0[%c0, %c0_0] : memref<64x5xbf16, #tpu.memory_space<vmem>>, vector<64x5xbf16>
    %c0_1 = arith.constant 0 : index
    %c0_2 = arith.constant 0 : index
    %1 = vector.load %arg1[%c0_1, %c0_2] : memref<5x768xbf16, #tpu.memory_space<vmem>>, vector<5x768xbf16>
    %cst = arith.constant dense<0.000000e+00> : vector<64x768xf32>
    %2 = tpu.matmul %0, %1, %cst {dimension_numbers = #tpu.dot_dimension_numbers<[1], [0], [0], [1], [0, 0, 1, 1], [], []>} : vector<64x5xbf16>, vector<5x768xbf16>, vector<64x768xf32> -> vector<64x768xf32>
    %3 = vector.shape_cast %2 : vector<64x768xf32> to vector<8x8x768xf32>
    %c0_3 = arith.constant 0 : index
    %c0_4 = arith.constant 0 : index
    %c0_5 = arith.constant 0 : index
    %4 = vector.load %arg7[%c0_3, %c0_4, %c0_5] : memref<8x8x768xf32, #tpu.memory_space<vmem>>, vector<8x8x768xf32>
    tpu.vector_store %arg7[%c0_3, %c0_4, %c0_5], %3 {strides = array<i32>} : memref<8x8x768xf32, #tpu.memory_space<vmem>>, vector<8x8x768xf32>,
    %c0_6 = arith.constant 0 : index
    %c0_7 = arith.constant 0 : index
    %5 = vector.load %arg3[%c0_6, %c0_7] : memref<2x128xf32, #tpu.memory_space<vmem>>, vector<1x128xf32>
    %c1 = arith.constant 1 : index
    %c0_8 = arith.constant 0 : index
    %6 = vector.load %arg3[%c1, %c0_8] : memref<2x128xf32, #tpu.memory_space<vmem>>, vector<1x128xf32>
    %cst_9 = arith.constant 0.000000e+00 : f32
    %7 = vector.broadcast %cst_9 : f32 to vector<16x256xf32>
    %c0_10 = arith.constant 0 : index
    %c0_11 = arith.constant 0 : index
    %8 = vector.load %arg8[%c0_10, %c0_11] : memref<16x256xf32, #tpu.memory_space<vmem>>, vector<16x256xf32>
    tpu.vector_store %arg8[%c0_10, %c0_11], %7 {strides = array<i32>} : memref<16x256xf32, #tpu.memory_space<vmem>>, vector<16x256xf32>,
    %cst_12 = arith.constant 0.000000e+00 : f32
    %9 = vector.broadcast %cst_12 : f32 to vector<8x128xf32>
    %c0_i32 = arith.constant 0 : i32
    %c0_13 = arith.constant 0 : index
    %c0_14 = arith.constant 0 : index
    %10 = vector.load %arg8[%c0_13, %c0_14] : memref<16x256xf32, #tpu.memory_space<vmem>>, vector<8x128xf32>
    tpu.vector_store %arg8[%c0_13, %c0_14], %9 {strides = array<i32>} : memref<16x256xf32, #tpu.memory_space<vmem>>, vector<8x128xf32>,
    %c8 = arith.constant 8 : index
    %c128 = arith.constant 128 : index
    %11 = vector.load %arg8[%c8, %c128] : memref<16x256xf32, #tpu.memory_space<vmem>>, vector<8x128xf32>
    tpu.vector_store %arg8[%c8, %c128], %9 {strides = array<i32>} : memref<16x256xf32, #tpu.memory_space<vmem>>, vector<8x128xf32>,
    %c0_15 = arith.constant 0 : index
    %c0_16 = arith.constant 0 : index
    %12 = vector.load %arg8[%c0_15, %c0_16] : memref<16x256xf32, #tpu.memory_space<vmem>>, vector<16x256xf32>
    %13 = arith.truncf %12 : vector<16x256xf32> to vector<16x256xbf16>
    %c0_17 = arith.constant 0 : index
    %c0_18 = arith.constant 0 : index
    %14 = vector.load %arg2[%c0_17, %c0_18] : memref<256x384xbf16, #tpu.memory_space<vmem>>, vector<256x384xbf16>
    %cst_19 = arith.constant dense<0.000000e+00> : vector<16x384xf32>
    %15 = tpu.matmul %13, %14, %cst_19 {dimension_numbers = #tpu.dot_dimension_numbers<[1], [0], [0], [1], [0, 0, 1, 1], [], []>} : vector<16x256xbf16>, vector<256x384xbf16>, vector<16x384xf32> -> vector<16x384xf32>
    %16 = arith.index_cast %c0_i32 : i32 to index
    %c0_20 = arith.constant 0 : index
    %c0_21 = arith.constant 0 : index
    %17 = vector.load %arg7[%16, %c0_20, %c0_21] : memref<8x8x768xf32, #tpu.memory_space<vmem>>, vector<1x8x768xf32>
    %18 = vector.shape_cast %17 : vector<1x8x768xf32> to vector<8x768xf32>
    %c7_i32 = arith.constant 7 : i32
    %19 = arith.subi %c7_i32, %c0_i32 : i32
    %20 = arith.index_cast %19 : i32 to index
    %c0_22 = arith.constant 0 : index
    %c0_23 = arith.constant 0 : index
    %21 = vector.load %arg7[%20, %c0_22, %c0_23] : memref<8x8x768xf32, #tpu.memory_space<vmem>>, vector<1x8x768xf32>
    %22 = vector.shape_cast %21 : vector<1x8x768xf32> to vector<8x768xf32>
    %23 = vector.extract_strided_slice %18 {offsets = [0, 0], sizes = [8, 384], strides = [1, 1]} : vector<8x768xf32> to vector<8x384xf32>
    %24 = vector.extract_strided_slice %15 {offsets = [0, 0], sizes = [8, 384], strides = [1, 1]} : vector<16x384xf32> to vector<8x384xf32>
    %25 = vector.extract_strided_slice %23 {offsets = [0, 0], sizes = [8, 128], strides = [1, 1]} : vector<8x384xf32> to vector<8x128xf32>
    %26 = vector.extract_strided_slice %24 {offsets = [0, 0], sizes = [8, 128], strides = [1, 1]} : vector<8x384xf32> to vector<8x128xf32>
    %27 = arith.addf %25, %26 : vector<8x128xf32>
    %28 = arith.negf %27 : vector<8x128xf32>
    %29 = math.exp %28 : vector<8x128xf32>
    %cst_24 = arith.constant 1.000000e+00 : f32
    %30 = vector.broadcast %cst_24 : f32 to vector<8x128xf32>
    %31 = arith.addf %30, %29 : vector<8x128xf32>
    %32 = arith.divf %30, %31 : vector<8x128xf32>
    %33 = vector.extract_strided_slice %23 {offsets = [0, 128], sizes = [8, 128], strides = [1, 1]} : vector<8x384xf32> to vector<8x128xf32>
    %34 = vector.extract_strided_slice %24 {offsets = [0, 128], sizes = [8, 128], strides = [1, 1]} : vector<8x384xf32> to vector<8x128xf32>
    %35 = arith.addf %33, %34 : vector<8x128xf32>
    %36 = arith.negf %35 : vector<8x128xf32>
    %37 = math.exp %36 : vector<8x128xf32>
    %cst_25 = arith.constant 1.000000e+00 : f32
    %38 = vector.broadcast %cst_25 : f32 to vector<8x128xf32>
    %39 = arith.addf %38, %37 : vector<8x128xf32>
    %40 = arith.divf %38, %39 : vector<8x128xf32>
    %41 = vector.extract_strided_slice %23 {offsets = [0, 256], sizes = [8, 128], strides = [1, 1]} : vector<8x384xf32> to vector<8x128xf32>
    %42 = vector.extract_strided_slice %24 {offsets = [0, 256], sizes = [8, 128], strides = [1, 1]} : vector<8x384xf32> to vector<8x128xf32>
    %43 = vector.broadcast %5 : vector<1x128xf32> to vector<8x128xf32>
    %44 = arith.addf %42, %43 : vector<8x128xf32>
    %45 = arith.mulf %32, %44 : vector<8x128xf32>
    %46 = arith.addf %41, %45 : vector<8x128xf32>
    %47 = math.tanh %46 : vector<8x128xf32>
    %cst_26 = arith.constant 1.000000e+00 : f32
    %48 = vector.broadcast %cst_26 : f32 to vector<8x128xf32>
    %49 = arith.subf %48, %40 : vector<8x128xf32>
    %50 = arith.mulf %49, %47 : vector<8x128xf32>
    %51 = arith.mulf %40, %9 : vector<8x128xf32>
    %52 = arith.addf %50, %51 : vector<8x128xf32>
    %53 = vector.extract_strided_slice %22 {offsets = [0, 384], sizes = [8, 384], strides = [1, 1]} : vector<8x768xf32> to vector<8x384xf32>
    %54 = vector.extract_strided_slice %15 {offsets = [8, 0], sizes = [8, 384], strides = [1, 1]} : vector<16x384xf32> to vector<8x384xf32>
    %55 = vector.extract_strided_slice %53 {offsets = [0, 0], sizes = [8, 128], strides = [1, 1]} : vector<8x384xf32> to vector<8x128xf32>
    %56 = vector.extract_strided_slice %54 {offsets = [0, 0], sizes = [8, 128], strides = [1, 1]} : vector<8x384xf32> to vector<8x128xf32>
    %57 = arith.addf %55, %56 : vector<8x128xf32>
    %58 = arith.negf %57 : vector<8x128xf32>
    %59 = math.exp %58 : vector<8x128xf32>
    %cst_27 = arith.constant 1.000000e+00 : f32
    %60 = vector.broadcast %cst_27 : f32 to vector<8x128xf32>
    %61 = arith.addf %60, %59 : vector<8x128xf32>
    %62 = arith.divf %60, %61 : vector<8x128xf32>
    %63 = vector.extract_strided_slice %53 {offsets = [0, 128], sizes = [8, 128], strides = [1, 1]} : vector<8x384xf32> to vector<8x128xf32>
    %64 = vector.extract_strided_slice %54 {offsets = [0, 128], sizes = [8, 128], strides = [1, 1]} : vector<8x384xf32> to vector<8x128xf32>
    %65 = arith.addf %63, %64 : vector<8x128xf32>
    %66 = arith.negf %65 : vector<8x128xf32>
    %67 = math.exp %66 : vector<8x128xf32>
    %cst_28 = arith.constant 1.000000e+00 : f32
    %68 = vector.broadcast %cst_28 : f32 to vector<8x128xf32>
    %69 = arith.addf %68, %67 : vector<8x128xf32>
    %70 = arith.divf %68, %69 : vector<8x128xf32>
    %71 = vector.extract_strided_slice %53 {offsets = [0, 256], sizes = [8, 128], strides = [1, 1]} : vector<8x384xf32> to vector<8x128xf32>
    %72 = vector.extract_strided_slice %54 {offsets = [0, 256], sizes = [8, 128], strides = [1, 1]} : vector<8x384xf32> to vector<8x128xf32>
    %73 = vector.broadcast %6 : vector<1x128xf32> to vector<8x128xf32>
    %74 = arith.addf %72, %73 : vector<8x128xf32>
    %75 = arith.mulf %62, %74 : vector<8x128xf32>
    %76 = arith.addf %71, %75 : vector<8x128xf32>
    %77 = math.tanh %76 : vector<8x128xf32>
    %cst_29 = arith.constant 1.000000e+00 : f32
    %78 = vector.broadcast %cst_29 : f32 to vector<8x128xf32>
    %79 = arith.subf %78, %70 : vector<8x128xf32>
    %80 = arith.mulf %79, %77 : vector<8x128xf32>
    %81 = arith.mulf %70, %9 : vector<8x128xf32>
    %82 = arith.addf %80, %81 : vector<8x128xf32>
    %c1_i32 = arith.constant 1 : i32
    %c0_30 = arith.constant 0 : index
    %c0_31 = arith.constant 0 : index
    %83 = vector.load %arg8[%c0_30, %c0_31] : memref<16x256xf32, #tpu.memory_space<vmem>>, vector<8x128xf32>
    tpu.vector_store %arg8[%c0_30, %c0_31], %52 {strides = array<i32>} : memref<16x256xf32, #tpu.memory_space<vmem>>, vector<8x128xf32>,
    %c8_32 = arith.constant 8 : index
    %c128_33 = arith.constant 128 : index
    %84 = vector.load %arg8[%c8_32, %c128_33] : memref<16x256xf32, #tpu.memory_space<vmem>>, vector<8x128xf32>
    tpu.vector_store %arg8[%c8_32, %c128_33], %82 {strides = array<i32>} : memref<16x256xf32, #tpu.memory_space<vmem>>, vector<8x128xf32>,
    %c0_34 = arith.constant 0 : index
    %c0_35 = arith.constant 0 : index
    %85 = vector.load %arg8[%c0_34, %c0_35] : memref<16x256xf32, #tpu.memory_space<vmem>>, vector<16x256xf32>
    %86 = arith.truncf %85 : vector<16x256xf32> to vector<16x256xbf16>
    %c0_36 = arith.constant 0 : index
    %c0_37 = arith.constant 0 : index
    %87 = vector.load %arg2[%c0_36, %c0_37] : memref<256x384xbf16, #tpu.memory_space<vmem>>, vector<256x384xbf16>
    %cst_38 = arith.constant dense<0.000000e+00> : vector<16x384xf32>
    %88 = tpu.matmul %86, %87, %cst_38 {dimension_numbers = #tpu.dot_dimension_numbers<[1], [0], [0], [1], [0, 0, 1, 1], [], []>} : vector<16x256xbf16>, vector<256x384xbf16>, vector<16x384xf32> -> vector<16x384xf32>
    %89 = arith.index_cast %c1_i32 : i32 to index
    %c0_39 = arith.constant 0 : index
    %c0_40 = arith.constant 0 : index
    %90 = vector.load %arg7[%89, %c0_39, %c0_40] : memref<8x8x768xf32, #tpu.memory_space<vmem>>, vector<1x8x768xf32>
    %91 = vector.shape_cast %90 : vector<1x8x768xf32> to vector<8x768xf32>
    %c7_i32_41 = arith.constant 7 : i32
    %92 = arith.subi %c7_i32_41, %c1_i32 : i32
    %93 = arith.index_cast %92 : i32 to index
    %c0_42 = arith.constant 0 : index
    %c0_43 = arith.constant 0 : index
    %94 = vector.load %arg7[%93, %c0_42, %c0_43] : memref<8x8x768xf32, #tpu.memory_space<vmem>>, vector<1x8x768xf32>
    %95 = vector.shape_cast %94 : vector<1x8x768xf32> to vector<8x768xf32>
    %96 = vector.extract_strided_slice %91 {offsets = [0, 0], sizes = [8, 384], strides = [1, 1]} : vector<8x768xf32> to vector<8x384xf32>
    %97 = vector.extract_strided_slice %88 {offsets = [0, 0], sizes = [8, 384], strides = [1, 1]} : vector<16x384xf32> to vector<8x384xf32>
    %98 = vector.extract_strided_slice %96 {offsets = [0, 0], sizes = [8, 128], strides = [1, 1]} : vector<8x384xf32> to vector<8x128xf32>
    %99 = vector.extract_strided_slice %97 {offsets = [0, 0], sizes = [8, 128], strides = [1, 1]} : vector<8x384xf32> to vector<8x128xf32>
    %100 = arith.addf %98, %99 : vector<8x128xf32>
    %101 = arith.negf %100 : vector<8x128xf32>
    %102 = math.exp %101 : vector<8x128xf32>
    %cst_44 = arith.constant 1.000000e+00 : f32
    %103 = vector.broadcast %cst_44 : f32 to vector<8x128xf32>
    %104 = arith.addf %103, %102 : vector<8x128xf32>
    %105 = arith.divf %103, %104 : vector<8x128xf32>
    %106 = vector.extract_strided_slice %96 {offsets = [0, 128], sizes = [8, 128], strides = [1, 1]} : vector<8x384xf32> to vector<8x128xf32>
    %107 = vector.extract_strided_slice %97 {offsets = [0, 128], sizes = [8, 128], strides = [1, 1]} : vector<8x384xf32> to vector<8x128xf32>
    %108 = arith.addf %106, %107 : vector<8x128xf32>
    %109 = arith.negf %108 : vector<8x128xf32>
    %110 = math.exp %109 : vector<8x128xf32>
    %cst_45 = arith.constant 1.000000e+00 : f32
    %111 = vector.broadcast %cst_45 : f32 to vector<8x128xf32>
    %112 = arith.addf %111, %110 : vector<8x128xf32>
    %113 = arith.divf %111, %112 : vector<8x128xf32>
    %114 = vector.extract_strided_slice %96 {offsets = [0, 256], sizes = [8, 128], strides = [1, 1]} : vector<8x384xf32> to vector<8x128xf32>
    %115 = vector.extract_strided_slice %97 {offsets = [0, 256], sizes = [8, 128], strides = [1, 1]} : vector<8x384xf32> to vector<8x128xf32>
    %116 = vector.broadcast %5 : vector<1x128xf32> to vector<8x128xf32>
    %117 = arith.addf %115, %116 : vector<8x128xf32>
    %118 = arith.mulf %105, %117 : vector<8x128xf32>
    %119 = arith.addf %114, %118 : vector<8x128xf32>
    %120 = math.tanh %119 : vector<8x128xf32>
    %cst_46 = arith.constant 1.000000e+00 : f32
    %121 = vector.broadcast %cst_46 : f32 to vector<8x128xf32>
    %122 = arith.subf %121, %113 : vector<8x128xf32>
    %123 = arith.mulf %122, %120 : vector<8x128xf32>
    %124 = arith.mulf %113, %52 : vector<8x128xf32>
    %125 = arith.addf %123, %124 : vector<8x128xf32>
    %126 = vector.extract_strided_slice %95 {offsets = [0, 384], sizes = [8, 384], strides = [1, 1]} : vector<8x768xf32> to vector<8x384xf32>
    %127 = vector.extract_strided_slice %88 {offsets = [8, 0], sizes = [8, 384], strides = [1, 1]} : vector<16x384xf32> to vector<8x384xf32>
    %128 = vector.extract_strided_slice %126 {offsets = [0, 0], sizes = [8, 128], strides = [1, 1]} : vector<8x384xf32> to vector<8x128xf32>
    %129 = vector.extract_strided_slice %127 {offsets = [0, 0], sizes = [8, 128], strides = [1, 1]} : vector<8x384xf32> to vector<8x128xf32>
    %130 = arith.addf %128, %129 : vector<8x128xf32>
    %131 = arith.negf %130 : vector<8x128xf32>
    %132 = math.exp %131 : vector<8x128xf32>
    %cst_47 = arith.constant 1.000000e+00 : f32
    %133 = vector.broadcast %cst_47 : f32 to vector<8x128xf32>
    %134 = arith.addf %133, %132 : vector<8x128xf32>
    %135 = arith.divf %133, %134 : vector<8x128xf32>
    %136 = vector.extract_strided_slice %126 {offsets = [0, 128], sizes = [8, 128], strides = [1, 1]} : vector<8x384xf32> to vector<8x128xf32>
    %137 = vector.extract_strided_slice %127 {offsets = [0, 128], sizes = [8, 128], strides = [1, 1]} : vector<8x384xf32> to vector<8x128xf32>
    %138 = arith.addf %136, %137 : vector<8x128xf32>
    %139 = arith.negf %138 : vector<8x128xf32>
    %140 = math.exp %139 : vector<8x128xf32>
    %cst_48 = arith.constant 1.000000e+00 : f32
    %141 = vector.broadcast %cst_48 : f32 to vector<8x128xf32>
    %142 = arith.addf %141, %140 : vector<8x128xf32>
    %143 = arith.divf %141, %142 : vector<8x128xf32>
    %144 = vector.extract_strided_slice %126 {offsets = [0, 256], sizes = [8, 128], strides = [1, 1]} : vector<8x384xf32> to vector<8x128xf32>
    %145 = vector.extract_strided_slice %127 {offsets = [0, 256], sizes = [8, 128], strides = [1, 1]} : vector<8x384xf32> to vector<8x128xf32>
    %146 = vector.broadcast %6 : vector<1x128xf32> to vector<8x128xf32>
    %147 = arith.addf %145, %146 : vector<8x128xf32>
    %148 = arith.mulf %135, %147 : vector<8x128xf32>
    %149 = arith.addf %144, %148 : vector<8x128xf32>
    %150 = math.tanh %149 : vector<8x128xf32>
    %cst_49 = arith.constant 1.000000e+00 : f32
    %151 = vector.broadcast %cst_49 : f32 to vector<8x128xf32>
    %152 = arith.subf %151, %143 : vector<8x128xf32>
    %153 = arith.mulf %152, %150 : vector<8x128xf32>
    %154 = arith.mulf %143, %82 : vector<8x128xf32>
    %155 = arith.addf %153, %154 : vector<8x128xf32>
    %c2_i32 = arith.constant 2 : i32
    %c0_50 = arith.constant 0 : index
    %c0_51 = arith.constant 0 : index
    %156 = vector.load %arg8[%c0_50, %c0_51] : memref<16x256xf32, #tpu.memory_space<vmem>>, vector<8x128xf32>
    tpu.vector_store %arg8[%c0_50, %c0_51], %125 {strides = array<i32>} : memref<16x256xf32, #tpu.memory_space<vmem>>, vector<8x128xf32>,
    %c8_52 = arith.constant 8 : index
    %c128_53 = arith.constant 128 : index
    %157 = vector.load %arg8[%c8_52, %c128_53] : memref<16x256xf32, #tpu.memory_space<vmem>>, vector<8x128xf32>
    tpu.vector_store %arg8[%c8_52, %c128_53], %155 {strides = array<i32>} : memref<16x256xf32, #tpu.memory_space<vmem>>, vector<8x128xf32>,
    %c0_54 = arith.constant 0 : index
    %c0_55 = arith.constant 0 : index
    %158 = vector.load %arg8[%c0_54, %c0_55] : memref<16x256xf32, #tpu.memory_space<vmem>>, vector<16x256xf32>
    %159 = arith.truncf %158 : vector<16x256xf32> to vector<16x256xbf16>
    %c0_56 = arith.constant 0 : index
    %c0_57 = arith.constant 0 : index
    %160 = vector.load %arg2[%c0_56, %c0_57] : memref<256x384xbf16, #tpu.memory_space<vmem>>, vector<256x384xbf16>
    %cst_58 = arith.constant dense<0.000000e+00> : vector<16x384xf32>
    %161 = tpu.matmul %159, %160, %cst_58 {dimension_numbers = #tpu.dot_dimension_numbers<[1], [0], [0], [1], [0, 0, 1, 1], [], []>} : vector<16x256xbf16>, vector<256x384xbf16>, vector<16x384xf32> -> vector<16x384xf32>
    %162 = arith.index_cast %c2_i32 : i32 to index
    %c0_59 = arith.constant 0 : index
    %c0_60 = arith.constant 0 : index
    %163 = vector.load %arg7[%162, %c0_59, %c0_60] : memref<8x8x768xf32, #tpu.memory_space<vmem>>, vector<1x8x768xf32>
    %164 = vector.shape_cast %163 : vector<1x8x768xf32> to vector<8x768xf32>
    %c7_i32_61 = arith.constant 7 : i32
    %165 = arith.subi %c7_i32_61, %c2_i32 : i32
    %166 = arith.index_cast %165 : i32 to index
    %c0_62 = arith.constant 0 : index
    %c0_63 = arith.constant 0 : index
    %167 = vector.load %arg7[%166, %c0_62, %c0_63] : memref<8x8x768xf32, #tpu.memory_space<vmem>>, vector<1x8x768xf32>
    %168 = vector.shape_cast %167 : vector<1x8x768xf32> to vector<8x768xf32>
    %169 = vector.extract_strided_slice %164 {offsets = [0, 0], sizes = [8, 384], strides = [1, 1]} : vector<8x768xf32> to vector<8x384xf32>
    %170 = vector.extract_strided_slice %161 {offsets = [0, 0], sizes = [8, 384], strides = [1, 1]} : vector<16x384xf32> to vector<8x384xf32>
    %171 = vector.extract_strided_slice %169 {offsets = [0, 0], sizes = [8, 128], strides = [1, 1]} : vector<8x384xf32> to vector<8x128xf32>
    %172 = vector.extract_strided_slice %170 {offsets = [0, 0], sizes = [8, 128], strides = [1, 1]} : vector<8x384xf32> to vector<8x128xf32>
    %173 = arith.addf %171, %172 : vector<8x128xf32>
    %174 = arith.negf %173 : vector<8x128xf32>
    %175 = math.exp %174 : vector<8x128xf32>
    %cst_64 = arith.constant 1.000000e+00 : f32
    %176 = vector.broadcast %cst_64 : f32 to vector<8x128xf32>
    %177 = arith.addf %176, %175 : vector<8x128xf32>
    %178 = arith.divf %176, %177 : vector<8x128xf32>
    %179 = vector.extract_strided_slice %169 {offsets = [0, 128], sizes = [8, 128], strides = [1, 1]} : vector<8x384xf32> to vector<8x128xf32>
    %180 = vector.extract_strided_slice %170 {offsets = [0, 128], sizes = [8, 128], strides = [1, 1]} : vector<8x384xf32> to vector<8x128xf32>
    %181 = arith.addf %179, %180 : vector<8x128xf32>
    %182 = arith.negf %181 : vector<8x128xf32>
    %183 = math.exp %182 : vector<8x128xf32>
    %cst_65 = arith.constant 1.000000e+00 : f32
    %184 = vector.broadcast %cst_65 : f32 to vector<8x128xf32>
    %185 = arith.addf %184, %183 : vector<8x128xf32>
    %186 = arith.divf %184, %185 : vector<8x128xf32>
    %187 = vector.extract_strided_slice %169 {offsets = [0, 256], sizes = [8, 128], strides = [1, 1]} : vector<8x384xf32> to vector<8x128xf32>
    %188 = vector.extract_strided_slice %170 {offsets = [0, 256], sizes = [8, 128], strides = [1, 1]} : vector<8x384xf32> to vector<8x128xf32>
    %189 = vector.broadcast %5 : vector<1x128xf32> to vector<8x128xf32>
    %190 = arith.addf %188, %189 : vector<8x128xf32>
    %191 = arith.mulf %178, %190 : vector<8x128xf32>
    %192 = arith.addf %187, %191 : vector<8x128xf32>
    %193 = math.tanh %192 : vector<8x128xf32>
    %cst_66 = arith.constant 1.000000e+00 : f32
    %194 = vector.broadcast %cst_66 : f32 to vector<8x128xf32>
    %195 = arith.subf %194, %186 : vector<8x128xf32>
    %196 = arith.mulf %195, %193 : vector<8x128xf32>
    %197 = arith.mulf %186, %125 : vector<8x128xf32>
    %198 = arith.addf %196, %197 : vector<8x128xf32>
    %199 = vector.extract_strided_slice %168 {offsets = [0, 384], sizes = [8, 384], strides = [1, 1]} : vector<8x768xf32> to vector<8x384xf32>
    %200 = vector.extract_strided_slice %161 {offsets = [8, 0], sizes = [8, 384], strides = [1, 1]} : vector<16x384xf32> to vector<8x384xf32>
    %201 = vector.extract_strided_slice %199 {offsets = [0, 0], sizes = [8, 128], strides = [1, 1]} : vector<8x384xf32> to vector<8x128xf32>
    %202 = vector.extract_strided_slice %200 {offsets = [0, 0], sizes = [8, 128], strides = [1, 1]} : vector<8x384xf32> to vector<8x128xf32>
    %203 = arith.addf %201, %202 : vector<8x128xf32>
    %204 = arith.negf %203 : vector<8x128xf32>
    %205 = math.exp %204 : vector<8x128xf32>
    %cst_67 = arith.constant 1.000000e+00 : f32
    %206 = vector.broadcast %cst_67 : f32 to vector<8x128xf32>
    %207 = arith.addf %206, %205 : vector<8x128xf32>
    %208 = arith.divf %206, %207 : vector<8x128xf32>
    %209 = vector.extract_strided_slice %199 {offsets = [0, 128], sizes = [8, 128], strides = [1, 1]} : vector<8x384xf32> to vector<8x128xf32>
    %210 = vector.extract_strided_slice %200 {offsets = [0, 128], sizes = [8, 128], strides = [1, 1]} : vector<8x384xf32> to vector<8x128xf32>
    %211 = arith.addf %209, %210 : vector<8x128xf32>
    %212 = arith.negf %211 : vector<8x128xf32>
    %213 = math.exp %212 : vector<8x128xf32>
    %cst_68 = arith.constant 1.000000e+00 : f32
    %214 = vector.broadcast %cst_68 : f32 to vector<8x128xf32>
    %215 = arith.addf %214, %213 : vector<8x128xf32>
    %216 = arith.divf %214, %215 : vector<8x128xf32>
    %217 = vector.extract_strided_slice %199 {offsets = [0, 256], sizes = [8, 128], strides = [1, 1]} : vector<8x384xf32> to vector<8x128xf32>
    %218 = vector.extract_strided_slice %200 {offsets = [0, 256], sizes = [8, 128], strides = [1, 1]} : vector<8x384xf32> to vector<8x128xf32>
    %219 = vector.broadcast %6 : vector<1x128xf32> to vector<8x128xf32>
    %220 = arith.addf %218, %219 : vector<8x128xf32>
    %221 = arith.mulf %208, %220 : vector<8x128xf32>
    %222 = arith.addf %217, %221 : vector<8x128xf32>
    %223 = math.tanh %222 : vector<8x128xf32>
    %cst_69 = arith.constant 1.000000e+00 : f32
    %224 = vector.broadcast %cst_69 : f32 to vector<8x128xf32>
    %225 = arith.subf %224, %216 : vector<8x128xf32>
    %226 = arith.mulf %225, %223 : vector<8x128xf32>
    %227 = arith.mulf %216, %155 : vector<8x128xf32>
    %228 = arith.addf %226, %227 : vector<8x128xf32>
    %c3_i32 = arith.constant 3 : i32
    %c0_70 = arith.constant 0 : index
    %c0_71 = arith.constant 0 : index
    %229 = vector.load %arg8[%c0_70, %c0_71] : memref<16x256xf32, #tpu.memory_space<vmem>>, vector<8x128xf32>
    tpu.vector_store %arg8[%c0_70, %c0_71], %198 {strides = array<i32>} : memref<16x256xf32, #tpu.memory_space<vmem>>, vector<8x128xf32>,
    %c8_72 = arith.constant 8 : index
    %c128_73 = arith.constant 128 : index
    %230 = vector.load %arg8[%c8_72, %c128_73] : memref<16x256xf32, #tpu.memory_space<vmem>>, vector<8x128xf32>
    tpu.vector_store %arg8[%c8_72, %c128_73], %228 {strides = array<i32>} : memref<16x256xf32, #tpu.memory_space<vmem>>, vector<8x128xf32>,
    %c0_74 = arith.constant 0 : index
    %c0_75 = arith.constant 0 : index
    %231 = vector.load %arg8[%c0_74, %c0_75] : memref<16x256xf32, #tpu.memory_space<vmem>>, vector<16x256xf32>
    %232 = arith.truncf %231 : vector<16x256xf32> to vector<16x256xbf16>
    %c0_76 = arith.constant 0 : index
    %c0_77 = arith.constant 0 : index
    %233 = vector.load %arg2[%c0_76, %c0_77] : memref<256x384xbf16, #tpu.memory_space<vmem>>, vector<256x384xbf16>
    %cst_78 = arith.constant dense<0.000000e+00> : vector<16x384xf32>
    %234 = tpu.matmul %232, %233, %cst_78 {dimension_numbers = #tpu.dot_dimension_numbers<[1], [0], [0], [1], [0, 0, 1, 1], [], []>} : vector<16x256xbf16>, vector<256x384xbf16>, vector<16x384xf32> -> vector<16x384xf32>
    %235 = arith.index_cast %c3_i32 : i32 to index
    %c0_79 = arith.constant 0 : index
    %c0_80 = arith.constant 0 : index
    %236 = vector.load %arg7[%235, %c0_79, %c0_80] : memref<8x8x768xf32, #tpu.memory_space<vmem>>, vector<1x8x768xf32>
    %237 = vector.shape_cast %236 : vector<1x8x768xf32> to vector<8x768xf32>
    %c7_i32_81 = arith.constant 7 : i32
    %238 = arith.subi %c7_i32_81, %c3_i32 : i32
    %239 = arith.index_cast %238 : i32 to index
    %c0_82 = arith.constant 0 : index
    %c0_83 = arith.constant 0 : index
    %240 = vector.load %arg7[%239, %c0_82, %c0_83] : memref<8x8x768xf32, #tpu.memory_space<vmem>>, vector<1x8x768xf32>
    %241 = vector.shape_cast %240 : vector<1x8x768xf32> to vector<8x768xf32>
    %242 = vector.extract_strided_slice %237 {offsets = [0, 0], sizes = [8, 384], strides = [1, 1]} : vector<8x768xf32> to vector<8x384xf32>
    %243 = vector.extract_strided_slice %234 {offsets = [0, 0], sizes = [8, 384], strides = [1, 1]} : vector<16x384xf32> to vector<8x384xf32>
    %244 = vector.extract_strided_slice %242 {offsets = [0, 0], sizes = [8, 128], strides = [1, 1]} : vector<8x384xf32> to vector<8x128xf32>
    %245 = vector.extract_strided_slice %243 {offsets = [0, 0], sizes = [8, 128], strides = [1, 1]} : vector<8x384xf32> to vector<8x128xf32>
    %246 = arith.addf %244, %245 : vector<8x128xf32>
    %247 = arith.negf %246 : vector<8x128xf32>
    %248 = math.exp %247 : vector<8x128xf32>
    %cst_84 = arith.constant 1.000000e+00 : f32
    %249 = vector.broadcast %cst_84 : f32 to vector<8x128xf32>
    %250 = arith.addf %249, %248 : vector<8x128xf32>
    %251 = arith.divf %249, %250 : vector<8x128xf32>
    %252 = vector.extract_strided_slice %242 {offsets = [0, 128], sizes = [8, 128], strides = [1, 1]} : vector<8x384xf32> to vector<8x128xf32>
    %253 = vector.extract_strided_slice %243 {offsets = [0, 128], sizes = [8, 128], strides = [1, 1]} : vector<8x384xf32> to vector<8x128xf32>
    %254 = arith.addf %252, %253 : vector<8x128xf32>
    %255 = arith.negf %254 : vector<8x128xf32>
    %256 = math.exp %255 : vector<8x128xf32>
    %cst_85 = arith.constant 1.000000e+00 : f32
    %257 = vector.broadcast %cst_85 : f32 to vector<8x128xf32>
    %258 = arith.addf %257, %256 : vector<8x128xf32>
    %259 = arith.divf %257, %258 : vector<8x128xf32>
    %260 = vector.extract_strided_slice %242 {offsets = [0, 256], sizes = [8, 128], strides = [1, 1]} : vector<8x384xf32> to vector<8x128xf32>
    %261 = vector.extract_strided_slice %243 {offsets = [0, 256], sizes = [8, 128], strides = [1, 1]} : vector<8x384xf32> to vector<8x128xf32>
    %262 = vector.broadcast %5 : vector<1x128xf32> to vector<8x128xf32>
    %263 = arith.addf %261, %262 : vector<8x128xf32>
    %264 = arith.mulf %251, %263 : vector<8x128xf32>
    %265 = arith.addf %260, %264 : vector<8x128xf32>
    %266 = math.tanh %265 : vector<8x128xf32>
    %cst_86 = arith.constant 1.000000e+00 : f32
    %267 = vector.broadcast %cst_86 : f32 to vector<8x128xf32>
    %268 = arith.subf %267, %259 : vector<8x128xf32>
    %269 = arith.mulf %268, %266 : vector<8x128xf32>
    %270 = arith.mulf %259, %198 : vector<8x128xf32>
    %271 = arith.addf %269, %270 : vector<8x128xf32>
    %272 = vector.extract_strided_slice %241 {offsets = [0, 384], sizes = [8, 384], strides = [1, 1]} : vector<8x768xf32> to vector<8x384xf32>
    %273 = vector.extract_strided_slice %234 {offsets = [8, 0], sizes = [8, 384], strides = [1, 1]} : vector<16x384xf32> to vector<8x384xf32>
    %274 = vector.extract_strided_slice %272 {offsets = [0, 0], sizes = [8, 128], strides = [1, 1]} : vector<8x384xf32> to vector<8x128xf32>
    %275 = vector.extract_strided_slice %273 {offsets = [0, 0], sizes = [8, 128], strides = [1, 1]} : vector<8x384xf32> to vector<8x128xf32>
    %276 = arith.addf %274, %275 : vector<8x128xf32>
    %277 = arith.negf %276 : vector<8x128xf32>
    %278 = math.exp %277 : vector<8x128xf32>
    %cst_87 = arith.constant 1.000000e+00 : f32
    %279 = vector.broadcast %cst_87 : f32 to vector<8x128xf32>
    %280 = arith.addf %279, %278 : vector<8x128xf32>
    %281 = arith.divf %279, %280 : vector<8x128xf32>
    %282 = vector.extract_strided_slice %272 {offsets = [0, 128], sizes = [8, 128], strides = [1, 1]} : vector<8x384xf32> to vector<8x128xf32>
    %283 = vector.extract_strided_slice %273 {offsets = [0, 128], sizes = [8, 128], strides = [1, 1]} : vector<8x384xf32> to vector<8x128xf32>
    %284 = arith.addf %282, %283 : vector<8x128xf32>
    %285 = arith.negf %284 : vector<8x128xf32>
    %286 = math.exp %285 : vector<8x128xf32>
    %cst_88 = arith.constant 1.000000e+00 : f32
    %287 = vector.broadcast %cst_88 : f32 to vector<8x128xf32>
    %288 = arith.addf %287, %286 : vector<8x128xf32>
    %289 = arith.divf %287, %288 : vector<8x128xf32>
    %290 = vector.extract_strided_slice %272 {offsets = [0, 256], sizes = [8, 128], strides = [1, 1]} : vector<8x384xf32> to vector<8x128xf32>
    %291 = vector.extract_strided_slice %273 {offsets = [0, 256], sizes = [8, 128], strides = [1, 1]} : vector<8x384xf32> to vector<8x128xf32>
    %292 = vector.broadcast %6 : vector<1x128xf32> to vector<8x128xf32>
    %293 = arith.addf %291, %292 : vector<8x128xf32>
    %294 = arith.mulf %281, %293 : vector<8x128xf32>
    %295 = arith.addf %290, %294 : vector<8x128xf32>
    %296 = math.tanh %295 : vector<8x128xf32>
    %cst_89 = arith.constant 1.000000e+00 : f32
    %297 = vector.broadcast %cst_89 : f32 to vector<8x128xf32>
    %298 = arith.subf %297, %289 : vector<8x128xf32>
    %299 = arith.mulf %298, %296 : vector<8x128xf32>
    %300 = arith.mulf %289, %228 : vector<8x128xf32>
    %301 = arith.addf %299, %300 : vector<8x128xf32>
    %c4_i32 = arith.constant 4 : i32
    %c0_90 = arith.constant 0 : index
    %c0_91 = arith.constant 0 : index
    %302 = vector.load %arg8[%c0_90, %c0_91] : memref<16x256xf32, #tpu.memory_space<vmem>>, vector<8x128xf32>
    tpu.vector_store %arg8[%c0_90, %c0_91], %271 {strides = array<i32>} : memref<16x256xf32, #tpu.memory_space<vmem>>, vector<8x128xf32>,
    %c8_92 = arith.constant 8 : index
    %c128_93 = arith.constant 128 : index
    %303 = vector.load %arg8[%c8_92, %c128_93] : memref<16x256xf32, #tpu.memory_space<vmem>>, vector<8x128xf32>
    tpu.vector_store %arg8[%c8_92, %c128_93], %301 {strides = array<i32>} : memref<16x256xf32, #tpu.memory_space<vmem>>, vector<8x128xf32>,
    %c0_94 = arith.constant 0 : index
    %c0_95 = arith.constant 0 : index
    %304 = vector.load %arg8[%c0_94, %c0_95] : memref<16x256xf32, #tpu.memory_space<vmem>>, vector<16x256xf32>
    %305 = arith.truncf %304 : vector<16x256xf32> to vector<16x256xbf16>
    %c0_96 = arith.constant 0 : index
    %c0_97 = arith.constant 0 : index
    %306 = vector.load %arg2[%c0_96, %c0_97] : memref<256x384xbf16, #tpu.memory_space<vmem>>, vector<256x384xbf16>
    %cst_98 = arith.constant dense<0.000000e+00> : vector<16x384xf32>
    %307 = tpu.matmul %305, %306, %cst_98 {dimension_numbers = #tpu.dot_dimension_numbers<[1], [0], [0], [1], [0, 0, 1, 1], [], []>} : vector<16x256xbf16>, vector<256x384xbf16>, vector<16x384xf32> -> vector<16x384xf32>
    %308 = arith.index_cast %c4_i32 : i32 to index
    %c0_99 = arith.constant 0 : index
    %c0_100 = arith.constant 0 : index
    %309 = vector.load %arg7[%308, %c0_99, %c0_100] : memref<8x8x768xf32, #tpu.memory_space<vmem>>, vector<1x8x768xf32>
    %310 = vector.shape_cast %309 : vector<1x8x768xf32> to vector<8x768xf32>
    %c7_i32_101 = arith.constant 7 : i32
    %311 = arith.subi %c7_i32_101, %c4_i32 : i32
    %312 = arith.index_cast %311 : i32 to index
    %c0_102 = arith.constant 0 : index
    %c0_103 = arith.constant 0 : index
    %313 = vector.load %arg7[%312, %c0_102, %c0_103] : memref<8x8x768xf32, #tpu.memory_space<vmem>>, vector<1x8x768xf32>
    %314 = vector.shape_cast %313 : vector<1x8x768xf32> to vector<8x768xf32>
    %315 = vector.extract_strided_slice %310 {offsets = [0, 0], sizes = [8, 384], strides = [1, 1]} : vector<8x768xf32> to vector<8x384xf32>
    %316 = vector.extract_strided_slice %307 {offsets = [0, 0], sizes = [8, 384], strides = [1, 1]} : vector<16x384xf32> to vector<8x384xf32>
    %317 = vector.extract_strided_slice %315 {offsets = [0, 0], sizes = [8, 128], strides = [1, 1]} : vector<8x384xf32> to vector<8x128xf32>
    %318 = vector.extract_strided_slice %316 {offsets = [0, 0], sizes = [8, 128], strides = [1, 1]} : vector<8x384xf32> to vector<8x128xf32>
    %319 = arith.addf %317, %318 : vector<8x128xf32>
    %320 = arith.negf %319 : vector<8x128xf32>
    %321 = math.exp %320 : vector<8x128xf32>
    %cst_104 = arith.constant 1.000000e+00 : f32
    %322 = vector.broadcast %cst_104 : f32 to vector<8x128xf32>
    %323 = arith.addf %322, %321 : vector<8x128xf32>
    %324 = arith.divf %322, %323 : vector<8x128xf32>
    %325 = vector.extract_strided_slice %315 {offsets = [0, 128], sizes = [8, 128], strides = [1, 1]} : vector<8x384xf32> to vector<8x128xf32>
    %326 = vector.extract_strided_slice %316 {offsets = [0, 128], sizes = [8, 128], strides = [1, 1]} : vector<8x384xf32> to vector<8x128xf32>
    %327 = arith.addf %325, %326 : vector<8x128xf32>
    %328 = arith.negf %327 : vector<8x128xf32>
    %329 = math.exp %328 : vector<8x128xf32>
    %cst_105 = arith.constant 1.000000e+00 : f32
    %330 = vector.broadcast %cst_105 : f32 to vector<8x128xf32>
    %331 = arith.addf %330, %329 : vector<8x128xf32>
    %332 = arith.divf %330, %331 : vector<8x128xf32>
    %333 = vector.extract_strided_slice %315 {offsets = [0, 256], sizes = [8, 128], strides = [1, 1]} : vector<8x384xf32> to vector<8x128xf32>
    %334 = vector.extract_strided_slice %316 {offsets = [0, 256], sizes = [8, 128], strides = [1, 1]} : vector<8x384xf32> to vector<8x128xf32>
    %335 = vector.broadcast %5 : vector<1x128xf32> to vector<8x128xf32>
    %336 = arith.addf %334, %335 : vector<8x128xf32>
    %337 = arith.mulf %324, %336 : vector<8x128xf32>
    %338 = arith.addf %333, %337 : vector<8x128xf32>
    %339 = math.tanh %338 : vector<8x128xf32>
    %cst_106 = arith.constant 1.000000e+00 : f32
    %340 = vector.broadcast %cst_106 : f32 to vector<8x128xf32>
    %341 = arith.subf %340, %332 : vector<8x128xf32>
    %342 = arith.mulf %341, %339 : vector<8x128xf32>
    %343 = arith.mulf %332, %271 : vector<8x128xf32>
    %344 = arith.addf %342, %343 : vector<8x128xf32>
    %345 = vector.extract_strided_slice %314 {offsets = [0, 384], sizes = [8, 384], strides = [1, 1]} : vector<8x768xf32> to vector<8x384xf32>
    %346 = vector.extract_strided_slice %307 {offsets = [8, 0], sizes = [8, 384], strides = [1, 1]} : vector<16x384xf32> to vector<8x384xf32>
    %347 = vector.extract_strided_slice %345 {offsets = [0, 0], sizes = [8, 128], strides = [1, 1]} : vector<8x384xf32> to vector<8x128xf32>
    %348 = vector.extract_strided_slice %346 {offsets = [0, 0], sizes = [8, 128], strides = [1, 1]} : vector<8x384xf32> to vector<8x128xf32>
    %349 = arith.addf %347, %348 : vector<8x128xf32>
    %350 = arith.negf %349 : vector<8x128xf32>
    %351 = math.exp %350 : vector<8x128xf32>
    %cst_107 = arith.constant 1.000000e+00 : f32
    %352 = vector.broadcast %cst_107 : f32 to vector<8x128xf32>
    %353 = arith.addf %352, %351 : vector<8x128xf32>
    %354 = arith.divf %352, %353 : vector<8x128xf32>
    %355 = vector.extract_strided_slice %345 {offsets = [0, 128], sizes = [8, 128], strides = [1, 1]} : vector<8x384xf32> to vector<8x128xf32>
    %356 = vector.extract_strided_slice %346 {offsets = [0, 128], sizes = [8, 128], strides = [1, 1]} : vector<8x384xf32> to vector<8x128xf32>
    %357 = arith.addf %355, %356 : vector<8x128xf32>
    %358 = arith.negf %357 : vector<8x128xf32>
    %359 = math.exp %358 : vector<8x128xf32>
    %cst_108 = arith.constant 1.000000e+00 : f32
    %360 = vector.broadcast %cst_108 : f32 to vector<8x128xf32>
    %361 = arith.addf %360, %359 : vector<8x128xf32>
    %362 = arith.divf %360, %361 : vector<8x128xf32>
    %363 = vector.extract_strided_slice %345 {offsets = [0, 256], sizes = [8, 128], strides = [1, 1]} : vector<8x384xf32> to vector<8x128xf32>
    %364 = vector.extract_strided_slice %346 {offsets = [0, 256], sizes = [8, 128], strides = [1, 1]} : vector<8x384xf32> to vector<8x128xf32>
    %365 = vector.broadcast %6 : vector<1x128xf32> to vector<8x128xf32>
    %366 = arith.addf %364, %365 : vector<8x128xf32>
    %367 = arith.mulf %354, %366 : vector<8x128xf32>
    %368 = arith.addf %363, %367 : vector<8x128xf32>
    %369 = math.tanh %368 : vector<8x128xf32>
    %cst_109 = arith.constant 1.000000e+00 : f32
    %370 = vector.broadcast %cst_109 : f32 to vector<8x128xf32>
    %371 = arith.subf %370, %362 : vector<8x128xf32>
    %372 = arith.mulf %371, %369 : vector<8x128xf32>
    %373 = arith.mulf %362, %301 : vector<8x128xf32>
    %374 = arith.addf %372, %373 : vector<8x128xf32>
    %c5_i32 = arith.constant 5 : i32
    %c0_110 = arith.constant 0 : index
    %c0_111 = arith.constant 0 : index
    %375 = vector.load %arg8[%c0_110, %c0_111] : memref<16x256xf32, #tpu.memory_space<vmem>>, vector<8x128xf32>
    tpu.vector_store %arg8[%c0_110, %c0_111], %344 {strides = array<i32>} : memref<16x256xf32, #tpu.memory_space<vmem>>, vector<8x128xf32>,
    %c8_112 = arith.constant 8 : index
    %c128_113 = arith.constant 128 : index
    %376 = vector.load %arg8[%c8_112, %c128_113] : memref<16x256xf32, #tpu.memory_space<vmem>>, vector<8x128xf32>
    tpu.vector_store %arg8[%c8_112, %c128_113], %374 {strides = array<i32>} : memref<16x256xf32, #tpu.memory_space<vmem>>, vector<8x128xf32>,
    %c0_114 = arith.constant 0 : index
    %c0_115 = arith.constant 0 : index
    %377 = vector.load %arg8[%c0_114, %c0_115] : memref<16x256xf32, #tpu.memory_space<vmem>>, vector<16x256xf32>
    %378 = arith.truncf %377 : vector<16x256xf32> to vector<16x256xbf16>
    %c0_116 = arith.constant 0 : index
    %c0_117 = arith.constant 0 : index
    %379 = vector.load %arg2[%c0_116, %c0_117] : memref<256x384xbf16, #tpu.memory_space<vmem>>, vector<256x384xbf16>
    %cst_118 = arith.constant dense<0.000000e+00> : vector<16x384xf32>
    %380 = tpu.matmul %378, %379, %cst_118 {dimension_numbers = #tpu.dot_dimension_numbers<[1], [0], [0], [1], [0, 0, 1, 1], [], []>} : vector<16x256xbf16>, vector<256x384xbf16>, vector<16x384xf32> -> vector<16x384xf32>
    %381 = arith.index_cast %c5_i32 : i32 to index
    %c0_119 = arith.constant 0 : index
    %c0_120 = arith.constant 0 : index
    %382 = vector.load %arg7[%381, %c0_119, %c0_120] : memref<8x8x768xf32, #tpu.memory_space<vmem>>, vector<1x8x768xf32>
    %383 = vector.shape_cast %382 : vector<1x8x768xf32> to vector<8x768xf32>
    %c7_i32_121 = arith.constant 7 : i32
    %384 = arith.subi %c7_i32_121, %c5_i32 : i32
    %385 = arith.index_cast %384 : i32 to index
    %c0_122 = arith.constant 0 : index
    %c0_123 = arith.constant 0 : index
    %386 = vector.load %arg7[%385, %c0_122, %c0_123] : memref<8x8x768xf32, #tpu.memory_space<vmem>>, vector<1x8x768xf32>
    %387 = vector.shape_cast %386 : vector<1x8x768xf32> to vector<8x768xf32>
    %388 = vector.extract_strided_slice %383 {offsets = [0, 0], sizes = [8, 384], strides = [1, 1]} : vector<8x768xf32> to vector<8x384xf32>
    %389 = vector.extract_strided_slice %380 {offsets = [0, 0], sizes = [8, 384], strides = [1, 1]} : vector<16x384xf32> to vector<8x384xf32>
    %390 = vector.extract_strided_slice %388 {offsets = [0, 0], sizes = [8, 128], strides = [1, 1]} : vector<8x384xf32> to vector<8x128xf32>
    %391 = vector.extract_strided_slice %389 {offsets = [0, 0], sizes = [8, 128], strides = [1, 1]} : vector<8x384xf32> to vector<8x128xf32>
    %392 = arith.addf %390, %391 : vector<8x128xf32>
    %393 = arith.negf %392 : vector<8x128xf32>
    %394 = math.exp %393 : vector<8x128xf32>
    %cst_124 = arith.constant 1.000000e+00 : f32
    %395 = vector.broadcast %cst_124 : f32 to vector<8x128xf32>
    %396 = arith.addf %395, %394 : vector<8x128xf32>
    %397 = arith.divf %395, %396 : vector<8x128xf32>
    %398 = vector.extract_strided_slice %388 {offsets = [0, 128], sizes = [8, 128], strides = [1, 1]} : vector<8x384xf32> to vector<8x128xf32>
    %399 = vector.extract_strided_slice %389 {offsets = [0, 128], sizes = [8, 128], strides = [1, 1]} : vector<8x384xf32> to vector<8x128xf32>
    %400 = arith.addf %398, %399 : vector<8x128xf32>
    %401 = arith.negf %400 : vector<8x128xf32>
    %402 = math.exp %401 : vector<8x128xf32>
    %cst_125 = arith.constant 1.000000e+00 : f32
    %403 = vector.broadcast %cst_125 : f32 to vector<8x128xf32>
    %404 = arith.addf %403, %402 : vector<8x128xf32>
    %405 = arith.divf %403, %404 : vector<8x128xf32>
    %406 = vector.extract_strided_slice %388 {offsets = [0, 256], sizes = [8, 128], strides = [1, 1]} : vector<8x384xf32> to vector<8x128xf32>
    %407 = vector.extract_strided_slice %389 {offsets = [0, 256], sizes = [8, 128], strides = [1, 1]} : vector<8x384xf32> to vector<8x128xf32>
    %408 = vector.broadcast %5 : vector<1x128xf32> to vector<8x128xf32>
    %409 = arith.addf %407, %408 : vector<8x128xf32>
    %410 = arith.mulf %397, %409 : vector<8x128xf32>
    %411 = arith.addf %406, %410 : vector<8x128xf32>
    %412 = math.tanh %411 : vector<8x128xf32>
    %cst_126 = arith.constant 1.000000e+00 : f32
    %413 = vector.broadcast %cst_126 : f32 to vector<8x128xf32>
    %414 = arith.subf %413, %405 : vector<8x128xf32>
    %415 = arith.mulf %414, %412 : vector<8x128xf32>
    %416 = arith.mulf %405, %344 : vector<8x128xf32>
    %417 = arith.addf %415, %416 : vector<8x128xf32>
    %418 = vector.extract_strided_slice %387 {offsets = [0, 384], sizes = [8, 384], strides = [1, 1]} : vector<8x768xf32> to vector<8x384xf32>
    %419 = vector.extract_strided_slice %380 {offsets = [8, 0], sizes = [8, 384], strides = [1, 1]} : vector<16x384xf32> to vector<8x384xf32>
    %420 = vector.extract_strided_slice %418 {offsets = [0, 0], sizes = [8, 128], strides = [1, 1]} : vector<8x384xf32> to vector<8x128xf32>
    %421 = vector.extract_strided_slice %419 {offsets = [0, 0], sizes = [8, 128], strides = [1, 1]} : vector<8x384xf32> to vector<8x128xf32>
    %422 = arith.addf %420, %421 : vector<8x128xf32>
    %423 = arith.negf %422 : vector<8x128xf32>
    %424 = math.exp %423 : vector<8x128xf32>
    %cst_127 = arith.constant 1.000000e+00 : f32
    %425 = vector.broadcast %cst_127 : f32 to vector<8x128xf32>
    %426 = arith.addf %425, %424 : vector<8x128xf32>
    %427 = arith.divf %425, %426 : vector<8x128xf32>
    %428 = vector.extract_strided_slice %418 {offsets = [0, 128], sizes = [8, 128], strides = [1, 1]} : vector<8x384xf32> to vector<8x128xf32>
    %429 = vector.extract_strided_slice %419 {offsets = [0, 128], sizes = [8, 128], strides = [1, 1]} : vector<8x384xf32> to vector<8x128xf32>
    %430 = arith.addf %428, %429 : vector<8x128xf32>
    %431 = arith.negf %430 : vector<8x128xf32>
    %432 = math.exp %431 : vector<8x128xf32>
    %cst_128 = arith.constant 1.000000e+00 : f32
    %433 = vector.broadcast %cst_128 : f32 to vector<8x128xf32>
    %434 = arith.addf %433, %432 : vector<8x128xf32>
    %435 = arith.divf %433, %434 : vector<8x128xf32>
    %436 = vector.extract_strided_slice %418 {offsets = [0, 256], sizes = [8, 128], strides = [1, 1]} : vector<8x384xf32> to vector<8x128xf32>
    %437 = vector.extract_strided_slice %419 {offsets = [0, 256], sizes = [8, 128], strides = [1, 1]} : vector<8x384xf32> to vector<8x128xf32>
    %438 = vector.broadcast %6 : vector<1x128xf32> to vector<8x128xf32>
    %439 = arith.addf %437, %438 : vector<8x128xf32>
    %440 = arith.mulf %427, %439 : vector<8x128xf32>
    %441 = arith.addf %436, %440 : vector<8x128xf32>
    %442 = math.tanh %441 : vector<8x128xf32>
    %cst_129 = arith.constant 1.000000e+00 : f32
    %443 = vector.broadcast %cst_129 : f32 to vector<8x128xf32>
    %444 = arith.subf %443, %435 : vector<8x128xf32>
    %445 = arith.mulf %444, %442 : vector<8x128xf32>
    %446 = arith.mulf %435, %374 : vector<8x128xf32>
    %447 = arith.addf %445, %446 : vector<8x128xf32>
    %c6_i32 = arith.constant 6 : i32
    %c0_130 = arith.constant 0 : index
    %c0_131 = arith.constant 0 : index
    %448 = vector.load %arg8[%c0_130, %c0_131] : memref<16x256xf32, #tpu.memory_space<vmem>>, vector<8x128xf32>
    tpu.vector_store %arg8[%c0_130, %c0_131], %417 {strides = array<i32>} : memref<16x256xf32, #tpu.memory_space<vmem>>, vector<8x128xf32>,
    %c8_132 = arith.constant 8 : index
    %c128_133 = arith.constant 128 : index
    %449 = vector.load %arg8[%c8_132, %c128_133] : memref<16x256xf32, #tpu.memory_space<vmem>>, vector<8x128xf32>
    tpu.vector_store %arg8[%c8_132, %c128_133], %447 {strides = array<i32>} : memref<16x256xf32, #tpu.memory_space<vmem>>, vector<8x128xf32>,
    %c0_134 = arith.constant 0 : index
    %c0_135 = arith.constant 0 : index
    %450 = vector.load %arg8[%c0_134, %c0_135] : memref<16x256xf32, #tpu.memory_space<vmem>>, vector<16x256xf32>
    %451 = arith.truncf %450 : vector<16x256xf32> to vector<16x256xbf16>
    %c0_136 = arith.constant 0 : index
    %c0_137 = arith.constant 0 : index
    %452 = vector.load %arg2[%c0_136, %c0_137] : memref<256x384xbf16, #tpu.memory_space<vmem>>, vector<256x384xbf16>
    %cst_138 = arith.constant dense<0.000000e+00> : vector<16x384xf32>
    %453 = tpu.matmul %451, %452, %cst_138 {dimension_numbers = #tpu.dot_dimension_numbers<[1], [0], [0], [1], [0, 0, 1, 1], [], []>} : vector<16x256xbf16>, vector<256x384xbf16>, vector<16x384xf32> -> vector<16x384xf32>
    %454 = arith.index_cast %c6_i32 : i32 to index
    %c0_139 = arith.constant 0 : index
    %c0_140 = arith.constant 0 : index
    %455 = vector.load %arg7[%454, %c0_139, %c0_140] : memref<8x8x768xf32, #tpu.memory_space<vmem>>, vector<1x8x768xf32>
    %456 = vector.shape_cast %455 : vector<1x8x768xf32> to vector<8x768xf32>
    %c7_i32_141 = arith.constant 7 : i32
    %457 = arith.subi %c7_i32_141, %c6_i32 : i32
    %458 = arith.index_cast %457 : i32 to index
    %c0_142 = arith.constant 0 : index
    %c0_143 = arith.constant 0 : index
    %459 = vector.load %arg7[%458, %c0_142, %c0_143] : memref<8x8x768xf32, #tpu.memory_space<vmem>>, vector<1x8x768xf32>
    %460 = vector.shape_cast %459 : vector<1x8x768xf32> to vector<8x768xf32>
    %461 = vector.extract_strided_slice %456 {offsets = [0, 0], sizes = [8, 384], strides = [1, 1]} : vector<8x768xf32> to vector<8x384xf32>
    %462 = vector.extract_strided_slice %453 {offsets = [0, 0], sizes = [8, 384], strides = [1, 1]} : vector<16x384xf32> to vector<8x384xf32>
    %463 = vector.extract_strided_slice %461 {offsets = [0, 0], sizes = [8, 128], strides = [1, 1]} : vector<8x384xf32> to vector<8x128xf32>
    %464 = vector.extract_strided_slice %462 {offsets = [0, 0], sizes = [8, 128], strides = [1, 1]} : vector<8x384xf32> to vector<8x128xf32>
    %465 = arith.addf %463, %464 : vector<8x128xf32>
    %466 = arith.negf %465 : vector<8x128xf32>
    %467 = math.exp %466 : vector<8x128xf32>
    %cst_144 = arith.constant 1.000000e+00 : f32
    %468 = vector.broadcast %cst_144 : f32 to vector<8x128xf32>
    %469 = arith.addf %468, %467 : vector<8x128xf32>
    %470 = arith.divf %468, %469 : vector<8x128xf32>
    %471 = vector.extract_strided_slice %461 {offsets = [0, 128], sizes = [8, 128], strides = [1, 1]} : vector<8x384xf32> to vector<8x128xf32>
    %472 = vector.extract_strided_slice %462 {offsets = [0, 128], sizes = [8, 128], strides = [1, 1]} : vector<8x384xf32> to vector<8x128xf32>
    %473 = arith.addf %471, %472 : vector<8x128xf32>
    %474 = arith.negf %473 : vector<8x128xf32>
    %475 = math.exp %474 : vector<8x128xf32>
    %cst_145 = arith.constant 1.000000e+00 : f32
    %476 = vector.broadcast %cst_145 : f32 to vector<8x128xf32>
    %477 = arith.addf %476, %475 : vector<8x128xf32>
    %478 = arith.divf %476, %477 : vector<8x128xf32>
    %479 = vector.extract_strided_slice %461 {offsets = [0, 256], sizes = [8, 128], strides = [1, 1]} : vector<8x384xf32> to vector<8x128xf32>
    %480 = vector.extract_strided_slice %462 {offsets = [0, 256], sizes = [8, 128], strides = [1, 1]} : vector<8x384xf32> to vector<8x128xf32>
    %481 = vector.broadcast %5 : vector<1x128xf32> to vector<8x128xf32>
    %482 = arith.addf %480, %481 : vector<8x128xf32>
    %483 = arith.mulf %470, %482 : vector<8x128xf32>
    %484 = arith.addf %479, %483 : vector<8x128xf32>
    %485 = math.tanh %484 : vector<8x128xf32>
    %cst_146 = arith.constant 1.000000e+00 : f32
    %486 = vector.broadcast %cst_146 : f32 to vector<8x128xf32>
    %487 = arith.subf %486, %478 : vector<8x128xf32>
    %488 = arith.mulf %487, %485 : vector<8x128xf32>
    %489 = arith.mulf %478, %417 : vector<8x128xf32>
    %490 = arith.addf %488, %489 : vector<8x128xf32>
    %491 = vector.extract_strided_slice %460 {offsets = [0, 384], sizes = [8, 384], strides = [1, 1]} : vector<8x768xf32> to vector<8x384xf32>
    %492 = vector.extract_strided_slice %453 {offsets = [8, 0], sizes = [8, 384], strides = [1, 1]} : vector<16x384xf32> to vector<8x384xf32>
    %493 = vector.extract_strided_slice %491 {offsets = [0, 0], sizes = [8, 128], strides = [1, 1]} : vector<8x384xf32> to vector<8x128xf32>
    %494 = vector.extract_strided_slice %492 {offsets = [0, 0], sizes = [8, 128], strides = [1, 1]} : vector<8x384xf32> to vector<8x128xf32>
    %495 = arith.addf %493, %494 : vector<8x128xf32>
    %496 = arith.negf %495 : vector<8x128xf32>
    %497 = math.exp %496 : vector<8x128xf32>
    %cst_147 = arith.constant 1.000000e+00 : f32
    %498 = vector.broadcast %cst_147 : f32 to vector<8x128xf32>
    %499 = arith.addf %498, %497 : vector<8x128xf32>
    %500 = arith.divf %498, %499 : vector<8x128xf32>
    %501 = vector.extract_strided_slice %491 {offsets = [0, 128], sizes = [8, 128], strides = [1, 1]} : vector<8x384xf32> to vector<8x128xf32>
    %502 = vector.extract_strided_slice %492 {offsets = [0, 128], sizes = [8, 128], strides = [1, 1]} : vector<8x384xf32> to vector<8x128xf32>
    %503 = arith.addf %501, %502 : vector<8x128xf32>
    %504 = arith.negf %503 : vector<8x128xf32>
    %505 = math.exp %504 : vector<8x128xf32>
    %cst_148 = arith.constant 1.000000e+00 : f32
    %506 = vector.broadcast %cst_148 : f32 to vector<8x128xf32>
    %507 = arith.addf %506, %505 : vector<8x128xf32>
    %508 = arith.divf %506, %507 : vector<8x128xf32>
    %509 = vector.extract_strided_slice %491 {offsets = [0, 256], sizes = [8, 128], strides = [1, 1]} : vector<8x384xf32> to vector<8x128xf32>
    %510 = vector.extract_strided_slice %492 {offsets = [0, 256], sizes = [8, 128], strides = [1, 1]} : vector<8x384xf32> to vector<8x128xf32>
    %511 = vector.broadcast %6 : vector<1x128xf32> to vector<8x128xf32>
    %512 = arith.addf %510, %511 : vector<8x128xf32>
    %513 = arith.mulf %500, %512 : vector<8x128xf32>
    %514 = arith.addf %509, %513 : vector<8x128xf32>
    %515 = math.tanh %514 : vector<8x128xf32>
    %cst_149 = arith.constant 1.000000e+00 : f32
    %516 = vector.broadcast %cst_149 : f32 to vector<8x128xf32>
    %517 = arith.subf %516, %508 : vector<8x128xf32>
    %518 = arith.mulf %517, %515 : vector<8x128xf32>
    %519 = arith.mulf %508, %447 : vector<8x128xf32>
    %520 = arith.addf %518, %519 : vector<8x128xf32>
    %c7_i32_150 = arith.constant 7 : i32
    %c0_151 = arith.constant 0 : index
    %c0_152 = arith.constant 0 : index
    %521 = vector.load %arg8[%c0_151, %c0_152] : memref<16x256xf32, #tpu.memory_space<vmem>>, vector<8x128xf32>
    tpu.vector_store %arg8[%c0_151, %c0_152], %490 {strides = array<i32>} : memref<16x256xf32, #tpu.memory_space<vmem>>, vector<8x128xf32>,
    %c8_153 = arith.constant 8 : index
    %c128_154 = arith.constant 128 : index
    %522 = vector.load %arg8[%c8_153, %c128_154] : memref<16x256xf32, #tpu.memory_space<vmem>>, vector<8x128xf32>
    tpu.vector_store %arg8[%c8_153, %c128_154], %520 {strides = array<i32>} : memref<16x256xf32, #tpu.memory_space<vmem>>, vector<8x128xf32>,
    %c0_155 = arith.constant 0 : index
    %c0_156 = arith.constant 0 : index
    %523 = vector.load %arg8[%c0_155, %c0_156] : memref<16x256xf32, #tpu.memory_space<vmem>>, vector<16x256xf32>
    %524 = arith.truncf %523 : vector<16x256xf32> to vector<16x256xbf16>
    %c0_157 = arith.constant 0 : index
    %c0_158 = arith.constant 0 : index
    %525 = vector.load %arg2[%c0_157, %c0_158] : memref<256x384xbf16, #tpu.memory_space<vmem>>, vector<256x384xbf16>
    %cst_159 = arith.constant dense<0.000000e+00> : vector<16x384xf32>
    %526 = tpu.matmul %524, %525, %cst_159 {dimension_numbers = #tpu.dot_dimension_numbers<[1], [0], [0], [1], [0, 0, 1, 1], [], []>} : vector<16x256xbf16>, vector<256x384xbf16>, vector<16x384xf32> -> vector<16x384xf32>
    %527 = arith.index_cast %c7_i32_150 : i32 to index
    %c0_160 = arith.constant 0 : index
    %c0_161 = arith.constant 0 : index
    %528 = vector.load %arg7[%527, %c0_160, %c0_161] : memref<8x8x768xf32, #tpu.memory_space<vmem>>, vector<1x8x768xf32>
    %529 = vector.shape_cast %528 : vector<1x8x768xf32> to vector<8x768xf32>
    %c7_i32_162 = arith.constant 7 : i32
    %530 = arith.subi %c7_i32_162, %c7_i32_150 : i32
    %531 = arith.index_cast %530 : i32 to index
    %c0_163 = arith.constant 0 : index
    %c0_164 = arith.constant 0 : index
    %532 = vector.load %arg7[%531, %c0_163, %c0_164] : memref<8x8x768xf32, #tpu.memory_space<vmem>>, vector<1x8x768xf32>
    %533 = vector.shape_cast %532 : vector<1x8x768xf32> to vector<8x768xf32>
    %534 = vector.extract_strided_slice %529 {offsets = [0, 0], sizes = [8, 384], strides = [1, 1]} : vector<8x768xf32> to vector<8x384xf32>
    %535 = vector.extract_strided_slice %526 {offsets = [0, 0], sizes = [8, 384], strides = [1, 1]} : vector<16x384xf32> to vector<8x384xf32>
    %536 = vector.extract_strided_slice %534 {offsets = [0, 0], sizes = [8, 128], strides = [1, 1]} : vector<8x384xf32> to vector<8x128xf32>
    %537 = vector.extract_strided_slice %535 {offsets = [0, 0], sizes = [8, 128], strides = [1, 1]} : vector<8x384xf32> to vector<8x128xf32>
    %538 = arith.addf %536, %537 : vector<8x128xf32>
    %539 = arith.negf %538 : vector<8x128xf32>
    %540 = math.exp %539 : vector<8x128xf32>
    %cst_165 = arith.constant 1.000000e+00 : f32
    %541 = vector.broadcast %cst_165 : f32 to vector<8x128xf32>
    %542 = arith.addf %541, %540 : vector<8x128xf32>
    %543 = arith.divf %541, %542 : vector<8x128xf32>
    %544 = vector.extract_strided_slice %534 {offsets = [0, 128], sizes = [8, 128], strides = [1, 1]} : vector<8x384xf32> to vector<8x128xf32>
    %545 = vector.extract_strided_slice %535 {offsets = [0, 128], sizes = [8, 128], strides = [1, 1]} : vector<8x384xf32> to vector<8x128xf32>
    %546 = arith.addf %544, %545 : vector<8x128xf32>
    %547 = arith.negf %546 : vector<8x128xf32>
    %548 = math.exp %547 : vector<8x128xf32>
    %cst_166 = arith.constant 1.000000e+00 : f32
    %549 = vector.broadcast %cst_166 : f32 to vector<8x128xf32>
    %550 = arith.addf %549, %548 : vector<8x128xf32>
    %551 = arith.divf %549, %550 : vector<8x128xf32>
    %552 = vector.extract_strided_slice %534 {offsets = [0, 256], sizes = [8, 128], strides = [1, 1]} : vector<8x384xf32> to vector<8x128xf32>
    %553 = vector.extract_strided_slice %535 {offsets = [0, 256], sizes = [8, 128], strides = [1, 1]} : vector<8x384xf32> to vector<8x128xf32>
    %554 = vector.broadcast %5 : vector<1x128xf32> to vector<8x128xf32>
    %555 = arith.addf %553, %554 : vector<8x128xf32>
    %556 = arith.mulf %543, %555 : vector<8x128xf32>
    %557 = arith.addf %552, %556 : vector<8x128xf32>
    %558 = math.tanh %557 : vector<8x128xf32>
    %cst_167 = arith.constant 1.000000e+00 : f32
    %559 = vector.broadcast %cst_167 : f32 to vector<8x128xf32>
    %560 = arith.subf %559, %551 : vector<8x128xf32>
    %561 = arith.mulf %560, %558 : vector<8x128xf32>
    %562 = arith.mulf %551, %490 : vector<8x128xf32>
    %563 = arith.addf %561, %562 : vector<8x128xf32>
    %564 = vector.extract_strided_slice %533 {offsets = [0, 384], sizes = [8, 384], strides = [1, 1]} : vector<8x768xf32> to vector<8x384xf32>
    %565 = vector.extract_strided_slice %526 {offsets = [8, 0], sizes = [8, 384], strides = [1, 1]} : vector<16x384xf32> to vector<8x384xf32>
    %566 = vector.extract_strided_slice %564 {offsets = [0, 0], sizes = [8, 128], strides = [1, 1]} : vector<8x384xf32> to vector<8x128xf32>
    %567 = vector.extract_strided_slice %565 {offsets = [0, 0], sizes = [8, 128], strides = [1, 1]} : vector<8x384xf32> to vector<8x128xf32>
    %568 = arith.addf %566, %567 : vector<8x128xf32>
    %569 = arith.negf %568 : vector<8x128xf32>
    %570 = math.exp %569 : vector<8x128xf32>
    %cst_168 = arith.constant 1.000000e+00 : f32
    %571 = vector.broadcast %cst_168 : f32 to vector<8x128xf32>
    %572 = arith.addf %571, %570 : vector<8x128xf32>
    %573 = arith.divf %571, %572 : vector<8x128xf32>
    %574 = vector.extract_strided_slice %564 {offsets = [0, 128], sizes = [8, 128], strides = [1, 1]} : vector<8x384xf32> to vector<8x128xf32>
    %575 = vector.extract_strided_slice %565 {offsets = [0, 128], sizes = [8, 128], strides = [1, 1]} : vector<8x384xf32> to vector<8x128xf32>
    %576 = arith.addf %574, %575 : vector<8x128xf32>
    %577 = arith.negf %576 : vector<8x128xf32>
    %578 = math.exp %577 : vector<8x128xf32>
    %cst_169 = arith.constant 1.000000e+00 : f32
    %579 = vector.broadcast %cst_169 : f32 to vector<8x128xf32>
    %580 = arith.addf %579, %578 : vector<8x128xf32>
    %581 = arith.divf %579, %580 : vector<8x128xf32>
    %582 = vector.extract_strided_slice %564 {offsets = [0, 256], sizes = [8, 128], strides = [1, 1]} : vector<8x384xf32> to vector<8x128xf32>
    %583 = vector.extract_strided_slice %565 {offsets = [0, 256], sizes = [8, 128], strides = [1, 1]} : vector<8x384xf32> to vector<8x128xf32>
    %584 = vector.broadcast %6 : vector<1x128xf32> to vector<8x128xf32>
    %585 = arith.addf %583, %584 : vector<8x128xf32>
    %586 = arith.mulf %573, %585 : vector<8x128xf32>
    %587 = arith.addf %582, %586 : vector<8x128xf32>
    %588 = math.tanh %587 : vector<8x128xf32>
    %cst_170 = arith.constant 1.000000e+00 : f32
    %589 = vector.broadcast %cst_170 : f32 to vector<8x128xf32>
    %590 = arith.subf %589, %581 : vector<8x128xf32>
    %591 = arith.mulf %590, %588 : vector<8x128xf32>
    %592 = arith.mulf %581, %520 : vector<8x128xf32>
    %593 = arith.addf %591, %592 : vector<8x128xf32>
    %c8_i32 = arith.constant 8 : i32
    %594 = tpu.concatenate %563, %593 in 1 : vector<8x128xf32>, vector<8x128xf32> -> vector<8x256xf32>
    %595 = arith.truncf %594 : vector<8x256xf32> to vector<8x256xbf16>
    %c0_171 = arith.constant 0 : index
    %c0_172 = arith.constant 0 : index
    %596 = vector.load %arg4[%c0_171, %c0_172] : memref<256x128xbf16, #tpu.memory_space<vmem>>, vector<256x128xbf16>
    %cst_173 = arith.constant dense<0.000000e+00> : vector<8x128xf32>
    %597 = tpu.matmul %595, %596, %cst_173 {dimension_numbers = #tpu.dot_dimension_numbers<[1], [0], [0], [1], [0, 0, 1, 1], [], []>} : vector<8x256xbf16>, vector<256x128xbf16>, vector<8x128xf32> -> vector<8x128xf32>
    %c0_174 = arith.constant 0 : index
    %c0_175 = arith.constant 0 : index
    %598 = vector.load %arg5[%c0_174, %c0_175] : memref<1x128xf32, #tpu.memory_space<vmem>>, vector<1x128xf32>
    %599 = vector.broadcast %598 : vector<1x128xf32> to vector<8x128xf32>
    %600 = arith.addf %597, %599 : vector<8x128xf32>
    %c0_176 = arith.constant 0 : index
    %c0_177 = arith.constant 0 : index
    %601 = vector.load %arg6[%c0_176, %c0_177] : memref<8x128xf32, #tpu.memory_space<vmem>>, vector<8x128xf32>
    tpu.vector_store %arg6[%c0_176, %c0_177], %600 {strides = array<i32>} : memref<8x128xf32, #tpu.memory_space<vmem>>, vector<8x128xf32>,
    return
  }
}

</mosaic_0001>

<bundles_post_ra>
// kernel: tpu_custom_call.1
= control target key start
LH: loop header
LB: loop body
LE: loop exit
PB: predicated region body
PF: predicated region fallthrough
CT: control target
= control target key end

     0   :  { %11 = vsyncpa [#allocation5], 0  ;;  %s6339_s0 = inlined_call_operand.vmem [shape: bf16[64,5], index: 0, kind: input, shape index: {}]   ;;  %s6340_s1 = inlined_call_operand.vmem [shape: bf16[5,768], index: 1, kind: input, shape index: {}]   ;;  %s6341_s2 = inlined_call_operand.hbm [shape: bf16[256,384], index: 2, kind: input, shape index: {}]   ;;  %s6342_s3 = inlined_call_operand.vmem [shape: f32[2,128], index: 3, kind: input, shape index: {}]   ;;  %s6343_s4 = inlined_call_operand.hbm [shape: bf16[256,128], index: 4, kind: input, shape index: {}]   ;;  %s6344_s5 = inlined_call_operand.vmem [shape: f32[1,128], index: 5, kind: input, shape index: {}]   ;;  %s6345_s6 = inlined_call_operand.hbm [shape: f32[8,128], index: 6, kind: output, shape index: {}]  }
   0x1   :  { %12 = vsyncpa [#allocation8], 0 }
   0x2   :  { %13 = vsyncpa [#allocation6], 0  ;;  %s5539_s21 = smov [#allocation4]   ;;  %s5467_s25 = scalar_lea.hbm %s6341_s2, 6144 }
   0x3   :  { %s23_s22 = sshll.u32 %s5539_s21, 4  ;;  %p5468_p0 = scmp.ne.s32.totalorder %s6341_s2, %s5467_s25  ;;  %s24_s22 = int_to_ptr.vmem [resolvable:$true] %s23_s22 }
   0x4   :  { %p5471_p1 = scmp.lt.u32.totalorder %s5467_s25, %s6341_s2 }
   0x6   :  { %p5473_p2 = pnand %p5471_p1, %p5468_p0 }
   0x8   :  { %5476 = shalt.err (!%p5473_p2)
}
   0x9   :  { %s5477_s30 = scalar_lea.vmem %s24_s22, 6144  ;;  %p5482_p4 = scmp.lt.s32.totalorder %s24_s22, %s24_s22 }
   0xa   :  { %p5478_p3 = scmp.ne.s32.totalorder %s24_s22, %s5477_s30  ;;  %p5483_p5 = scmp.lt.s32.totalorder %s5477_s30, %s5477_s30 }
   0xc   :  { %p5484_p6 = por %p5483_p5, %p5482_p4 }
   0xe   :  { %p5485_p7 = pnand %p5484_p6, %p5478_p3 }
  0x10   :  { %5488 = shalt.err (!%p5485_p7)
}
  0x11   :  { %s5540_s7 = smov 192   ;;  %s5541_s8 = smov 12  }
  0x12   :  { %29 = dma.hbm_to_vmem [thread:$0]  %s6341_s2, 6144, %s24_s22, [#allocation5], %s5540_s7, %s5540_s7, %s5541_s8  }
  0x13   :  { %s5542_s11 = smov [#allocation7]   ;;  %s5489_s15 = scalar_lea.hbm %s6343_s4, 2048 }
  0x14   :  { %s37_s12 = sshll.u32 %s5542_s11, 4  ;;  %p5490_p8 = scmp.ne.s32.totalorder %s6343_s4, %s5489_s15  ;;  %s38_s12 = int_to_ptr.vmem [resolvable:$true] %s37_s12 }
  0x15   :  { %p5493_p9 = scmp.lt.u32.totalorder %s5489_s15, %s6343_s4 }
  0x17   :  { %p5495_p10 = pnand %p5493_p9, %p5490_p8 }
  0x19   :  { %5498 = shalt.err (!%p5495_p10)
}
  0x1a   :  { %s5499_s20 = scalar_lea.vmem %s38_s12, 2048  ;;  %p5504_p12 = scmp.lt.s32.totalorder %s38_s12, %s38_s12 }
  0x1b   :  { %p5500_p11 = scmp.ne.s32.totalorder %s38_s12, %s5499_s20  ;;  %p5505_p13 = scmp.lt.s32.totalorder %s5499_s20, %s5499_s20 }
  0x1d   :  { %p5506_p0 = por %p5505_p13, %p5504_p12 }
  0x1f   :  { %p5507_p1 = pnand %p5506_p0, %p5500_p11 }
  0x21   :  { %5510 = shalt.err (!%p5507_p1)
}
  0x22   :  { %s5543_s2 = smov 64   ;;  %s5544_s21 = smov 4  }
  0x23   :  { %43 = dma.hbm_to_vmem [thread:$0]  %s6343_s4, 2048, %s38_s12, [#allocation8], %s5543_s2, %s5543_s2, %s5544_s21  }
  0x24   :  { %5533 = dma.done.wait [#allocation5], 6144  }
  0x25   :  { %5534 = vsyncadd [#allocation5], 4294961152 }
  0x26   :  { %5535 = dma.done.wait [#allocation8], 2048  }
  0x27   :  { %5536 = vsyncadd [#allocation8], 4294965248  ;;  %vm112_vm0 = vcmask 1041408   ;;  %v5545_v0 = vmov 0   ;;  %vm113_vm1 = vcmask 1042432   ;;  %v5546_v1 = vmov 65535  }
  0x28   :  { %239 = vmatprep.mubr.bf16.mxu1 %v5545_v0  ;;  %166 = vmatprep.mubr.bf16.mxu0 %v5545_v0  ;;  %v114_v2 = vsel %vm112_vm0, 4294967295, %v5546_v1  ;;  %v62_v4 = vld [vmem:[%s6340_s1 + $0x8] sm:$0x77]  ;;  %v61_v10 = vld [vmem:[%s6340_s1] sm:$0x77]  ;;  %vm99_vm2 = vcmask 39936  }
  0x29   :  { %v115_v3 = vsel %vm113_vm1, %v114_v2, 0  ;;  %v4319_v5 = vcombine.high %v62_v4, %v62_v4  ;;  %v4318_v6 = vcombine.low %v62_v4, %v62_v4  ;;  %v5614_v9 = vld [vmem:[#allocation4 + $0x4] ss:$12 sps:$4 sm:$0xff]   ;;  %v5622_v11 = vld [vmem:[%s6339_s0] sm:$0xff]   ;;  %v4317_v12 = vcombine.high %v61_v10, %v61_v10  ;;  %v63_v18 = vld [vmem:[%s6340_s1 + $0x10] sm:$0x77] }
  0x2a   :  { %v4316_v13 = vcombine.low %v61_v10, %v61_v10  ;;  %v5624_v14 = vld [vmem:[#allocation4] ss:$12 sps:$4 sm:$0xff]   ;;  %v5627_v15 = vld [vmem:[#allocation4 + $0x1c] ss:$12 sps:$4 sm:$0xff]   ;;  %v5635_v19 = vld [vmem:[#allocation4 + $0x18] ss:$12 sps:$4 sm:$0xff]   ;;  %v4320_v20 = vcombine.low %v63_v18, %v63_v18  ;;  %v4321_v21 = vcombine.high %v63_v18, %v63_v18 }
  0x2b   :  { %v126_v7 = vand.u32 %v4319_v5, %v115_v3  ;;  %v123_v8 = vand.u32 %v4318_v6, %v115_v3  ;;  %v120_v16 = vand.u32 %v4317_v12, %v115_v3  ;;  %v5638_v22 = vld [vmem:[#allocation4 + $0x34] ss:$12 sps:$4 sm:$0xff]   ;;  %v5644_v25 = vld [vmem:[#allocation4 + $0x30] ss:$12 sps:$4 sm:$0xff]   ;;  %v5648_v26 = vld [vmem:[#allocation4 + $0x4c] ss:$12 sps:$4 sm:$0xff]  }
  0x2c   :  { %v117_v17 = vand.u32 %v4316_v13, %v115_v3  ;;  %v132_v23 = vand.u32 %v4321_v21, %v115_v3  ;;  %v129_v24 = vand.u32 %v4320_v20, %v115_v3  ;;  %v5653_v27 = vld [vmem:[%s6339_s0 + $0x8] sm:$0xff]   ;;  %v5667_v30 = vld [vmem:[#allocation4 + $0x60] ss:$12 sps:$4 sm:$0xff]   ;;  %v5671_v31 = vld [vmem:[#allocation4 + $0x7c] ss:$12 sps:$4 sm:$0xff]   ;;  %v5547_v40 = vmov 0.0|0.0  }
  0x2d   :  { %207 = vmatprep.subr.bf16.mxu1 %v126_v7  ;;  %134 = vmatprep.subr.bf16.mxu0 %v120_v16  ;;  %v5658_v28 = vld [vmem:[#allocation4 + $0x48] ss:$12 sps:$4 sm:$0xff]   ;;  %v5662_v29 = vld [vmem:[#allocation4 + $0x64] ss:$12 sps:$4 sm:$0xff]   ;;  %v5676_v32 = vld [vmem:[%s6339_s0 + $0x10] sm:$0xff]   ;;  %s5549_s20 = smov [#allocation9]  }
  0x2e   :  { %208 = vmatpush1.bf16.msra.mxu1 %v123_v8  ;;  %135 = vmatpush1.bf16.msra.mxu0 %v117_v17  ;;  %v5030_v33 = vld [vmem:[#allocation4 + $0xc8] ss:$12 sps:$4 sm:$0xff]   ;;  %v5681_v34 = vld [vmem:[#allocation4 + $0x78] ss:$12 sps:$4 sm:$0xff]   ;;  %v5687_v36 = vld [vmem:[#allocation4 + $0x90] ss:$12 sps:$4 sm:$0xff]  }
  0x2f   :  { %735 = vmatprep.subr.bf16.mxu1 %v5614_v9  ;;  %280 = vmatprep.subr.bf16.mxu0 %v132_v23  ;;  %v5685_v35 = vld [vmem:[#allocation4 + $0x94] ss:$12 sps:$4 sm:$0xff]   ;;  %v5692_v37 = vld [vmem:[#allocation4 + $0xac] ss:$12 sps:$4 sm:$0xff]   ;;  %v5708_v41 = vld [vmem:[#allocation4 + $0xc4] ss:$12 sps:$4 sm:$0xff]  }
  0x30   :  { %v5699_v38 = vld [vmem:[%s6339_s0 + $0x18] sm:$0xff]   ;;  %v5704_v39 = vld [vmem:[#allocation4 + $0xa8] ss:$12 sps:$4 sm:$0xff]   ;;  %v5725_v48 = vld [vmem:[#allocation4 + $0xf0] ss:$12 sps:$4 sm:$0xff]   ;;  %s4302_s2 = sshll.u32 %s5549_s20, 4  ;;  %s4303_s2 = int_to_ptr.vmem [resolvable:$true] %s4302_s2 }
  0x31   :  { %4326 = vmatmul.mubr.msk.bf16.vlgmr.msra.gmra.mrb[0].mxu1 %vm99_vm2, %v5622_v11  ;;  %4322 = vmatmul.mubr.msk.bf16.vlgmr.msra.gmra.mrb[0].mxu0 %vm99_vm2, %v5622_v11  ;;  %v5713_v42 = vld [vmem:[#allocation4 + $0xc0] ss:$12 sps:$4 sm:$0xff]   ;;  %v5717_v43 = vld [vmem:[#allocation4 + $0xdc] ss:$12 sps:$4 sm:$0xff]   ;;  %v5719_v44 = vld [vmem:[#allocation4 + $0xd8] ss:$12 sps:$4 sm:$0xff]   ;;  %p5516_p3 = scmp.lt.s32.totalorder %s4303_s2, %s4303_s2 }
  0x32   :  { %736 = vmatpush1.bf16.msra.mxu1 %v5624_v14  ;;  %249 = vmatprep.mubr.bf16.mxu1 %v5545_v0  ;;  %v5721_v45 = vld [vmem:[#allocation4 + $0xf4] ss:$12 sps:$4 sm:$0xff]   ;;  %v5729_v49 = vld [vmem:[#allocation4 + $0x10c] ss:$12 sps:$4 sm:$0xff]   ;;  %v5736_v53 = vld [vmem:[#allocation4 + $0x124] ss:$12 sps:$4 sm:$0xff]  }
  0x33   :  { %737 = vmatprep.subr.bf16.mxu1 %v5627_v15  ;;  %176 = vmatprep.mubr.bf16.mxu0 %v5545_v0  ;;  %v5031_v46 = vld [vmem:[#allocation4 + $0x8] ss:$12 sps:$4 sm:$0xff]   ;;  %v5035_v47 = vld [vmem:[#allocation4 + $0xe0] ss:$12 sps:$4 sm:$0xff]   ;;  %v5040_v51 = vld [vmem:[#allocation4 + $0xf8] ss:$12 sps:$4 sm:$0xff]  }
  0x34   :  { %281 = vmatpush1.bf16.msra.mxu0 %v129_v24  ;;  %v5036_v50 = vld [vmem:[#allocation4 + $0x20] ss:$12 sps:$4 sm:$0xff]   ;;  %v5734_v52 = vld [vmem:[#allocation4 + $0x108] ss:$12 sps:$4 sm:$0xff]   ;;  %v5041_v54 = vld [vmem:[#allocation4 + $0x38] ss:$12 sps:$4 sm:$0xff]  }
  0x35   :  { %4769 = vmatprep.subr.bf16.mxu0 %v5030_v33  ;;  %v5042_v55 = vld [vmem:[#allocation4 + $0x110] ss:$12 sps:$4 sm:$0xff]   ;;  %v5740_v56 = vld [vmem:[#allocation4 + $0x120] ss:$12 sps:$4 sm:$0xff]   ;;  %v5044_v59 = vld [vmem:[#allocation4 + $0x128] ss:$12 sps:$4 sm:$0xff]  }
  0x36   :  { %738 = vmatpush1.bf16.msra.mxu1 %v5635_v19  ;;  %v5744_v57 = vld [vmem:[#allocation4 + $0x13c] ss:$12 sps:$4 sm:$0xff]   ;;  %v5027_v60 = vld [vmem:[#allocation4 + $0x138] ss:$12 sps:$4 sm:$0xff]   ;;  %v5034_v61 = vld [vmem:[#allocation4 + $0x154] ss:$12 sps:$4 sm:$0xff]  }
  0x37   :  { %739 = vmatprep.subr.bf16.mxu1 %v5638_v22  ;;  %v5043_v58 = vld [vmem:[#allocation4 + $0x50] ss:$12 sps:$4 sm:$0xff]   ;;  %v5045_v62 = vld [vmem:[#allocation4 + $0x68] ss:$12 sps:$4 sm:$0xff]   ;;  %v5046_v63 = vld [vmem:[#allocation4 + $0x140] ss:$12 sps:$4 sm:$0xff]  }
  0x38   :  { %v5751_v1 = vld [vmem:[#allocation4 + $0x150] ss:$12 sps:$4 sm:$0xff]   ;;  %v5755_v2 = vld [vmem:[#allocation4 + $0x16c] ss:$12 sps:$4 sm:$0xff]   ;;  %v5758_v5 = vld [vmem:[#allocation4 + $0x168] ss:$12 sps:$4 sm:$0xff]  }
  0x39   :  { %4327 = vmatmul.mubr.msk.bf16.gmra.mrb[4].mxu1 %vm99_vm2, %v5653_v27  ;;  %4323 = vmatmul.mubr.msk.bf16.gmra.mrb[4].mxu0 %vm99_vm2, %v5653_v27  ;;  %v5047_v3 = vld [vmem:[#allocation4 + $0x80] ss:$12 sps:$4 sm:$0xff]   ;;  %v5048_v4 = vld [vmem:[#allocation4 + $0x158] ss:$12 sps:$4 sm:$0xff]   ;;  %v5050_v7 = vld [vmem:[#allocation4 + $0x170] ss:$12 sps:$4 sm:$0xff]  }
  0x3a   :  { %740 = vmatpush1.bf16.msra.mxu1 %v5644_v25  ;;  %259 = vmatprep.mubr.bf16.mxu1 %v5545_v0  ;;  %v5049_v6 = vld [vmem:[#allocation4 + $0x98] ss:$12 sps:$4 sm:$0xff]   ;;  %v5051_v8 = vld [vmem:[#allocation4 + $0xb0] ss:$12 sps:$4 sm:$0xff]   ;;  %v5054_v10 = vld [vmem:[#allocation4 + $0xe0] ss:$12 sps:$4 sm:$0xff]  }
  0x3b   :  { %741 = vmatprep.subr.bf16.mxu1 %v5648_v26  ;;  %186 = vmatprep.mubr.bf16.mxu0 %v5545_v0  ;;  %v5056_v12 = vld [vmem:[#allocation4 + $0xf8] ss:$12 sps:$4 sm:$0xff]   ;;  %v5060_v16 = vld [vmem:[#allocation4 + $0x128] ss:$12 sps:$4 sm:$0xff]   ;;  %v5062_v18 = vld [vmem:[#allocation4 + $0x140] ss:$12 sps:$4 sm:$0xff]  }
  0x3c   :  { %v5057_v13 = vld [vmem:[#allocation4 + $0x38] ss:$12 sps:$4 sm:$0xff]   ;;  %v5061_v17 = vld [vmem:[#allocation4 + $0x68] ss:$12 sps:$4 sm:$0xff]   ;;  %v5067_v23 = vld [vmem:[#allocation4 + $0xb0] ss:$12 sps:$4 sm:$0xff]  }
  0x3d   :  { %v5064_v20 = vld [vmem:[#allocation4 + $0x158] ss:$12 sps:$4 sm:$0xff]   ;;  %s5511_s21 = scalar_lea.vmem %s4303_s2, 128 }
  0x3e   :  { %742 = vmatpush1.bf16.msra.mxu1 %v5658_v28  ;;  %v5065_v21 = vld [vmem:[#allocation4 + $0x98] ss:$12 sps:$4 sm:$0xff]   ;;  %p5512_p2 = scmp.ne.s32.totalorder %s4303_s2, %s5511_s21  ;;  %p5517_p4 = scmp.lt.s32.totalorder %s5511_s21, %s5511_s21 }
  0x3f   :  { %743 = vmatprep.subr.bf16.mxu1 %v5662_v29  ;;  %v5436_v24 = vld [vmem:[#allocation4 + $0x4] ss:$12 sps:$4 sm:$0xff]  }
  0x40   :  { %p5518_p5 = por %p5517_p4, %p5516_p3 }
  0x41   :  { %4328 = vmatmul.mubr.msk.bf16.gmra.mrb[8].mxu1 %vm99_vm2, %v5676_v32  ;;  %4324 = vmatmul.mubr.msk.bf16.gmra.mrb[8].mxu0 %vm99_vm2, %v5676_v32 }
  0x42   :  { %744 = vmatpush1.bf16.msra.mxu1 %v5667_v30  ;;  %269 = vmatprep.mubr.bf16.mxu1 %v5545_v0  ;;  %p5519_p6 = pnand %p5518_p5, %p5512_p2 }
  0x43   :  { %745 = vmatprep.subr.bf16.mxu1 %v5671_v31  ;;  %196 = vmatprep.mubr.bf16.mxu0 %v5545_v0 }
  0x46   :  { %746 = vmatpush1.bf16.msra.mxu1 %v5681_v34 }
  0x47   :  { %747 = vmatprep.subr.bf16.mxu1 %v5685_v35 }
  0x49   :  { %4329 = vmatmul.mubr.msk.bf16.gmra.mrb[12].mxu1 %vm99_vm2, %v5699_v38  ;;  %4325 = vmatmul.mubr.msk.bf16.gmra.mrb[12].mxu0 %vm99_vm2, %v5699_v38 }
  0x4a   :  { %748 = vmatpush1.bf16.msra.mxu1 %v5687_v36  ;;  %767 = vmatprep.mubr.bf16.mxu1 %v5547_v40 }
  0x4b   :  { %749 = vmatprep.subr.bf16.mxu1 %v5692_v37  ;;  %312 = vmatprep.mubr.bf16.mxu0 %v5545_v0 }
  0x4e   :  { %750 = vmatpush1.bf16.msra.mxu1 %v5704_v39 }
  0x4f   :  { %751 = vmatprep.subr.bf16.mxu1 %v5708_v41 }
  0x51   :  { %4330 = vmatmul.mubr.msk.bf16.vlgmr.msra.gmra.mrb[16].mxu0 %vm99_vm2, %v5622_v11  ;;  %v5055_v11 = vld [vmem:[#allocation4 + $0x20] ss:$12 sps:$4 sm:$0xff]  }
  0x52   :  { %752 = vmatpush1.bf16.msra.mxu1 %v5713_v42  ;;  %322 = vmatprep.mubr.bf16.mxu0 %v5545_v0 }
  0x53   :  { %753 = vmatprep.subr.bf16.mxu1 %v5717_v43  ;;  %4770 = vmatpush3.bf16.msra.mxu0 %v5031_v46 }
  0x54   :  { %4771 = vmatprep.subr.bf16.mxu0 %v5035_v47 }
  0x56   :  { %754 = vmatpush1.bf16.msra.mxu1 %v5719_v44 }
  0x57   :  { %755 = vmatprep.subr.bf16.mxu1 %v5721_v45  ;;  %4772 = vmatpush3.bf16.msra.mxu0 %v5036_v50 }
  0x58   :  { %4773 = vmatprep.subr.bf16.mxu0 %v5040_v51 }
  0x59   :  { %4331 = vmatmul.mubr.msk.bf16.gmra.mrb[20].mxu0 %vm99_vm2, %v5653_v27 }
  0x5a   :  { %756 = vmatpush1.bf16.msra.mxu1 %v5725_v48  ;;  %332 = vmatprep.mubr.bf16.mxu0 %v5545_v0 }
  0x5b   :  { %757 = vmatprep.subr.bf16.mxu1 %v5729_v49  ;;  %4774 = vmatpush3.bf16.msra.mxu0 %v5041_v54 }
  0x5c   :  { %4775 = vmatprep.subr.bf16.mxu0 %v5042_v55 }
  0x5e   :  { %758 = vmatpush1.bf16.msra.mxu1 %v5734_v52 }
  0x5f   :  { %759 = vmatprep.subr.bf16.mxu1 %v5736_v53  ;;  %4776 = vmatpush3.bf16.msra.mxu0 %v5043_v58 }
  0x60   :  { %4777 = vmatprep.subr.bf16.mxu0 %v5044_v59 }
  0x61   :  { %4332 = vmatmul.mubr.msk.bf16.gmra.mrb[24].mxu0 %vm99_vm2, %v5676_v32 }
  0x62   :  { %760 = vmatpush1.bf16.msra.mxu1 %v5740_v56  ;;  %342 = vmatprep.mubr.bf16.mxu0 %v5545_v0  ;;  %v5052_v0 = vld [vmem:[#allocation4 + $0xc8] ss:$12 sps:$4 sm:$0xff]  }
  0x63   :  { %761 = vmatprep.subr.bf16.mxu1 %v5744_v57  ;;  %4778 = vmatpush3.bf16.msra.mxu0 %v5045_v62 }
  0x64   :  { %4779 = vmatprep.subr.bf16.mxu0 %v5046_v63 }
  0x66   :  { %762 = vmatpush1.bf16.msra.mxu1 %v5027_v60 }
  0x67   :  { %763 = vmatprep.subr.bf16.mxu1 %v5034_v61  ;;  %4780 = vmatpush3.bf16.msra.mxu0 %v5047_v3 }
  0x68   :  { %4781 = vmatprep.subr.bf16.mxu0 %v5048_v4 }
  0x69   :  { %4333 = vmatmul.mubr.msk.bf16.gmra.mrb[28].mxu0 %vm99_vm2, %v5699_v38 }
  0x6a   :  { %764 = vmatpush1.bf16.msra.mxu1 %v5751_v1  ;;  %810 = vmatprep.mubr.bf16.mxu0 %v5547_v40 }
  0x6b   :  { %765 = vmatprep.subr.bf16.mxu1 %v5755_v2  ;;  %4782 = vmatpush3.bf16.msra.mxu0 %v5049_v6 }
  0x6c   :  { %4783 = vmatprep.subr.bf16.mxu0 %v5050_v7 }
  0x6e   :  { %766 = vmatpush1.bf16.msra.mxu1 %v5758_v5 }
  0x6f   :  { %4784 = vmatpush3.bf16.msra.mxu0 %v5051_v8  ;;  %4791 = vmatprep.subr.bf16.mxu1 %v5052_v0 }
  0x70   :  { %1206 = vmatprep.subr.bf16.mxu0 %v5614_v9  ;;  %v5053_v9 = vld [vmem:[#allocation4 + $0x8] ss:$12 sps:$4 sm:$0xff]  }
  0x71   :  { %768 = vmatmul.mubr.bf16.vlgmr.msra.gmra.mrb[16].mxu1 %v5547_v40 }
  0x72   :  { %811 = vmatmul.mubr.bf16.vlgmr.msra.gmra.mrb[32].mxu0 %v5547_v40  ;;  %4792 = vmatpush3.bf16.msra.mxu1 %v5053_v9 }
  0x73   :  { %1207 = vmatpush1.bf16.msra.mxu0 %v5624_v14  ;;  %4793 = vmatprep.subr.bf16.mxu1 %v5054_v10  ;;  %v5058_v14 = vld [vmem:[#allocation4 + $0x110] ss:$12 sps:$4 sm:$0xff]  }
  0x74   :  { %1208 = vmatprep.subr.bf16.mxu0 %v5627_v15  ;;  %v5059_v15 = vld [vmem:[#allocation4 + $0x50] ss:$12 sps:$4 sm:$0xff]  }
  0x76   :  { %4794 = vmatpush3.bf16.msra.mxu1 %v5055_v11 }
  0x77   :  { %1209 = vmatpush1.bf16.msra.mxu0 %v5635_v19  ;;  %4795 = vmatprep.subr.bf16.mxu1 %v5056_v12  ;;  %v5063_v19 = vld [vmem:[#allocation4 + $0x80] ss:$12 sps:$4 sm:$0xff]  }
  0x78   :  { %1210 = vmatprep.subr.bf16.mxu0 %v5638_v22  ;;  %v5066_v22 = vld [vmem:[#allocation4 + $0x170] ss:$12 sps:$4 sm:$0xff]  }
  0x7a   :  { %4796 = vmatpush3.bf16.msra.mxu1 %v5057_v13 }
  0x7b   :  { %1211 = vmatpush1.bf16.msra.mxu0 %v5644_v25  ;;  %4797 = vmatprep.subr.bf16.mxu1 %v5058_v14 }
  0x7c   :  { %1212 = vmatprep.subr.bf16.mxu0 %v5648_v26 }
  0x7e   :  { %4798 = vmatpush3.bf16.msra.mxu1 %v5059_v15 }
  0x7f   :  { %1213 = vmatpush1.bf16.msra.mxu0 %v5658_v28  ;;  %4799 = vmatprep.subr.bf16.mxu1 %v5060_v16 }
  0x80   :  { %1214 = vmatprep.subr.bf16.mxu0 %v5662_v29 }
  0x82   :  { %4800 = vmatpush3.bf16.msra.mxu1 %v5061_v17 }
  0x83   :  { %1215 = vmatpush1.bf16.msra.mxu0 %v5667_v30  ;;  %4801 = vmatprep.subr.bf16.mxu1 %v5062_v18 }
  0x84   :  { %1216 = vmatprep.subr.bf16.mxu0 %v5671_v31 }
  0x86   :  { %4802 = vmatpush3.bf16.msra.mxu1 %v5063_v19 }
  0x87   :  { %1217 = vmatpush1.bf16.msra.mxu0 %v5681_v34  ;;  %4803 = vmatprep.subr.bf16.mxu1 %v5064_v20 }
  0x88   :  { %1218 = vmatprep.subr.bf16.mxu0 %v5685_v35 }
  0x8a   :  { %4804 = vmatpush3.bf16.msra.mxu1 %v5065_v21 }
  0x8b   :  { %1219 = vmatpush1.bf16.msra.mxu0 %v5687_v36  ;;  %4805 = vmatprep.subr.bf16.mxu1 %v5066_v22 }
  0x8c   :  { %1220 = vmatprep.subr.bf16.mxu0 %v5692_v37 }
  0x8e   :  { %4806 = vmatpush3.bf16.msra.mxu1 %v5067_v23 }
  0x8f   :  { %1221 = vmatpush1.bf16.msra.mxu0 %v5704_v39  ;;  %1670 = vmatprep.subr.bf16.mxu1 %v5436_v24 }
  0x90   :  { %1222 = vmatprep.subr.bf16.mxu0 %v5708_v41 }
  0x93   :  { %1223 = vmatpush1.bf16.msra.mxu0 %v5713_v42 }
  0x94   :  { %1224 = vmatprep.subr.bf16.mxu0 %v5717_v43 }
  0x97   :  { %1225 = vmatpush1.bf16.msra.mxu0 %v5719_v44 }
  0x98   :  { %1226 = vmatprep.subr.bf16.mxu0 %v5721_v45 }
  0x9b   :  { %1227 = vmatpush1.bf16.msra.mxu0 %v5725_v48 }
  0x9c   :  { %1228 = vmatprep.subr.bf16.mxu0 %v5729_v49 }
  0x9f   :  { %1229 = vmatpush1.bf16.msra.mxu0 %v5734_v52 }
  0xa0   :  { %1230 = vmatprep.subr.bf16.mxu0 %v5736_v53 }
  0xa3   :  { %1231 = vmatpush1.bf16.msra.mxu0 %v5740_v56 }
  0xa4   :  { %1232 = vmatprep.subr.bf16.mxu0 %v5744_v57 }
  0xa7   :  { %1233 = vmatpush1.bf16.msra.mxu0 %v5027_v60 }
  0xa8   :  { %1234 = vmatprep.subr.bf16.mxu0 %v5034_v61 }
  0xab   :  { %1235 = vmatpush1.bf16.msra.mxu0 %v5751_v1 }
  0xac   :  { %1236 = vmatprep.subr.bf16.mxu0 %v5755_v2 }
  0xaf   :  { %1237 = vmatpush1.bf16.msra.mxu0 %v5758_v5 }
 0x104   :  { %v5798_v25 = vpop.f32.mrb[0].mxu1  ;;  %v168_v29 = vpop.f32.mrb[0].mxu0 }
 0x105   :  { %v5800_v26 = vpop.f32.mrb[1].mxu1  ;;  %v170_v30 = vpop.f32.mrb[1].mxu0 }
 0x106   :  { %6348 = vst [vmem:[#allocation13_spill] sm:$0xff] %v5800_v26  ;;  %v5802_v27 = vpop.f32.mrb[2].mxu1  ;;  %v5806_v31 = vpop.f32.mrb[2].mxu0 }
 0x107   :  { %v5804_v28 = vpop.f32.mrb[3].mxu1  ;;  %v5808_v32 = vpop.f32.mrb[3].mxu0 }
 0x108   :  { %6349 = vst [vmem:[#allocation14_spill] sm:$0xff] %v5804_v28  ;;  %v5141_v28 = vld [vmem:[#allocation4 + $0x158] ss:$12 sps:$4 sm:$0xff]  }
 0x10c   :  { %v5810_v33 = vpop.f32.mrb[4].mxu1  ;;  %v5818_v37 = vpop.f32.mrb[4].mxu0 }
 0x10d   :  { %v5812_v34 = vpop.f32.mrb[5].mxu1  ;;  %v5820_v38 = vpop.f32.mrb[5].mxu0 }
 0x10e   :  { %6350 = vst [vmem:[#allocation15_spill] sm:$0xff] %v5812_v34  ;;  %v5814_v35 = vpop.f32.mrb[6].mxu1  ;;  %v5822_v39 = vpop.f32.mrb[6].mxu0 }
 0x10f   :  { %v5816_v36 = vpop.f32.mrb[7].mxu1  ;;  %v5824_v40 = vpop.f32.mrb[7].mxu0 }
 0x110   :  { %6351 = vst [vmem:[#allocation16_spill] sm:$0xff] %v5816_v36 }
 0x114   :  { %v5826_v41 = vpop.f32.mrb[8].mxu1  ;;  %v5834_v45 = vpop.f32.mrb[8].mxu0 }
 0x115   :  { %6352 = vst [vmem:[#allocation17_spill] sm:$0xff] %v5826_v41  ;;  %v5828_v42 = vpop.f32.mrb[9].mxu1  ;;  %6354 = vst [vmem:[#allocation19_spill] sm:$0xff] %v5834_v45  ;;  %v5836_v46 = vpop.f32.mrb[9].mxu0 }
 0x116   :  { %v5830_v43 = vpop.f32.mrb[10].mxu1  ;;  %6355 = vst [vmem:[#allocation20_spill] sm:$0xff] %v5836_v46  ;;  %v5838_v47 = vpop.f32.mrb[10].mxu0 }
 0x117   :  { %6353 = vst [vmem:[#allocation18_spill] sm:$0xff] %v5830_v43  ;;  %v5832_v44 = vpop.f32.mrb[11].mxu1  ;;  %6356 = vst [vmem:[#allocation21_spill] sm:$0xff] %v5838_v47  ;;  %v5840_v48 = vpop.f32.mrb[11].mxu0 }
 0x118   :  { %6357 = vst [vmem:[#allocation22_spill] sm:$0xff] %v5840_v48 }
 0x11c   :  { %v5842_v49 = vpop.f32.mrb[12].mxu1  ;;  %v5848_v53 = vpop.f32.mrb[12].mxu0 }
 0x11d   :  { %6358 = vst [vmem:[#allocation23_spill] sm:$0xff] %v5842_v49  ;;  %v5844_v50 = vpop.f32.mrb[13].mxu1  ;;  %6360 = vst [vmem:[#allocation25_spill] sm:$0xff] %v5848_v53  ;;  %v5850_v54 = vpop.f32.mrb[13].mxu0  ;;  %v6002_v49 = vld [vmem:[#allocation4 + $0x13c] ss:$12 sps:$4 sm:$0xff]  }
 0x11e   :  { %v5846_v51 = vpop.f32.mrb[14].mxu1  ;;  %6361 = vst [vmem:[#allocation26_spill] sm:$0xff] %v5850_v54  ;;  %v5852_v55 = vpop.f32.mrb[14].mxu0  ;;  %v6012_v54 = vld [vmem:[#allocation4 + $0x150] ss:$12 sps:$4 sm:$0xff]  }
 0x11f   :  { %6359 = vst [vmem:[#allocation24_spill] sm:$0xff] %v5846_v51  ;;  %v277_v52 = vpop.f32.mrb[15].mxu1  ;;  %6362 = vst [vmem:[#allocation27_spill] sm:$0xff] %v5852_v55  ;;  %v5854_v56 = vpop.f32.mrb[15].mxu0  ;;  %v6000_v55 = vld [vmem:[#allocation4 + $0x124] ss:$12 sps:$4 sm:$0xff]  }
 0x120   :  { %6363 = vst [vmem:[#allocation28_spill] sm:$0xff] %v5854_v56  ;;  %v5142_v53 = vld [vmem:[#allocation4 + $0x98] ss:$12 sps:$4 sm:$0xff]  }
 0x124   :  { %v5856_v57 = vpop.f32.mrb[16].mxu0 }
 0x125   :  { %6364 = vst [vmem:[#allocation29_spill] sm:$0xff] %v5856_v57  ;;  %v5858_v58 = vpop.f32.mrb[17].mxu0 }
 0x126   :  { %6365 = vst [vmem:[#allocation30_spill] sm:$0xff] %v5858_v58  ;;  %v5860_v59 = vpop.f32.mrb[18].mxu0 }
 0x127   :  { %6366 = vst [vmem:[#allocation31_spill] sm:$0xff] %v5860_v59  ;;  %v5862_v60 = vpop.f32.mrb[19].mxu0  ;;  %v6006_v59 = vld [vmem:[#allocation4 + $0x138] ss:$12 sps:$4 sm:$0xff]  }
 0x128   :  { %6367 = vst [vmem:[#allocation32_spill] sm:$0xff] %v5862_v60  ;;  %v5132_v60 = vld [vmem:[#allocation4 + $0x68] ss:$12 sps:$4 sm:$0xff]  }
 0x12c   :  { %v5864_v61 = vpop.f32.mrb[20].mxu0 }
 0x12d   :  { %6368 = vst [vmem:[#allocation33_spill] sm:$0xff] %v5864_v61  ;;  %v5866_v62 = vpop.f32.mrb[21].mxu0 }
 0x12e   :  { %6369 = vst [vmem:[#allocation34_spill] sm:$0xff] %v5866_v62  ;;  %v5868_v63 = vpop.f32.mrb[22].mxu0  ;;  %v6018_v62 = vld [vmem:[#allocation4 + $0x168] ss:$12 sps:$4 sm:$0xff]  }
 0x12f   :  { %6370 = vst [vmem:[#allocation35_spill] sm:$0xff] %v5868_v63  ;;  %v5870_v3 = vpop.f32.mrb[23].mxu0 }
 0x130   :  { %6371 = vst [vmem:[#allocation36_spill] sm:$0xff] %v5870_v3 }
 0x134   :  { %v5872_v4 = vpop.f32.mrb[24].mxu0 }
 0x135   :  { %v5874_v6 = vpop.f32.mrb[25].mxu0 }
 0x136   :  { %6372 = vst [vmem:[#allocation37_spill] sm:$0xff] %v5874_v6  ;;  %v5876_v7 = vpop.f32.mrb[26].mxu0 }
 0x137   :  { %v5878_v8 = vpop.f32.mrb[27].mxu0 }
 0x13c   :  { %v5880_v0 = vpop.f32.mrb[28].mxu0 }
 0x13d   :  { %v5882_v9 = vpop.f32.mrb[29].mxu0 }
 0x13e   :  { %v348_v10 = vpop.f32.mrb[30].mxu0 }
 0x13f   :  { %v350_v11 = vpop.f32.mrb[31].mxu0 }
 0x144   :  { %v769_v12 = vpop.f32.mrb[16].mxu1 }
 0x145   :  { %v826_v13 = vadd.f32 %v769_v12, %v168_v29  ;;  %v771_v14 = vpop.f32.mrb[17].mxu1  ;;  %v4785_v22 = vpop.f32.mrb[32].mxu0 }
 0x146   :  { %v833_v15 = vadd.f32 %v771_v14, %v170_v30  ;;  %v773_v16 = vpop.f32.mrb[18].mxu1  ;;  %v4786_v23 = vpop.f32.mrb[33].mxu0 }
 0x147   :  { %v4382_v17 = vmul.f32 -1.442695, %v826_v13  ;;  %v852_v18 = vadd.f32 %v773_v16, %v277_v52  ;;  %v775_v19 = vpop.f32.mrb[19].mxu1  ;;  %v4787_v24 = vadd.f32 %v4786_v23, %v4785_v22  ;;  %v4788_v58 = vpop.f32.mrb[34].mxu0  ;;  %v5887_v13 = vld [vmem:[%s6342_s3] ss:$0 sm:$0xff] }
 0x148   :  { %v859_v20 = vadd.f32 %v775_v19, %v348_v10  ;;  %v4383_v51 = vmul.f32 -1.442695, %v833_v15  ;;  %v4789_v57 = vpop.f32.mrb[35].mxu0 }
 0x149   :  { %5276 = vpow2.f32 %v4382_v17  ;;  %v4385_v21 = vmul.f32 -1.442695, %v852_v18  ;;  %v4790_v26 = vadd.f32 %v4789_v57, %v4788_v58  ;;  %v844_v15 = vadd.f32 %v4787_v24, %v5887_v13 }
 0x14a   :  { %v4386_v56 = vmul.f32 -1.442695, %v859_v20 }
 0x14b   :  { %5278 = vpow2.f32 %v4385_v21 }
 0x14c   :  { %5280 = vpow2.f32 %v4383_v51  ;;  %v5893_v51 = vld [vmem:[%s6342_s3 + $0x1] ss:$0 sm:$0xff] }
 0x14d   :  { %5282 = vpow2.f32 %v4386_v56  ;;  %v870_v17 = vadd.f32 %v4790_v26, %v5893_v51 }
 0x153   :  { %v5277_v29 = vpop.eup %5276 }
 0x154   :  { %v830_v30 = vadd.f32 1.0, %v5277_v29 }
 0x155   :  { %v5279_v12 = vpop.eup %5278 }
 0x156   :  { %5284 = vrcp.f32 %v830_v30  ;;  %v856_v52 = vadd.f32 1.0, %v5279_v12  ;;  %v5281_v10 = vpop.eup %5280 }
 0x157   :  { %v5283_v14 = vpop.eup %5282  ;;  %v837_v16 = vadd.f32 1.0, %v5281_v10 }
 0x158   :  { %5286 = vrcp.f32 %v856_v52  ;;  %v863_v56 = vadd.f32 1.0, %v5283_v14 }
 0x159   :  { %5288 = vrcp.f32 %v837_v16 }
 0x15a   :  { %5290 = vrcp.f32 %v863_v56  ;;  %v6346_v56 = vmov 0.0  }
 0x160   :  { %v5285_v57 = vpop.eup %5284 }
 0x161   :  { %v845_v58 = vmul.f32 %v5285_v57, %v844_v15  ;;  %v5437_v57 = vld [vmem:[#allocation4] ss:$12 sps:$4 sm:$0xff]  }
 0x162   :  { %v5287_v18 = vpop.eup %5286 }
 0x163   :  { %v846_v19 = vadd.f32 %v845_v58, %v5798_v25  ;;  %v871_v20 = vmul.f32 %v5287_v18, %v870_v17  ;;  %v5289_v22 = vpop.eup %5288  ;;  %v5438_v58 = vld [vmem:[#allocation4 + $0x1c] ss:$12 sps:$4 sm:$0xff]   ;;  %v5439_v17 = vld [vmem:[#allocation4 + $0x18] ss:$12 sps:$4 sm:$0xff]   ;;  %v5440_v18 = vld [vmem:[#allocation4 + $0x34] ss:$12 sps:$4 sm:$0xff]  }
 0x164   :  { %v5291_v23 = vpop.eup %5290  ;;  %v848_v24 = vsub.f32 1.0, %v5289_v22  ;;  %v850_v52 = vmul.f32 0.0, %v5289_v22  ;;  %v5444_v22 = vld [vmem:[#allocation4 + $0x64] ss:$12 sps:$4 sm:$0xff]  }
 0x165   :  { %5292 = vtanh.f32 %v846_v19  ;;  %v872_v21 = vadd.f32 %v871_v20, %v350_v11  ;;  %v874_v30 = vsub.f32 1.0, %v5291_v23  ;;  %v876_v16 = vmul.f32 0.0, %v5291_v23  ;;  %v5441_v19 = vld [vmem:[#allocation4 + $0x30] ss:$12 sps:$4 sm:$0xff]   ;;  %v5442_v20 = vld [vmem:[#allocation4 + $0x4c] ss:$12 sps:$4 sm:$0xff]  }
 0x166   :  { %v5445_v23 = vld [vmem:[#allocation4 + $0x60] ss:$12 sps:$4 sm:$0xff]  }
 0x167   :  { %5294 = vtanh.f32 %v872_v21  ;;  %v5443_v21 = vld [vmem:[#allocation4 + $0x48] ss:$12 sps:$4 sm:$0xff]  }
 0x16f   :  { %v5293_v29 = vpop.eup %5292 }
 0x170   :  { %v849_v12 = vmul.f32 %v5293_v29, %v848_v24  ;;  %v5446_v24 = vld [vmem:[#allocation4 + $0x7c] ss:$12 sps:$4 sm:$0xff]   ;;  %v5447_v29 = vld [vmem:[#allocation4 + $0x78] ss:$12 sps:$4 sm:$0xff]  }
 0x171   :  { %v5295_v10 = vpop.eup %5294 }
 0x172   :  { %v875_v14 = vmul.f32 %v5295_v10, %v874_v30  ;;  %v5897_v15 = vadd.f32 %v850_v52, %v849_v12  ;;  %v5448_v30 = vld [vmem:[#allocation4 + $0x94] ss:$12 sps:$4 sm:$0xff]   ;;  %v5449_v12 = vld [vmem:[#allocation4 + $0x90] ss:$12 sps:$4 sm:$0xff]   ;;  %v5450_v52 = vld [vmem:[#allocation4 + $0xac] ss:$12 sps:$4 sm:$0xff]  }
 0x173   :  { %v5451_v10 = vld [vmem:[#allocation4 + $0xa8] ss:$12 sps:$4 sm:$0xff]  }
 0x174   :  { %v5899_v26 = vadd.f32 %v876_v16, %v875_v14  ;;  %v884_v11 = vpack.c.bf16 %v6346_v56, %v5897_v15  ;;  %v5452_v14 = vld [vmem:[#allocation4 + $0xc4] ss:$12 sps:$4 sm:$0xff]   ;;  %v5453_v16 = vld [vmem:[#allocation4 + $0xc0] ss:$12 sps:$4 sm:$0xff]  }
 0x176   :  { %v885_v25 = vpack.c.bf16 %v5899_v26, %v6346_v56 }
 0x178   :  { %1238 = vmatprep.mubr.bf16.mxu0 %v885_v25  ;;  %1281 = vmatprep.mubr.bf16.mxu1 %v885_v25  ;;  %v5454_v25 = vld [vmem:[#allocation4 + $0xdc] ss:$12 sps:$4 sm:$0xff]  }
 0x179   :  { %1239 = vmatmul.mubr.bf16.vlgmr.msra.gmra.mrb[36].mxu0 %v884_v11  ;;  %1282 = vmatmul.mubr.bf16.vlgmr.msra.gmra.mrb[20].mxu1 %v884_v11  ;;  %v5455_v11 = vld [vmem:[#allocation4 + $0xd8] ss:$12 sps:$4 sm:$0xff]  }
 0x17a   :  { %1671 = vmatpush1.bf16.msra.mxu1 %v5437_v57  ;;  %v5456_v57 = vld [vmem:[#allocation4 + $0xf4] ss:$12 sps:$4 sm:$0xff]  }
 0x17b   :  { %1672 = vmatprep.subr.bf16.mxu1 %v5438_v58  ;;  %v5457_v58 = vld [vmem:[#allocation4 + $0xf0] ss:$12 sps:$4 sm:$0xff]  }
 0x17e   :  { %1673 = vmatpush1.bf16.msra.mxu1 %v5439_v17  ;;  %v5458_v17 = vld [vmem:[#allocation4 + $0x10c] ss:$12 sps:$4 sm:$0xff]  }
 0x17f   :  { %1674 = vmatprep.subr.bf16.mxu1 %v5440_v18  ;;  %v5459_v18 = vld [vmem:[#allocation4 + $0x108] ss:$12 sps:$4 sm:$0xff]  }
 0x182   :  { %1675 = vmatpush1.bf16.msra.mxu1 %v5441_v19  ;;  %v5460_v19 = vld [vmem:[#allocation4 + $0x124] ss:$12 sps:$4 sm:$0xff]  }
 0x183   :  { %1676 = vmatprep.subr.bf16.mxu1 %v5442_v20  ;;  %v5461_v20 = vld [vmem:[#allocation4 + $0x120] ss:$12 sps:$4 sm:$0xff]  }
 0x186   :  { %1677 = vmatpush1.bf16.msra.mxu1 %v5443_v21  ;;  %v5462_v21 = vld [vmem:[#allocation4 + $0x13c] ss:$12 sps:$4 sm:$0xff]  }
 0x187   :  { %1678 = vmatprep.subr.bf16.mxu1 %v5444_v22  ;;  %v5463_v22 = vld [vmem:[#allocation4 + $0x138] ss:$12 sps:$4 sm:$0xff]  }
 0x18a   :  { %1679 = vmatpush1.bf16.msra.mxu1 %v5445_v23  ;;  %v5464_v23 = vld [vmem:[#allocation4 + $0x154] ss:$12 sps:$4 sm:$0xff]  }
 0x18b   :  { %1680 = vmatprep.subr.bf16.mxu1 %v5446_v24  ;;  %v5068_v24 = vld [vmem:[#allocation4 + $0xc8] ss:$12 sps:$4 sm:$0xff]  }
 0x18c   :  { %4813 = vmatprep.subr.bf16.mxu0 %v5068_v24 }
 0x18e   :  { %1681 = vmatpush1.bf16.msra.mxu1 %v5447_v29  ;;  %v5069_v29 = vld [vmem:[#allocation4 + $0x8] ss:$12 sps:$4 sm:$0xff]  }
 0x18f   :  { %1682 = vmatprep.subr.bf16.mxu1 %v5448_v30  ;;  %4814 = vmatpush3.bf16.msra.mxu0 %v5069_v29  ;;  %v5070_v30 = vld [vmem:[#allocation4 + $0xe0] ss:$12 sps:$4 sm:$0xff]  }
 0x190   :  { %4815 = vmatprep.subr.bf16.mxu0 %v5070_v30 }
 0x192   :  { %1683 = vmatpush1.bf16.msra.mxu1 %v5449_v12  ;;  %v5071_v12 = vld [vmem:[#allocation4 + $0x20] ss:$12 sps:$4 sm:$0xff]  }
 0x193   :  { %1684 = vmatprep.subr.bf16.mxu1 %v5450_v52  ;;  %4816 = vmatpush3.bf16.msra.mxu0 %v5071_v12  ;;  %v5072_v52 = vld [vmem:[#allocation4 + $0xf8] ss:$12 sps:$4 sm:$0xff]  }
 0x194   :  { %4817 = vmatprep.subr.bf16.mxu0 %v5072_v52 }
 0x196   :  { %1685 = vmatpush1.bf16.msra.mxu1 %v5451_v10  ;;  %v5073_v10 = vld [vmem:[#allocation4 + $0x38] ss:$12 sps:$4 sm:$0xff]  }
 0x197   :  { %1686 = vmatprep.subr.bf16.mxu1 %v5452_v14  ;;  %4818 = vmatpush3.bf16.msra.mxu0 %v5073_v10  ;;  %v5074_v14 = vld [vmem:[#allocation4 + $0x110] ss:$12 sps:$4 sm:$0xff]  }
 0x198   :  { %4819 = vmatprep.subr.bf16.mxu0 %v5074_v14 }
 0x19a   :  { %1687 = vmatpush1.bf16.msra.mxu1 %v5453_v16  ;;  %v5075_v16 = vld [vmem:[#allocation4 + $0x50] ss:$12 sps:$4 sm:$0xff]  }
 0x19b   :  { %1688 = vmatprep.subr.bf16.mxu1 %v5454_v25  ;;  %4820 = vmatpush3.bf16.msra.mxu0 %v5075_v16  ;;  %v5078_v25 = vld [vmem:[#allocation4 + $0x140] ss:$12 sps:$4 sm:$0xff]  }
 0x19e   :  { %1689 = vmatpush1.bf16.msra.mxu1 %v5455_v11  ;;  %v5080_v11 = vld [vmem:[#allocation4 + $0x158] ss:$12 sps:$4 sm:$0xff]  }
 0x19f   :  { %1690 = vmatprep.subr.bf16.mxu1 %v5456_v57  ;;  %v5081_v57 = vld [vmem:[#allocation4 + $0x98] ss:$12 sps:$4 sm:$0xff]  }
 0x1a2   :  { %1691 = vmatpush1.bf16.msra.mxu1 %v5457_v58  ;;  %v5082_v58 = vld [vmem:[#allocation4 + $0x170] ss:$12 sps:$4 sm:$0xff]  }
 0x1a3   :  { %1692 = vmatprep.subr.bf16.mxu1 %v5458_v17  ;;  %v5083_v17 = vld [vmem:[#allocation4 + $0xb0] ss:$12 sps:$4 sm:$0xff]  }
 0x1a6   :  { %1693 = vmatpush1.bf16.msra.mxu1 %v5459_v18  ;;  %v5908_v18 = vld [vmem:[#allocation4 + $0x4] ss:$12 sps:$4 sm:$0xff]  }
 0x1a7   :  { %1694 = vmatprep.subr.bf16.mxu1 %v5460_v19 }
 0x1aa   :  { %1695 = vmatpush1.bf16.msra.mxu1 %v5461_v20 }
 0x1ab   :  { %1696 = vmatprep.subr.bf16.mxu1 %v5462_v21 }
 0x1ae   :  { %1697 = vmatpush1.bf16.msra.mxu1 %v5463_v22 }
 0x1af   :  { %1698 = vmatprep.subr.bf16.mxu1 %v5464_v23 }
 0x1b2   :  { %1699 = vmatpush1.bf16.msra.mxu1 %v5751_v1  ;;  %v5076_v1 = vld [vmem:[#allocation4 + $0x128] ss:$12 sps:$4 sm:$0xff]  }
 0x1b3   :  { %1700 = vmatprep.subr.bf16.mxu1 %v5755_v2  ;;  %v5077_v2 = vld [vmem:[#allocation4 + $0x68] ss:$12 sps:$4 sm:$0xff]   ;;  %4821 = vmatprep.subr.bf16.mxu0 %v5076_v1 }
 0x1b4   :  { %4822 = vmatpush3.bf16.msra.mxu0 %v5077_v2 }
 0x1b5   :  { %4823 = vmatprep.subr.bf16.mxu0 %v5078_v25 }
 0x1b6   :  { %1701 = vmatpush1.bf16.msra.mxu1 %v5758_v5  ;;  %v5079_v5 = vld [vmem:[#allocation4 + $0x80] ss:$12 sps:$4 sm:$0xff]  }
 0x1b8   :  { %4824 = vmatpush3.bf16.msra.mxu0 %v5079_v5 }
 0x1b9   :  { %4825 = vmatprep.subr.bf16.mxu0 %v5080_v11 }
 0x1bc   :  { %4826 = vmatpush3.bf16.msra.mxu0 %v5081_v57 }
 0x1bd   :  { %4827 = vmatprep.subr.bf16.mxu0 %v5082_v58 }
 0x1c0   :  { %4828 = vmatpush3.bf16.msra.mxu0 %v5083_v17 }
 0x1c1   :  { %2134 = vmatprep.subr.bf16.mxu0 %v5908_v18 }
 0x24c   :  { %v1240_v19 = vpop.f32.mrb[36].mxu0  ;;  %v4807_v20 = vpop.f32.mrb[20].mxu1 }
 0x24d   :  { %v1298_v21 = vadd.f32 %v1240_v19, %v5806_v31  ;;  %v1242_v22 = vpop.f32.mrb[37].mxu0  ;;  %v4808_v23 = vpop.f32.mrb[21].mxu1 }
 0x24e   :  { %v1305_v24 = vadd.f32 %v1242_v22, %v5808_v32  ;;  %v4809_v29 = vadd.f32 %v4808_v23, %v4807_v20  ;;  %v1244_v30 = vpop.f32.mrb[38].mxu0  ;;  %v4810_v12 = vpop.f32.mrb[22].mxu1 }
 0x24f   :  { %v4436_v52 = vmul.f32 -1.442695, %v1298_v21  ;;  %v1320_v10 = vadd.f32 %v1244_v30, %v5844_v50  ;;  %v1246_v14 = vpop.f32.mrb[39].mxu0  ;;  %v4811_v16 = vpop.f32.mrb[23].mxu1 }
 0x250   :  { %v1327_v1 = vadd.f32 %v1246_v14, %v5880_v0  ;;  %v4812_v2 = vadd.f32 %v4811_v16, %v4810_v12  ;;  %v4437_v5 = vmul.f32 -1.442695, %v1305_v24  ;;  %v1312_v20 = vadd.f32 %v4809_v29, %v5887_v13 }
 0x251   :  { %5296 = vpow2.f32 %v4436_v52  ;;  %v4438_v25 = vmul.f32 -1.442695, %v1320_v10 }
 0x252   :  { %v4439_v31 = vmul.f32 -1.442695, %v1327_v1  ;;  %v1334_v23 = vadd.f32 %v4812_v2, %v5893_v51 }
 0x253   :  { %5298 = vpow2.f32 %v4438_v25 }
 0x254   :  { %5300 = vpow2.f32 %v4437_v5 }
 0x255   :  { %5302 = vpow2.f32 %v4439_v31 }
 0x25b   :  { %v5297_v11 = vpop.eup %5296 }
 0x25c   :  { %v1302_v32 = vadd.f32 1.0, %v5297_v11 }
 0x25d   :  { %v5299_v57 = vpop.eup %5298 }
 0x25e   :  { %5304 = vrcp.f32 %v1302_v32  ;;  %v1324_v58 = vadd.f32 1.0, %v5299_v57  ;;  %v5301_v17 = vpop.eup %5300  ;;  %v5927_v57 = vld [vmem:[#allocation4] ss:$12 sps:$4 sm:$0xff]  }
 0x25f   :  { %v5303_v50 = vpop.eup %5302  ;;  %v1309_v19 = vadd.f32 1.0, %v5301_v17  ;;  %v5931_v17 = vld [vmem:[#allocation4 + $0x1c] ss:$12 sps:$4 sm:$0xff]  }
 0x260   :  { %5306 = vrcp.f32 %v1324_v58  ;;  %v1331_v0 = vadd.f32 1.0, %v5303_v50  ;;  %v5940_v50 = vld [vmem:[#allocation4 + $0x30] ss:$12 sps:$4 sm:$0xff]  }
 0x261   :  { %5308 = vrcp.f32 %v1309_v19  ;;  %v5944_v19 = vld [vmem:[#allocation4 + $0x4c] ss:$12 sps:$4 sm:$0xff]  }
 0x262   :  { %5310 = vrcp.f32 %v1331_v0  ;;  %v5950_v0 = vld [vmem:[#allocation4 + $0x64] ss:$12 sps:$4 sm:$0xff]  }
 0x268   :  { %v5305_v21 = vpop.eup %5304 }
 0x269   :  { %v1313_v22 = vmul.f32 %v5305_v21, %v1312_v20  ;;  %v5946_v20 = vld [vmem:[#allocation4 + $0x48] ss:$12 sps:$4 sm:$0xff]   ;;  %v5952_v21 = vld [vmem:[#allocation4 + $0x60] ss:$12 sps:$4 sm:$0xff]  }
 0x26a   :  { %v5307_v24 = vpop.eup %5306 }
 0x26b   :  { %v1314_v30 = vadd.f32 %v1313_v22, %v5802_v27  ;;  %v1335_v12 = vmul.f32 %v5307_v24, %v1334_v23  ;;  %v5309_v10 = vpop.eup %5308  ;;  %v5956_v22 = vld [vmem:[#allocation4 + $0x7c] ss:$12 sps:$4 sm:$0xff]   ;;  %v5958_v23 = vld [vmem:[#allocation4 + $0x78] ss:$12 sps:$4 sm:$0xff]   ;;  %v5962_v24 = vld [vmem:[#allocation4 + $0x94] ss:$12 sps:$4 sm:$0xff]  }
 0x26c   :  { %v5311_v14 = vpop.eup %5310  ;;  %v1316_v16 = vsub.f32 1.0, %v5309_v10  ;;  %v1318_v5 = vmul.f32 %v5309_v10, %v5897_v15  ;;  %v5934_v15 = vld [vmem:[#allocation4 + $0x18] ss:$12 sps:$4 sm:$0xff]  }
 0x26d   :  { %5312 = vtanh.f32 %v1314_v30  ;;  %v1336_v52 = vadd.f32 %v1335_v12, %v5882_v9  ;;  %v1338_v29 = vsub.f32 1.0, %v5311_v14  ;;  %v1340_v2 = vmul.f32 %v5311_v14, %v5899_v26  ;;  %v5937_v26 = vld [vmem:[#allocation4 + $0x34] ss:$12 sps:$4 sm:$0xff]   ;;  %v5964_v30 = vld [vmem:[#allocation4 + $0x90] ss:$12 sps:$4 sm:$0xff]  }
 0x26e   :  { %v5968_v12 = vld [vmem:[#allocation4 + $0xac] ss:$12 sps:$4 sm:$0xff]   ;;  %v5974_v10 = vld [vmem:[#allocation4 + $0xc4] ss:$12 sps:$4 sm:$0xff]   ;;  %v5111_v14 = vld [vmem:[#allocation4 + $0xc8] ss:$12 sps:$4 sm:$0xff]  }
 0x26f   :  { %5314 = vtanh.f32 %v1336_v52  ;;  %v5970_v52 = vld [vmem:[#allocation4 + $0xa8] ss:$12 sps:$4 sm:$0xff]   ;;  %4835 = vmatprep.subr.bf16.mxu1 %v5111_v14  ;;  %v5992_v14 = vld [vmem:[#allocation4 + $0x10c] ss:$12 sps:$4 sm:$0xff]  }
 0x277   :  { %v5313_v1 = vpop.eup %5312 }
 0x278   :  { %v1317_v25 = vmul.f32 %v5313_v1, %v1316_v16  ;;  %v5976_v16 = vld [vmem:[#allocation4 + $0xc0] ss:$12 sps:$4 sm:$0xff]   ;;  %v5112_v1 = vld [vmem:[#allocation4 + $0x8] ss:$12 sps:$4 sm:$0xff]  }
 0x279   :  { %v5315_v31 = vpop.eup %5314 }
 0x27a   :  { %v1339_v11 = vmul.f32 %v5315_v31, %v1338_v29  ;;  %v5921_v32 = vadd.f32 %v1318_v5, %v1317_v25  ;;  %v5980_v29 = vld [vmem:[#allocation4 + $0xdc] ss:$12 sps:$4 sm:$0xff]   ;;  %v5116_v25 = vld [vmem:[#allocation4 + $0xe0] ss:$12 sps:$4 sm:$0xff]   ;;  %v5982_v5 = vld [vmem:[#allocation4 + $0xd8] ss:$12 sps:$4 sm:$0xff]  }
 0x27b   :  { %v5117_v31 = vld [vmem:[#allocation4 + $0x20] ss:$12 sps:$4 sm:$0xff]  }
 0x27c   :  { %v5923_v27 = vadd.f32 %v1340_v2, %v1339_v11  ;;  %v1348_v58 = vpack.c.bf16 %v6346_v56, %v5921_v32  ;;  %v5986_v11 = vld [vmem:[#allocation4 + $0xf4] ss:$12 sps:$4 sm:$0xff]   ;;  %v5121_v2 = vld [vmem:[#allocation4 + $0xf8] ss:$12 sps:$4 sm:$0xff]  }
 0x27e   :  { %v1349_v9 = vpack.c.bf16 %v5923_v27, %v6346_v56  ;;  %v5994_v56 = vld [vmem:[#allocation4 + $0x108] ss:$12 sps:$4 sm:$0xff]  }
 0x280   :  { %1702 = vmatprep.mubr.bf16.mxu1 %v1349_v9  ;;  %1745 = vmatprep.mubr.bf16.mxu0 %v1349_v9  ;;  %v5988_v9 = vld [vmem:[#allocation4 + $0xf0] ss:$12 sps:$4 sm:$0xff]  }
 0x281   :  { %1703 = vmatmul.mubr.bf16.vlgmr.msra.gmra.mrb[24].mxu1 %v1348_v58  ;;  %1746 = vmatmul.mubr.bf16.vlgmr.msra.gmra.mrb[40].mxu0 %v1348_v58  ;;  %v5122_v58 = vld [vmem:[#allocation4 + $0x38] ss:$12 sps:$4 sm:$0xff]  }
 0x282   :  { %2135 = vmatpush1.bf16.msra.mxu0 %v5927_v57  ;;  %4836 = vmatpush3.bf16.msra.mxu1 %v5112_v1  ;;  %v5126_v1 = vld [vmem:[#allocation4 + $0x110] ss:$12 sps:$4 sm:$0xff]  }
 0x283   :  { %2136 = vmatprep.subr.bf16.mxu0 %v5931_v17  ;;  %4837 = vmatprep.subr.bf16.mxu1 %v5116_v25  ;;  %v5127_v25 = vld [vmem:[#allocation4 + $0x50] ss:$12 sps:$4 sm:$0xff]  }
 0x286   :  { %2137 = vmatpush1.bf16.msra.mxu0 %v5934_v15  ;;  %4838 = vmatpush3.bf16.msra.mxu1 %v5117_v31  ;;  %v5998_v31 = vld [vmem:[#allocation4 + $0x120] ss:$12 sps:$4 sm:$0xff]  }
 0x287   :  { %2138 = vmatprep.subr.bf16.mxu0 %v5937_v26  ;;  %4839 = vmatprep.subr.bf16.mxu1 %v5121_v2  ;;  %v5131_v2 = vld [vmem:[#allocation4 + $0x128] ss:$12 sps:$4 sm:$0xff]  }
 0x28a   :  { %2139 = vmatpush1.bf16.msra.mxu0 %v5940_v50  ;;  %4840 = vmatpush3.bf16.msra.mxu1 %v5122_v58  ;;  %v5136_v58 = vld [vmem:[#allocation4 + $0x140] ss:$12 sps:$4 sm:$0xff]  }
 0x28b   :  { %2140 = vmatprep.subr.bf16.mxu0 %v5944_v19  ;;  %4841 = vmatprep.subr.bf16.mxu1 %v5126_v1  ;;  %v5137_v1 = vld [vmem:[#allocation4 + $0x80] ss:$12 sps:$4 sm:$0xff]  }
 0x28e   :  { %2141 = vmatpush1.bf16.msra.mxu0 %v5946_v20  ;;  %4842 = vmatpush3.bf16.msra.mxu1 %v5127_v25  ;;  %v6009_v25 = vld [vmem:[#allocation4 + $0x154] ss:$12 sps:$4 sm:$0xff]  }
 0x28f   :  { %2142 = vmatprep.subr.bf16.mxu0 %v5950_v0  ;;  %4843 = vmatprep.subr.bf16.mxu1 %v5131_v2  ;;  %v6015_v2 = vld [vmem:[#allocation4 + $0x16c] ss:$12 sps:$4 sm:$0xff]  }
 0x292   :  { %2143 = vmatpush1.bf16.msra.mxu0 %v5952_v21  ;;  %4844 = vmatpush3.bf16.msra.mxu1 %v5132_v60  ;;  %v5146_v60 = vld [vmem:[#allocation4 + $0x170] ss:$12 sps:$4 sm:$0xff]  }
 0x293   :  { %2144 = vmatprep.subr.bf16.mxu0 %v5956_v22  ;;  %4845 = vmatprep.subr.bf16.mxu1 %v5136_v58  ;;  %v5147_v58 = vld [vmem:[#allocation4 + $0xb0] ss:$12 sps:$4 sm:$0xff]  }
 0x296   :  { %2145 = vmatpush1.bf16.msra.mxu0 %v5958_v23  ;;  %4846 = vmatpush3.bf16.msra.mxu1 %v5137_v1 }
 0x297   :  { %2146 = vmatprep.subr.bf16.mxu0 %v5962_v24  ;;  %4847 = vmatprep.subr.bf16.mxu1 %v5141_v28 }
 0x29a   :  { %2147 = vmatpush1.bf16.msra.mxu0 %v5964_v30  ;;  %4848 = vmatpush3.bf16.msra.mxu1 %v5142_v53 }
 0x29b   :  { %2148 = vmatprep.subr.bf16.mxu0 %v5968_v12  ;;  %4849 = vmatprep.subr.bf16.mxu1 %v5146_v60 }
 0x29e   :  { %2149 = vmatpush1.bf16.msra.mxu0 %v5970_v52  ;;  %4850 = vmatpush3.bf16.msra.mxu1 %v5147_v58 }
 0x29f   :  { %2150 = vmatprep.subr.bf16.mxu0 %v5974_v10  ;;  %2598 = vmatprep.subr.bf16.mxu1 %v5908_v18 }
 0x2a2   :  { %2151 = vmatpush1.bf16.msra.mxu0 %v5976_v16 }
 0x2a3   :  { %2152 = vmatprep.subr.bf16.mxu0 %v5980_v29 }
 0x2a6   :  { %2153 = vmatpush1.bf16.msra.mxu0 %v5982_v5 }
 0x2a7   :  { %2154 = vmatprep.subr.bf16.mxu0 %v5986_v11 }
 0x2aa   :  { %2155 = vmatpush1.bf16.msra.mxu0 %v5988_v9 }
 0x2ab   :  { %2156 = vmatprep.subr.bf16.mxu0 %v5992_v14 }
 0x2ae   :  { %2157 = vmatpush1.bf16.msra.mxu0 %v5994_v56 }
 0x2af   :  { %2158 = vmatprep.subr.bf16.mxu0 %v6000_v55 }
 0x2b2   :  { %2159 = vmatpush1.bf16.msra.mxu0 %v5998_v31 }
 0x2b3   :  { %2160 = vmatprep.subr.bf16.mxu0 %v6002_v49 }
 0x2b6   :  { %2161 = vmatpush1.bf16.msra.mxu0 %v6006_v59 }
 0x2b7   :  { %2162 = vmatprep.subr.bf16.mxu0 %v6009_v25 }
 0x2ba   :  { %2163 = vmatpush1.bf16.msra.mxu0 %v6012_v54 }
 0x2bb   :  { %2164 = vmatprep.subr.bf16.mxu0 %v6015_v2 }
 0x2be   :  { %2165 = vmatpush1.bf16.msra.mxu0 %v6018_v62 }
 0x354   :  { %v1704_v1 = vpop.f32.mrb[24].mxu1  ;;  %v4829_v43 = vpop.f32.mrb[40].mxu0 }
 0x355   :  { %v1762_v28 = vadd.f32 %v1704_v1, %v5818_v37  ;;  %v1706_v61 = vpop.f32.mrb[25].mxu1  ;;  %v4830_v34 = vpop.f32.mrb[41].mxu0 }
 0x356   :  { %v1769_v48 = vadd.f32 %v1706_v61, %v5820_v38  ;;  %v4831_v53 = vadd.f32 %v4830_v34, %v4829_v43  ;;  %v1708_v47 = vpop.f32.mrb[26].mxu1  ;;  %v4832_v3 = vpop.f32.mrb[42].mxu0 }
 0x357   :  { %v4488_v41 = vmul.f32 -1.442695, %v1762_v28  ;;  %v1784_v63 = vadd.f32 %v1708_v47, %v5832_v44  ;;  %v1710_v60 = vpop.f32.mrb[27].mxu1  ;;  %v4833_v36 = vpop.f32.mrb[43].mxu0 }
 0x358   :  { %v1791_v58 = vadd.f32 %v1710_v60, %v5876_v7  ;;  %v4834_v46 = vadd.f32 %v4833_v36, %v4832_v3  ;;  %v4489_v6 = vmul.f32 -1.442695, %v1769_v48  ;;  %v1776_v28 = vadd.f32 %v4831_v53, %v5887_v13 }
 0x359   :  { %5316 = vpow2.f32 %v4488_v41  ;;  %v4490_v45 = vmul.f32 -1.442695, %v1784_v63 }
 0x35a   :  { %v4491_v37 = vmul.f32 -1.442695, %v1791_v58 }
 0x35b   :  { %5318 = vpow2.f32 %v4490_v45  ;;  %v1798_v45 = vadd.f32 %v4834_v46, %v5893_v51 }
 0x35c   :  { %5320 = vpow2.f32 %v4489_v6 }
 0x35d   :  { %5322 = vpow2.f32 %v4491_v37 }
 0x363   :  { %v5317_v1 = vpop.eup %5316 }
 0x364   :  { %v1766_v38 = vadd.f32 1.0, %v5317_v1 }
 0x365   :  { %v5319_v34 = vpop.eup %5318 }
 0x366   :  { %5324 = vrcp.f32 %v1766_v38  ;;  %v1788_v43 = vadd.f32 1.0, %v5319_v34  ;;  %v5321_v61 = vpop.eup %5320 }
 0x367   :  { %v5323_v44 = vpop.eup %5322  ;;  %v1773_v47 = vadd.f32 1.0, %v5321_v61 }
 0x368   :  { %5326 = vrcp.f32 %v1788_v43  ;;  %v1795_v7 = vadd.f32 1.0, %v5323_v44 }
 0x369   :  { %5328 = vrcp.f32 %v1773_v47  ;;  %v6373_v47 = vmov 0.0  }
 0x36a   :  { %5330 = vrcp.f32 %v1795_v7  ;;  %v5150_v7 = vld [vmem:[#allocation4 + $0xe0] ss:$12 sps:$4 sm:$0xff]  }
 0x370   :  { %v5325_v36 = vpop.eup %5324 }
 0x371   :  { %v1777_v41 = vmul.f32 %v5325_v36, %v1776_v28  ;;  %v5151_v36 = vld [vmem:[#allocation4 + $0x20] ss:$12 sps:$4 sm:$0xff]  }
 0x372   :  { %v5327_v48 = vpop.eup %5326 }
 0x373   :  { %v1778_v63 = vadd.f32 %v1777_v41, %v5810_v33  ;;  %v1799_v3 = vmul.f32 %v5327_v48, %v1798_v45  ;;  %v5329_v60 = vpop.eup %5328  ;;  %v5152_v41 = vld [vmem:[#allocation4 + $0xf8] ss:$12 sps:$4 sm:$0xff]   ;;  %v5154_v48 = vld [vmem:[#allocation4 + $0x110] ss:$12 sps:$4 sm:$0xff]  }
 0x374   :  { %v5331_v58 = vpop.eup %5330  ;;  %v1780_v37 = vsub.f32 1.0, %v5329_v60  ;;  %v1782_v34 = vmul.f32 %v5329_v60, %v5921_v32  ;;  %v5148_v32 = vld [vmem:[#allocation4 + $0xc8] ss:$12 sps:$4 sm:$0xff]   ;;  %v5153_v45 = vld [vmem:[#allocation4 + $0x38] ss:$12 sps:$4 sm:$0xff]  }
 0x375   :  { %5332 = vtanh.f32 %v1778_v63  ;;  %v1800_v6 = vadd.f32 %v1799_v3, %v5878_v8  ;;  %v1802_v53 = vsub.f32 1.0, %v5331_v58  ;;  %v1804_v46 = vmul.f32 %v5331_v58, %v5923_v27  ;;  %v5149_v27 = vld [vmem:[#allocation4 + $0x8] ss:$12 sps:$4 sm:$0xff]   ;;  %4857 = vmatprep.subr.bf16.mxu0 %v5148_v32  ;;  %v5155_v63 = vld [vmem:[#allocation4 + $0x50] ss:$12 sps:$4 sm:$0xff]  }
 0x376   :  { %v5156_v3 = vld [vmem:[#allocation4 + $0x128] ss:$12 sps:$4 sm:$0xff]   ;;  %v5158_v60 = vld [vmem:[#allocation4 + $0x140] ss:$12 sps:$4 sm:$0xff]  }
 0x377   :  { %5334 = vtanh.f32 %v1800_v6  ;;  %v5157_v6 = vld [vmem:[#allocation4 + $0x68] ss:$12 sps:$4 sm:$0xff]   ;;  %v5159_v58 = vld [vmem:[#allocation4 + $0x80] ss:$12 sps:$4 sm:$0xff]  }
 0x37f   :  { %v5333_v1 = vpop.eup %5332 }
 0x380   :  { %v1781_v38 = vmul.f32 %v5333_v1, %v1780_v37  ;;  %v5160_v37 = vld [vmem:[#allocation4 + $0x158] ss:$12 sps:$4 sm:$0xff]  }
 0x381   :  { %v5335_v43 = vpop.eup %5334  ;;  %v5161_v1 = vld [vmem:[#allocation4 + $0x98] ss:$12 sps:$4 sm:$0xff]  }
 0x382   :  { %v1803_v61 = vmul.f32 %v5335_v43, %v1802_v53  ;;  %v6033_v44 = vadd.f32 %v1782_v34, %v1781_v38  ;;  %v5162_v53 = vld [vmem:[#allocation4 + $0x170] ss:$12 sps:$4 sm:$0xff]  }
 0x383   :  { %v5163_v38 = vld [vmem:[#allocation4 + $0xb0] ss:$12 sps:$4 sm:$0xff]  }
 0x384   :  { %v6035_v33 = vadd.f32 %v1804_v46, %v1803_v61  ;;  %v1812_v28 = vpack.c.bf16 %v6373_v47, %v6033_v44 }
 0x386   :  { %v1813_v8 = vpack.c.bf16 %v6035_v33, %v6373_v47 }
 0x388   :  { %2166 = vmatprep.mubr.bf16.mxu0 %v1813_v8  ;;  %2209 = vmatprep.mubr.bf16.mxu1 %v1813_v8 }
 0x389   :  { %2167 = vmatmul.mubr.bf16.vlgmr.msra.gmra.mrb[44].mxu0 %v1812_v28  ;;  %2210 = vmatmul.mubr.bf16.vlgmr.msra.gmra.mrb[28].mxu1 %v1812_v28 }
 0x38a   :  { %2599 = vmatpush1.bf16.msra.mxu1 %v5927_v57  ;;  %4858 = vmatpush3.bf16.msra.mxu0 %v5149_v27 }
 0x38b   :  { %2600 = vmatprep.subr.bf16.mxu1 %v5931_v17  ;;  %4859 = vmatprep.subr.bf16.mxu0 %v5150_v7 }
 0x38e   :  { %2601 = vmatpush1.bf16.msra.mxu1 %v5934_v15  ;;  %4860 = vmatpush3.bf16.msra.mxu0 %v5151_v36 }
 0x38f   :  { %2602 = vmatprep.subr.bf16.mxu1 %v5937_v26  ;;  %4861 = vmatprep.subr.bf16.mxu0 %v5152_v41 }
 0x392   :  { %2603 = vmatpush1.bf16.msra.mxu1 %v5940_v50  ;;  %4862 = vmatpush3.bf16.msra.mxu0 %v5153_v45 }
 0x393   :  { %2604 = vmatprep.subr.bf16.mxu1 %v5944_v19  ;;  %4863 = vmatprep.subr.bf16.mxu0 %v5154_v48 }
 0x396   :  { %2605 = vmatpush1.bf16.msra.mxu1 %v5946_v20  ;;  %4864 = vmatpush3.bf16.msra.mxu0 %v5155_v63 }
 0x397   :  { %2606 = vmatprep.subr.bf16.mxu1 %v5950_v0  ;;  %4865 = vmatprep.subr.bf16.mxu0 %v5156_v3 }
 0x39a   :  { %2607 = vmatpush1.bf16.msra.mxu1 %v5952_v21  ;;  %4866 = vmatpush3.bf16.msra.mxu0 %v5157_v6 }
 0x39b   :  { %2608 = vmatprep.subr.bf16.mxu1 %v5956_v22  ;;  %4867 = vmatprep.subr.bf16.mxu0 %v5158_v60 }
 0x39e   :  { %2609 = vmatpush1.bf16.msra.mxu1 %v5958_v23  ;;  %4868 = vmatpush3.bf16.msra.mxu0 %v5159_v58 }
 0x39f   :  { %2610 = vmatprep.subr.bf16.mxu1 %v5962_v24  ;;  %4869 = vmatprep.subr.bf16.mxu0 %v5160_v37 }
 0x3a2   :  { %2611 = vmatpush1.bf16.msra.mxu1 %v5964_v30  ;;  %4870 = vmatpush3.bf16.msra.mxu0 %v5161_v1 }
 0x3a3   :  { %2612 = vmatprep.subr.bf16.mxu1 %v5968_v12  ;;  %4871 = vmatprep.subr.bf16.mxu0 %v5162_v53 }
 0x3a6   :  { %2613 = vmatpush1.bf16.msra.mxu1 %v5970_v52  ;;  %4872 = vmatpush3.bf16.msra.mxu0 %v5163_v38 }
 0x3a7   :  { %2614 = vmatprep.subr.bf16.mxu1 %v5974_v10  ;;  %3060 = vmatprep.subr.bf16.mxu0 %v5908_v18 }
 0x3aa   :  { %2615 = vmatpush1.bf16.msra.mxu1 %v5976_v16 }
 0x3ab   :  { %2616 = vmatprep.subr.bf16.mxu1 %v5980_v29 }
 0x3ae   :  { %2617 = vmatpush1.bf16.msra.mxu1 %v5982_v5 }
 0x3af   :  { %2618 = vmatprep.subr.bf16.mxu1 %v5986_v11 }
 0x3b2   :  { %2619 = vmatpush1.bf16.msra.mxu1 %v5988_v9 }
 0x3b3   :  { %2620 = vmatprep.subr.bf16.mxu1 %v5992_v14 }
 0x3b6   :  { %2621 = vmatpush1.bf16.msra.mxu1 %v5994_v56 }
 0x3b7   :  { %2622 = vmatprep.subr.bf16.mxu1 %v6000_v55 }
 0x3ba   :  { %2623 = vmatpush1.bf16.msra.mxu1 %v5998_v31 }
 0x3bb   :  { %2624 = vmatprep.subr.bf16.mxu1 %v6002_v49 }
 0x3be   :  { %2625 = vmatpush1.bf16.msra.mxu1 %v6006_v59 }
 0x3bf   :  { %2626 = vmatprep.subr.bf16.mxu1 %v6009_v25 }
 0x3c2   :  { %2627 = vmatpush1.bf16.msra.mxu1 %v6012_v54 }
 0x3c3   :  { %2628 = vmatprep.subr.bf16.mxu1 %v6015_v2 }
 0x3c6   :  { %2629 = vmatpush1.bf16.msra.mxu1 %v6018_v62 }
 0x45c   :  { %v2168_v34 = vpop.f32.mrb[44].mxu0  ;;  %v4851_v43 = vpop.f32.mrb[28].mxu1 }
 0x45d   :  { %v2226_v61 = vadd.f32 %v2168_v34, %v5822_v39  ;;  %v2170_v46 = vpop.f32.mrb[45].mxu0  ;;  %v4852_v8 = vpop.f32.mrb[29].mxu1 }
 0x45e   :  { %v2233_v28 = vadd.f32 %v2170_v46, %v5824_v40  ;;  %v4853_v32 = vadd.f32 %v4852_v8, %v4851_v43  ;;  %v2172_v27 = vpop.f32.mrb[46].mxu0  ;;  %v4854_v7 = vpop.f32.mrb[30].mxu1 }
 0x45f   :  { %v4540_v36 = vmul.f32 -1.442695, %v2226_v61  ;;  %v2248_v41 = vadd.f32 %v2172_v27, %v5828_v42  ;;  %v2174_v45 = vpop.f32.mrb[47].mxu0  ;;  %v4855_v48 = vpop.f32.mrb[31].mxu1  ;;  %v6374_v27 = vld [vmem:[#allocation37_spill] sm:$0xff] }
 0x460   :  { %v2255_v63 = vadd.f32 %v2174_v45, %v5872_v4  ;;  %v4856_v3 = vadd.f32 %v4855_v48, %v4854_v7  ;;  %v4541_v6 = vmul.f32 -1.442695, %v2233_v28  ;;  %v2240_v38 = vadd.f32 %v4853_v32, %v5887_v13 }
 0x461   :  { %5336 = vpow2.f32 %v4540_v36  ;;  %v4542_v18 = vmul.f32 -1.442695, %v2248_v41 }
 0x462   :  { %v4543_v39 = vmul.f32 -1.442695, %v2255_v63  ;;  %v2262_v61 = vadd.f32 %v4856_v3, %v5893_v51 }
 0x463   :  { %5338 = vpow2.f32 %v4542_v18 }
 0x464   :  { %5340 = vpow2.f32 %v4541_v6 }
 0x465   :  { %5342 = vpow2.f32 %v4543_v39 }
 0x46b   :  { %v5337_v60 = vpop.eup %5336 }
 0x46c   :  { %v2230_v40 = vadd.f32 1.0, %v5337_v60 }
 0x46d   :  { %v5339_v58 = vpop.eup %5338 }
 0x46e   :  { %5344 = vrcp.f32 %v2230_v40  ;;  %v2252_v37 = vadd.f32 1.0, %v5339_v58  ;;  %v5341_v1 = vpop.eup %5340  ;;  %v6378_v40 = vld [vmem:[#allocation35_spill] sm:$0xff] }
 0x46f   :  { %v5343_v42 = vpop.eup %5342  ;;  %v2237_v53 = vadd.f32 1.0, %v5341_v1 }
 0x470   :  { %5346 = vrcp.f32 %v2252_v37  ;;  %v2259_v4 = vadd.f32 1.0, %v5343_v42 }
 0x471   :  { %5348 = vrcp.f32 %v2237_v53 }
 0x472   :  { %5350 = vrcp.f32 %v2259_v4 }
 0x478   :  { %v5345_v34 = vpop.eup %5344 }
 0x479   :  { %v2241_v43 = vmul.f32 %v5345_v34, %v2240_v38 }
 0x47a   :  { %v5347_v46 = vpop.eup %5346 }
 0x47b   :  { %v2242_v8 = vadd.f32 %v2241_v43, %v5814_v35  ;;  %v2263_v28 = vmul.f32 %v5347_v46, %v2262_v61  ;;  %v5349_v36 = vpop.eup %5348 }
 0x47c   :  { %v5351_v41 = vpop.eup %5350  ;;  %v2244_v45 = vsub.f32 1.0, %v5349_v36  ;;  %v2246_v63 = vmul.f32 %v5349_v36, %v6033_v44 }
 0x47d   :  { %5352 = vtanh.f32 %v2242_v8  ;;  %v2264_v7 = vadd.f32 %v2263_v28, %v6374_v27  ;;  %v2266_v13 = vsub.f32 1.0, %v5351_v41  ;;  %v2268_v51 = vmul.f32 %v5351_v41, %v6035_v33  ;;  %v6132_v28 = vld [vmem:[%s6342_s3] ss:$0 sm:$0xff] }
 0x47f   :  { %5354 = vtanh.f32 %v2264_v7 }
 0x487   :  { %v5353_v48 = vpop.eup %5352 }
 0x488   :  { %v2245_v32 = vmul.f32 %v5353_v48, %v2244_v45  ;;  %v6138_v45 = vld [vmem:[%s6342_s3 + $0x1] ss:$0 sm:$0xff] }
 0x489   :  { %v5355_v18 = vpop.eup %5354 }
 0x48a   :  { %v2267_v6 = vmul.f32 %v5355_v18, %v2266_v13  ;;  %v6083_v3 = vadd.f32 %v2246_v63, %v2245_v32  ;;  %v6379_v32 = vld [vmem:[#allocation17_spill] sm:$0xff] }
 0x48c   :  { %v6085_v35 = vadd.f32 %v2268_v51, %v2267_v6  ;;  %v2276_v60 = vpack.c.bf16 %v6373_v47, %v6083_v3  ;;  %v6380_v6 = vld [vmem:[#allocation36_spill] sm:$0xff] }
 0x48e   :  { %v2277_v39 = vpack.c.bf16 %v6085_v35, %v6373_v47 }
 0x490   :  { %2630 = vmatprep.mubr.bf16.mxu1 %v2277_v39  ;;  %2673 = vmatprep.mubr.bf16.mxu0 %v2277_v39 }
 0x491   :  { %2631 = vmatmul.mubr.bf16.vlgmr.msra.gmra.mrb[32].mxu1 %v2276_v60  ;;  %2674 = vmatmul.mubr.bf16.vlgmr.msra.gmra.mrb[48].mxu0 %v2276_v60 }
 0x492   :  { %3061 = vmatpush1.bf16.msra.mxu0 %v5927_v57  ;;  %v5164_v57 = vld [vmem:[#allocation4 + $0xc8] ss:$12 sps:$4 sm:$0xff]  }
 0x493   :  { %3062 = vmatprep.subr.bf16.mxu0 %v5931_v17  ;;  %v5165_v17 = vld [vmem:[#allocation4 + $0x8] ss:$12 sps:$4 sm:$0xff]   ;;  %4879 = vmatprep.subr.bf16.mxu1 %v5164_v57 }
 0x494   :  { %4880 = vmatpush3.bf16.msra.mxu1 %v5165_v17 }
 0x496   :  { %3063 = vmatpush1.bf16.msra.mxu0 %v5934_v15  ;;  %v5168_v15 = vld [vmem:[#allocation4 + $0xf8] ss:$12 sps:$4 sm:$0xff]  }
 0x497   :  { %3064 = vmatprep.subr.bf16.mxu0 %v5937_v26  ;;  %v5171_v26 = vld [vmem:[#allocation4 + $0x50] ss:$12 sps:$4 sm:$0xff]  }
 0x49a   :  { %3065 = vmatpush1.bf16.msra.mxu0 %v5940_v50  ;;  %v5173_v50 = vld [vmem:[#allocation4 + $0x68] ss:$12 sps:$4 sm:$0xff]  }
 0x49b   :  { %3066 = vmatprep.subr.bf16.mxu0 %v5944_v19  ;;  %v5174_v19 = vld [vmem:[#allocation4 + $0x140] ss:$12 sps:$4 sm:$0xff]  }
 0x49e   :  { %3067 = vmatpush1.bf16.msra.mxu0 %v5946_v20  ;;  %v5176_v20 = vld [vmem:[#allocation4 + $0x158] ss:$12 sps:$4 sm:$0xff]  }
 0x49f   :  { %3068 = vmatprep.subr.bf16.mxu0 %v5950_v0  ;;  %v5177_v0 = vld [vmem:[#allocation4 + $0x98] ss:$12 sps:$4 sm:$0xff]  }
 0x4a2   :  { %3069 = vmatpush1.bf16.msra.mxu0 %v5952_v21  ;;  %v5178_v21 = vld [vmem:[#allocation4 + $0x170] ss:$12 sps:$4 sm:$0xff]  }
 0x4a3   :  { %3070 = vmatprep.subr.bf16.mxu0 %v5956_v22  ;;  %v5179_v22 = vld [vmem:[#allocation4 + $0xb0] ss:$12 sps:$4 sm:$0xff]  }
 0x4a6   :  { %3071 = vmatpush1.bf16.msra.mxu0 %v5958_v23  ;;  %v6122_v23 = vld [vmem:[#allocation4 + $0x4] ss:$12 sps:$4 sm:$0xff]  }
 0x4a7   :  { %3072 = vmatprep.subr.bf16.mxu0 %v5962_v24 }
 0x4aa   :  { %3073 = vmatpush1.bf16.msra.mxu0 %v5964_v30 }
 0x4ab   :  { %3074 = vmatprep.subr.bf16.mxu0 %v5968_v12  ;;  %v6375_v12 = vld [vmem:[#allocation19_spill] sm:$0xff] }
 0x4ae   :  { %3075 = vmatpush1.bf16.msra.mxu0 %v5970_v52 }
 0x4af   :  { %3076 = vmatprep.subr.bf16.mxu0 %v5974_v10 }
 0x4b2   :  { %3077 = vmatpush1.bf16.msra.mxu0 %v5976_v16 }
 0x4b3   :  { %3078 = vmatprep.subr.bf16.mxu0 %v5980_v29  ;;  %v6376_v29 = vld [vmem:[#allocation20_spill] sm:$0xff] }
 0x4b6   :  { %3079 = vmatpush1.bf16.msra.mxu0 %v5982_v5 }
 0x4b7   :  { %3080 = vmatprep.subr.bf16.mxu0 %v5986_v11 }
 0x4ba   :  { %3081 = vmatpush1.bf16.msra.mxu0 %v5988_v9 }
 0x4bb   :  { %3082 = vmatprep.subr.bf16.mxu0 %v5992_v14 }
 0x4be   :  { %3083 = vmatpush1.bf16.msra.mxu0 %v5994_v56  ;;  %v5166_v56 = vld [vmem:[#allocation4 + $0xe0] ss:$12 sps:$4 sm:$0xff]  }
 0x4bf   :  { %3084 = vmatprep.subr.bf16.mxu0 %v6000_v55  ;;  %v5167_v55 = vld [vmem:[#allocation4 + $0x20] ss:$12 sps:$4 sm:$0xff]   ;;  %4881 = vmatprep.subr.bf16.mxu1 %v5166_v56 }
 0x4c0   :  { %4882 = vmatpush3.bf16.msra.mxu1 %v5167_v55 }
 0x4c1   :  { %4883 = vmatprep.subr.bf16.mxu1 %v5168_v15 }
 0x4c2   :  { %3085 = vmatpush1.bf16.msra.mxu0 %v5998_v31 }
 0x4c3   :  { %3086 = vmatprep.subr.bf16.mxu0 %v6002_v49  ;;  %v5169_v49 = vld [vmem:[#allocation4 + $0x38] ss:$12 sps:$4 sm:$0xff]  }
 0x4c4   :  { %4884 = vmatpush3.bf16.msra.mxu1 %v5169_v49 }
 0x4c6   :  { %3087 = vmatpush1.bf16.msra.mxu0 %v6006_v59  ;;  %v5170_v59 = vld [vmem:[#allocation4 + $0x110] ss:$12 sps:$4 sm:$0xff]  }
 0x4c7   :  { %3088 = vmatprep.subr.bf16.mxu0 %v6009_v25  ;;  %4885 = vmatprep.subr.bf16.mxu1 %v5170_v59  ;;  %v6377_v25 = vld [vmem:[#allocation16_spill] sm:$0xff] }
 0x4c8   :  { %4886 = vmatpush3.bf16.msra.mxu1 %v5171_v26 }
 0x4ca   :  { %3089 = vmatpush1.bf16.msra.mxu0 %v6012_v54  ;;  %v5172_v54 = vld [vmem:[#allocation4 + $0x128] ss:$12 sps:$4 sm:$0xff]  }
 0x4cb   :  { %3090 = vmatprep.subr.bf16.mxu0 %v6015_v2  ;;  %4887 = vmatprep.subr.bf16.mxu1 %v5172_v54 }
 0x4cc   :  { %4888 = vmatpush3.bf16.msra.mxu1 %v5173_v50 }
 0x4cd   :  { %4889 = vmatprep.subr.bf16.mxu1 %v5174_v19 }
 0x4ce   :  { %3091 = vmatpush1.bf16.msra.mxu0 %v6018_v62  ;;  %v5175_v62 = vld [vmem:[#allocation4 + $0x80] ss:$12 sps:$4 sm:$0xff]  }
 0x4d0   :  { %4890 = vmatpush3.bf16.msra.mxu1 %v5175_v62  ;;  %v6151_v62 = vld [vmem:[#allocation4] ss:$12 sps:$4 sm:$0xff]  }
 0x4d1   :  { %4891 = vmatprep.subr.bf16.mxu1 %v5176_v20 }
 0x4d4   :  { %4892 = vmatpush3.bf16.msra.mxu1 %v5177_v0  ;;  %v6155_v0 = vld [vmem:[#allocation4 + $0x1c] ss:$12 sps:$4 sm:$0xff]  }
 0x4d5   :  { %4893 = vmatprep.subr.bf16.mxu1 %v5178_v21  ;;  %v6164_v21 = vld [vmem:[#allocation4 + $0x30] ss:$12 sps:$4 sm:$0xff]  }
 0x4d8   :  { %4894 = vmatpush3.bf16.msra.mxu1 %v5179_v22  ;;  %v6168_v22 = vld [vmem:[#allocation4 + $0x4c] ss:$12 sps:$4 sm:$0xff]  }
 0x4d9   :  { %3522 = vmatprep.subr.bf16.mxu1 %v6122_v23 }
 0x564   :  { %v2632_v24 = vpop.f32.mrb[32].mxu1  ;;  %v4873_v30 = vpop.f32.mrb[48].mxu0 }
 0x565   :  { %v2688_v52 = vadd.f32 %v2632_v24, %v6375_v12  ;;  %v2634_v10 = vpop.f32.mrb[33].mxu1  ;;  %v4874_v16 = vpop.f32.mrb[49].mxu0  ;;  %v6170_v24 = vld [vmem:[#allocation4 + $0x48] ss:$12 sps:$4 sm:$0xff]   ;;  %v6176_v12 = vld [vmem:[#allocation4 + $0x60] ss:$12 sps:$4 sm:$0xff]  }
 0x566   :  { %v2695_v5 = vadd.f32 %v2634_v10, %v6376_v29  ;;  %v4875_v11 = vadd.f32 %v4874_v16, %v4873_v30  ;;  %v2636_v9 = vpop.f32.mrb[34].mxu1  ;;  %v4876_v14 = vpop.f32.mrb[50].mxu0  ;;  %v6174_v30 = vld [vmem:[#allocation4 + $0x64] ss:$12 sps:$4 sm:$0xff]   ;;  %v6186_v16 = vld [vmem:[#allocation4 + $0x94] ss:$12 sps:$4 sm:$0xff]  }
 0x567   :  { %v4592_v31 = vmul.f32 -1.442695, %v2688_v52  ;;  %v2710_v2 = vadd.f32 %v2636_v9, %v6377_v25  ;;  %v2638_v44 = vpop.f32.mrb[35].mxu1  ;;  %v4877_v33 = vpop.f32.mrb[51].mxu0  ;;  %v6180_v52 = vld [vmem:[#allocation4 + $0x7c] ss:$12 sps:$4 sm:$0xff]  }
 0x568   :  { %v2717_v58 = vadd.f32 %v2638_v44, %v6378_v40  ;;  %v4878_v37 = vadd.f32 %v4877_v33, %v4876_v14  ;;  %v4593_v42 = vmul.f32 -1.442695, %v2695_v5  ;;  %v2702_v27 = vadd.f32 %v6132_v28, %v4875_v11  ;;  %v6182_v10 = vld [vmem:[#allocation4 + $0x78] ss:$12 sps:$4 sm:$0xff]   ;;  %v6188_v29 = vld [vmem:[#allocation4 + $0x90] ss:$12 sps:$4 sm:$0xff]  }
 0x569   :  { %5356 = vpow2.f32 %v4592_v31  ;;  %v4594_v1 = vmul.f32 -1.442695, %v2710_v2  ;;  %v6192_v5 = vld [vmem:[#allocation4 + $0xac] ss:$12 sps:$4 sm:$0xff]   ;;  %v6194_v11 = vld [vmem:[#allocation4 + $0xa8] ss:$12 sps:$4 sm:$0xff]  }
 0x56a   :  { %v4595_v53 = vmul.f32 -1.442695, %v2717_v58  ;;  %v2724_v48 = vadd.f32 %v6138_v45, %v4878_v37  ;;  %v6198_v9 = vld [vmem:[#allocation4 + $0xc4] ss:$12 sps:$4 sm:$0xff]   ;;  %v5207_v14 = vld [vmem:[#allocation4 + $0xc8] ss:$12 sps:$4 sm:$0xff]  }
 0x56b   :  { %5358 = vpow2.f32 %v4594_v1  ;;  %v6200_v31 = vld [vmem:[#allocation4 + $0xc0] ss:$12 sps:$4 sm:$0xff]   ;;  %v5208_v25 = vld [vmem:[#allocation4 + $0x8] ss:$12 sps:$4 sm:$0xff]   ;;  %4901 = vmatprep.subr.bf16.mxu0 %v5207_v14  ;;  %v6206_v33 = vld [vmem:[#allocation4 + $0xd8] ss:$12 sps:$4 sm:$0xff]  }
 0x56c   :  { %5360 = vpow2.f32 %v4593_v42  ;;  %v6204_v2 = vld [vmem:[#allocation4 + $0xdc] ss:$12 sps:$4 sm:$0xff]   ;;  %v5212_v44 = vld [vmem:[#allocation4 + $0xe0] ss:$12 sps:$4 sm:$0xff]   ;;  %v5217_v37 = vld [vmem:[#allocation4 + $0xf8] ss:$12 sps:$4 sm:$0xff]  }
 0x56d   :  { %5362 = vpow2.f32 %v4595_v53  ;;  %v5213_v40 = vld [vmem:[#allocation4 + $0x20] ss:$12 sps:$4 sm:$0xff]   ;;  %v6212_v1 = vld [vmem:[#allocation4 + $0xf0] ss:$12 sps:$4 sm:$0xff]   ;;  %v5218_v42 = vld [vmem:[#allocation4 + $0x38] ss:$12 sps:$4 sm:$0xff]  }
 0x56e   :  { %v6210_v58 = vld [vmem:[#allocation4 + $0xf4] ss:$12 sps:$4 sm:$0xff]   ;;  %v6216_v53 = vld [vmem:[#allocation4 + $0x10c] ss:$12 sps:$4 sm:$0xff]  }
 0x573   :  { %v5357_v38 = vpop.eup %5356 }
 0x574   :  { %v2692_v4 = vadd.f32 1.0, %v5357_v38  ;;  %v5222_v38 = vld [vmem:[#allocation4 + $0x110] ss:$12 sps:$4 sm:$0xff]  }
 0x575   :  { %v5359_v34 = vpop.eup %5358 }
 0x576   :  { %5364 = vrcp.f32 %v2692_v4  ;;  %v2714_v43 = vadd.f32 1.0, %v5359_v34  ;;  %v5361_v61 = vpop.eup %5360  ;;  %v6218_v4 = vld [vmem:[#allocation4 + $0x108] ss:$12 sps:$4 sm:$0xff]   ;;  %v5223_v34 = vld [vmem:[#allocation4 + $0x50] ss:$12 sps:$4 sm:$0xff]  }
 0x577   :  { %v5363_v46 = vpop.eup %5362  ;;  %v2699_v8 = vadd.f32 1.0, %v5361_v61  ;;  %v6224_v61 = vld [vmem:[#allocation4 + $0x124] ss:$12 sps:$4 sm:$0xff]  }
 0x578   :  { %5366 = vrcp.f32 %v2714_v43  ;;  %v2721_v7 = vadd.f32 1.0, %v5363_v46  ;;  %v6222_v43 = vld [vmem:[#allocation4 + $0x120] ss:$12 sps:$4 sm:$0xff]   ;;  %v5227_v46 = vld [vmem:[#allocation4 + $0x128] ss:$12 sps:$4 sm:$0xff]  }
 0x579   :  { %5368 = vrcp.f32 %v2699_v8  ;;  %v5228_v8 = vld [vmem:[#allocation4 + $0x68] ss:$12 sps:$4 sm:$0xff]  }
 0x57a   :  { %5370 = vrcp.f32 %v2721_v7  ;;  %v5232_v7 = vld [vmem:[#allocation4 + $0x140] ss:$12 sps:$4 sm:$0xff]  }
 0x580   :  { %v5365_v36 = vpop.eup %5364 }
 0x581   :  { %v2703_v41 = vmul.f32 %v5365_v36, %v2702_v27  ;;  %v6226_v27 = vld [vmem:[#allocation4 + $0x13c] ss:$12 sps:$4 sm:$0xff]   ;;  %v6230_v36 = vld [vmem:[#allocation4 + $0x138] ss:$12 sps:$4 sm:$0xff]  }
 0x582   :  { %v5367_v13 = vpop.eup %5366 }
 0x583   :  { %v2704_v63 = vadd.f32 %v2703_v41, %v6379_v32  ;;  %v2725_v18 = vmul.f32 %v5367_v13, %v2724_v48  ;;  %v5369_v39 = vpop.eup %5368  ;;  %v5233_v41 = vld [vmem:[#allocation4 + $0x80] ss:$12 sps:$4 sm:$0xff]   ;;  %v5237_v13 = vld [vmem:[#allocation4 + $0x158] ss:$12 sps:$4 sm:$0xff]   ;;  %v6236_v32 = vld [vmem:[#allocation4 + $0x150] ss:$12 sps:$4 sm:$0xff]  }
 0x584   :  { %v5371_v60 = vpop.eup %5370  ;;  %v2706_v57 = vsub.f32 1.0, %v5369_v39  ;;  %v2708_v15 = vmul.f32 %v5369_v39, %v6083_v3  ;;  %v6158_v3 = vld [vmem:[#allocation4 + $0x18] ss:$12 sps:$4 sm:$0xff]   ;;  %v6233_v48 = vld [vmem:[#allocation4 + $0x154] ss:$12 sps:$4 sm:$0xff]  }
 0x585   :  { %5372 = vtanh.f32 %v2704_v63  ;;  %v2726_v51 = vadd.f32 %v2725_v18, %v6380_v6  ;;  %v2728_v56 = vsub.f32 1.0, %v5371_v60  ;;  %v2730_v26 = vmul.f32 %v5371_v60, %v6085_v35  ;;  %v6161_v35 = vld [vmem:[#allocation4 + $0x34] ss:$12 sps:$4 sm:$0xff]   ;;  %v5238_v63 = vld [vmem:[#allocation4 + $0x98] ss:$12 sps:$4 sm:$0xff]  }
 0x586   :  { %v6239_v18 = vld [vmem:[#allocation4 + $0x16c] ss:$12 sps:$4 sm:$0xff]   ;;  %v5242_v6 = vld [vmem:[#allocation4 + $0x170] ss:$12 sps:$4 sm:$0xff]  }
 0x587   :  { %5374 = vtanh.f32 %v2726_v51  ;;  %v6242_v51 = vld [vmem:[#allocation4 + $0x168] ss:$12 sps:$4 sm:$0xff]   ;;  %v5243_v39 = vld [vmem:[#allocation4 + $0xb0] ss:$12 sps:$4 sm:$0xff]  }
 0x58f   :  { %v5373_v17 = vpop.eup %5372 }
 0x590   :  { %v2707_v55 = vmul.f32 %v5373_v17, %v2706_v57  ;;  %v6381_v17 = vld [vmem:[#allocation21_spill] sm:$0xff] }
 0x591   :  { %v5375_v49 = vpop.eup %5374 }
 0x592   :  { %v2729_v59 = vmul.f32 %v5375_v49, %v2728_v56  ;;  %v6145_v54 = vadd.f32 %v2708_v15, %v2707_v55  ;;  %v6382_v49 = vld [vmem:[#allocation22_spill] sm:$0xff] }
 0x594   :  { %v6147_v50 = vadd.f32 %v2730_v26, %v2729_v59  ;;  %v2738_v20 = vpack.c.bf16 %v6373_v47, %v6145_v54 }
 0x596   :  { %v2739_v19 = vpack.c.bf16 %v6147_v50, %v6373_v47 }
 0x598   :  { %3092 = vmatprep.mubr.bf16.mxu0 %v2739_v19  ;;  %3135 = vmatprep.mubr.bf16.mxu1 %v2739_v19 }
 0x599   :  { %3093 = vmatmul.mubr.bf16.vlgmr.msra.gmra.mrb[52].mxu0 %v2738_v20  ;;  %3136 = vmatmul.mubr.bf16.vlgmr.msra.gmra.mrb[36].mxu1 %v2738_v20 }
 0x59a   :  { %3523 = vmatpush1.bf16.msra.mxu1 %v6151_v62  ;;  %4902 = vmatpush3.bf16.msra.mxu0 %v5208_v25  ;;  %v6383_v25 = vld [vmem:[#allocation15_spill] sm:$0xff] }
 0x59b   :  { %3524 = vmatprep.subr.bf16.mxu1 %v6155_v0  ;;  %4903 = vmatprep.subr.bf16.mxu0 %v5212_v44 }
 0x59e   :  { %3525 = vmatpush1.bf16.msra.mxu1 %v6158_v3  ;;  %4904 = vmatpush3.bf16.msra.mxu0 %v5213_v40 }
 0x59f   :  { %3526 = vmatprep.subr.bf16.mxu1 %v6161_v35  ;;  %4905 = vmatprep.subr.bf16.mxu0 %v5217_v37 }
 0x5a2   :  { %3527 = vmatpush1.bf16.msra.mxu1 %v6164_v21  ;;  %4906 = vmatpush3.bf16.msra.mxu0 %v5218_v42  ;;  %v6384_v42 = vld [vmem:[#allocation33_spill] sm:$0xff] }
 0x5a3   :  { %3528 = vmatprep.subr.bf16.mxu1 %v6168_v22  ;;  %4907 = vmatprep.subr.bf16.mxu0 %v5222_v38 }
 0x5a6   :  { %3529 = vmatpush1.bf16.msra.mxu1 %v6170_v24  ;;  %4908 = vmatpush3.bf16.msra.mxu0 %v5223_v34 }
 0x5a7   :  { %3530 = vmatprep.subr.bf16.mxu1 %v6174_v30  ;;  %4909 = vmatprep.subr.bf16.mxu0 %v5227_v46 }
 0x5aa   :  { %3531 = vmatpush1.bf16.msra.mxu1 %v6176_v12  ;;  %4910 = vmatpush3.bf16.msra.mxu0 %v5228_v8 }
 0x5ab   :  { %3532 = vmatprep.subr.bf16.mxu1 %v6180_v52  ;;  %4911 = vmatprep.subr.bf16.mxu0 %v5232_v7 }
 0x5ae   :  { %3533 = vmatpush1.bf16.msra.mxu1 %v6182_v10  ;;  %4912 = vmatpush3.bf16.msra.mxu0 %v5233_v41 }
 0x5af   :  { %3534 = vmatprep.subr.bf16.mxu1 %v6186_v16  ;;  %4913 = vmatprep.subr.bf16.mxu0 %v5237_v13 }
 0x5b2   :  { %3535 = vmatpush1.bf16.msra.mxu1 %v6188_v29  ;;  %4914 = vmatpush3.bf16.msra.mxu0 %v5238_v63 }
 0x5b3   :  { %3536 = vmatprep.subr.bf16.mxu1 %v6192_v5  ;;  %4915 = vmatprep.subr.bf16.mxu0 %v5242_v6 }
 0x5b6   :  { %3537 = vmatpush1.bf16.msra.mxu1 %v6194_v11  ;;  %4916 = vmatpush3.bf16.msra.mxu0 %v5243_v39 }
 0x5b7   :  { %3538 = vmatprep.subr.bf16.mxu1 %v6198_v9  ;;  %3984 = vmatprep.subr.bf16.mxu0 %v6122_v23 }
 0x5ba   :  { %3539 = vmatpush1.bf16.msra.mxu1 %v6200_v31 }
 0x5bb   :  { %3540 = vmatprep.subr.bf16.mxu1 %v6204_v2 }
 0x5be   :  { %3541 = vmatpush1.bf16.msra.mxu1 %v6206_v33 }
 0x5bf   :  { %3542 = vmatprep.subr.bf16.mxu1 %v6210_v58 }
 0x5c2   :  { %3543 = vmatpush1.bf16.msra.mxu1 %v6212_v1 }
 0x5c3   :  { %3544 = vmatprep.subr.bf16.mxu1 %v6216_v53 }
 0x5c6   :  { %3545 = vmatpush1.bf16.msra.mxu1 %v6218_v4 }
 0x5c7   :  { %3546 = vmatprep.subr.bf16.mxu1 %v6224_v61 }
 0x5ca   :  { %3547 = vmatpush1.bf16.msra.mxu1 %v6222_v43 }
 0x5cb   :  { %3548 = vmatprep.subr.bf16.mxu1 %v6226_v27 }
 0x5ce   :  { %3549 = vmatpush1.bf16.msra.mxu1 %v6230_v36 }
 0x5cf   :  { %3550 = vmatprep.subr.bf16.mxu1 %v6233_v48 }
 0x5d2   :  { %3551 = vmatpush1.bf16.msra.mxu1 %v6236_v32 }
 0x5d3   :  { %3552 = vmatprep.subr.bf16.mxu1 %v6239_v18 }
 0x5d6   :  { %3553 = vmatpush1.bf16.msra.mxu1 %v6242_v51 }
 0x66c   :  { %v3094_v60 = vpop.f32.mrb[52].mxu0  ;;  %v4895_v57 = vpop.f32.mrb[36].mxu1 }
 0x66d   :  { %v3150_v56 = vadd.f32 %v3094_v60, %v6381_v17  ;;  %v3096_v55 = vpop.f32.mrb[53].mxu0  ;;  %v4896_v15 = vpop.f32.mrb[37].mxu1 }
 0x66e   :  { %v3157_v59 = vadd.f32 %v3096_v55, %v6382_v49  ;;  %v4897_v26 = vadd.f32 %v4896_v15, %v4895_v57  ;;  %v3098_v19 = vpop.f32.mrb[54].mxu0  ;;  %v4898_v20 = vpop.f32.mrb[38].mxu1 }
 0x66f   :  { %v4644_v14 = vmul.f32 -1.442695, %v3150_v56  ;;  %v3172_v44 = vadd.f32 %v3098_v19, %v6383_v25  ;;  %v3100_v40 = vpop.f32.mrb[55].mxu0  ;;  %v4899_v37 = vpop.f32.mrb[39].mxu1 }
 0x670   :  { %v3179_v38 = vadd.f32 %v3100_v40, %v6384_v42  ;;  %v4900_v34 = vadd.f32 %v4899_v37, %v4898_v20  ;;  %v4645_v46 = vmul.f32 -1.442695, %v3157_v59  ;;  %v3164_v57 = vadd.f32 %v6132_v28, %v4897_v26  ;;  %v6385_v59 = vld [vmem:[#allocation18_spill] sm:$0xff] }
 0x671   :  { %5376 = vpow2.f32 %v4644_v14  ;;  %v4646_v23 = vmul.f32 -1.442695, %v3172_v44  ;;  %v6386_v14 = vld [vmem:[#allocation34_spill] sm:$0xff] }
 0x672   :  { %v4647_v8 = vmul.f32 -1.442695, %v3179_v38  ;;  %v3186_v15 = vadd.f32 %v6138_v45, %v4900_v34 }
 0x673   :  { %5378 = vpow2.f32 %v4646_v23 }
 0x674   :  { %5380 = vpow2.f32 %v4645_v46 }
 0x675   :  { %5382 = vpow2.f32 %v4647_v8 }
 0x67b   :  { %v5377_v7 = vpop.eup %5376 }
 0x67c   :  { %v3154_v41 = vadd.f32 1.0, %v5377_v7 }
 0x67d   :  { %v5379_v13 = vpop.eup %5378 }
 0x67e   :  { %5384 = vrcp.f32 %v3154_v41  ;;  %v3176_v63 = vadd.f32 1.0, %v5379_v13  ;;  %v5381_v6 = vpop.eup %5380 }
 0x67f   :  { %v5383_v39 = vpop.eup %5382  ;;  %v3161_v60 = vadd.f32 1.0, %v5381_v6 }
 0x680   :  { %5386 = vrcp.f32 %v3176_v63  ;;  %v3183_v17 = vadd.f32 1.0, %v5383_v39 }
 0x681   :  { %5388 = vrcp.f32 %v3161_v60 }
 0x682   :  { %5390 = vrcp.f32 %v3183_v17 }
 0x688   :  { %v5385_v56 = vpop.eup %5384 }
 0x689   :  { %v3165_v55 = vmul.f32 %v5385_v56, %v3164_v57 }
 0x68a   :  { %v5387_v49 = vpop.eup %5386 }
 0x68b   :  { %v3166_v19 = vadd.f32 %v3165_v55, %v6385_v59  ;;  %v3187_v20 = vmul.f32 %v5387_v49, %v3186_v15  ;;  %v5389_v44 = vpop.eup %5388 }
 0x68c   :  { %v5391_v40 = vpop.eup %5390  ;;  %v3168_v37 = vsub.f32 1.0, %v5389_v44  ;;  %v3170_v23 = vmul.f32 %v5389_v44, %v6145_v54  ;;  %v5244_v54 = vld [vmem:[#allocation4 + $0xc8] ss:$12 sps:$4 sm:$0xff]  }
 0x68d   :  { %5392 = vtanh.f32 %v3166_v19  ;;  %v3188_v25 = vadd.f32 %v3187_v20, %v6386_v14  ;;  %v3190_v26 = vsub.f32 1.0, %v5391_v40  ;;  %v3192_v34 = vmul.f32 %v5391_v40, %v6147_v50  ;;  %v5245_v50 = vld [vmem:[#allocation4 + $0x8] ss:$12 sps:$4 sm:$0xff]   ;;  %4923 = vmatprep.subr.bf16.mxu1 %v5244_v54 }
 0x68f   :  { %5394 = vtanh.f32 %v3188_v25 }
 0x697   :  { %v5393_v42 = vpop.eup %5392 }
 0x698   :  { %v3169_v38 = vmul.f32 %v5393_v42, %v3168_v37 }
 0x699   :  { %v5395_v46 = vpop.eup %5394 }
 0x69a   :  { %v3191_v8 = vmul.f32 %v5395_v46, %v3190_v26  ;;  %v6257_v7 = vadd.f32 %v3170_v23, %v3169_v38  ;;  %v6391_v26 = vld [vmem:[#allocation23_spill] sm:$0xff]  ;;  %v6392_v46 = vld [vmem:[#allocation32_spill] sm:$0xff] }
 0x69c   :  { %v6259_v41 = vadd.f32 %v3192_v34, %v3191_v8  ;;  %v3200_v63 = vpack.c.bf16 %v6373_v47, %v6257_v7 }
 0x69e   :  { %v3201_v13 = vpack.c.bf16 %v6259_v41, %v6373_v47 }
 0x6a0   :  { %3554 = vmatprep.mubr.bf16.mxu1 %v3201_v13  ;;  %3597 = vmatprep.mubr.bf16.mxu0 %v3201_v13 }
 0x6a1   :  { %3555 = vmatmul.mubr.bf16.vlgmr.msra.gmra.mrb[40].mxu1 %v3200_v63  ;;  %3598 = vmatmul.mubr.bf16.vlgmr.msra.gmra.mrb[56].mxu0 %v3200_v63 }
 0x6a2   :  { %3985 = vmatpush1.bf16.msra.mxu0 %v6151_v62  ;;  %4924 = vmatpush3.bf16.msra.mxu1 %v5245_v50  ;;  %v5246_v62 = vld [vmem:[#allocation4 + $0xe0] ss:$12 sps:$4 sm:$0xff]  }
 0x6a3   :  { %3986 = vmatprep.subr.bf16.mxu0 %v6155_v0  ;;  %v5247_v0 = vld [vmem:[#allocation4 + $0x20] ss:$12 sps:$4 sm:$0xff]   ;;  %4925 = vmatprep.subr.bf16.mxu1 %v5246_v62 }
 0x6a6   :  { %3987 = vmatpush1.bf16.msra.mxu0 %v6158_v3  ;;  %4926 = vmatpush3.bf16.msra.mxu1 %v5247_v0  ;;  %v5248_v3 = vld [vmem:[#allocation4 + $0xf8] ss:$12 sps:$4 sm:$0xff]  }
 0x6a7   :  { %3988 = vmatprep.subr.bf16.mxu0 %v6161_v35  ;;  %v5249_v35 = vld [vmem:[#allocation4 + $0x38] ss:$12 sps:$4 sm:$0xff]   ;;  %4927 = vmatprep.subr.bf16.mxu1 %v5248_v3 }
 0x6aa   :  { %3989 = vmatpush1.bf16.msra.mxu0 %v6164_v21  ;;  %4928 = vmatpush3.bf16.msra.mxu1 %v5249_v35  ;;  %v5250_v21 = vld [vmem:[#allocation4 + $0x110] ss:$12 sps:$4 sm:$0xff]  }
 0x6ab   :  { %3990 = vmatprep.subr.bf16.mxu0 %v6168_v22  ;;  %v5251_v22 = vld [vmem:[#allocation4 + $0x50] ss:$12 sps:$4 sm:$0xff]   ;;  %4929 = vmatprep.subr.bf16.mxu1 %v5250_v21 }
 0x6ae   :  { %3991 = vmatpush1.bf16.msra.mxu0 %v6170_v24  ;;  %4930 = vmatpush3.bf16.msra.mxu1 %v5251_v22  ;;  %v5252_v24 = vld [vmem:[#allocation4 + $0x128] ss:$12 sps:$4 sm:$0xff]  }
 0x6af   :  { %3992 = vmatprep.subr.bf16.mxu0 %v6174_v30  ;;  %v5253_v30 = vld [vmem:[#allocation4 + $0x68] ss:$12 sps:$4 sm:$0xff]   ;;  %4931 = vmatprep.subr.bf16.mxu1 %v5252_v24 }
 0x6b2   :  { %3993 = vmatpush1.bf16.msra.mxu0 %v6176_v12  ;;  %v5254_v12 = vld [vmem:[#allocation4 + $0x140] ss:$12 sps:$4 sm:$0xff]   ;;  %4932 = vmatpush3.bf16.msra.mxu1 %v5253_v30 }
 0x6b3   :  { %3994 = vmatprep.subr.bf16.mxu0 %v6180_v52  ;;  %v5255_v52 = vld [vmem:[#allocation4 + $0x80] ss:$12 sps:$4 sm:$0xff]   ;;  %4933 = vmatprep.subr.bf16.mxu1 %v5254_v12 }
 0x6b6   :  { %3995 = vmatpush1.bf16.msra.mxu0 %v6182_v10  ;;  %v5256_v10 = vld [vmem:[#allocation4 + $0x158] ss:$12 sps:$4 sm:$0xff]   ;;  %4934 = vmatpush3.bf16.msra.mxu1 %v5255_v52 }
 0x6b7   :  { %3996 = vmatprep.subr.bf16.mxu0 %v6186_v16  ;;  %v5257_v16 = vld [vmem:[#allocation4 + $0x98] ss:$12 sps:$4 sm:$0xff]   ;;  %4935 = vmatprep.subr.bf16.mxu1 %v5256_v10  ;;  %v5262_v10 = vld [vmem:[#allocation7 + $0x48] sm:$0xff]  }
 0x6b8   :  { %v5260_v52 = vld [vmem:[#allocation7 + $0x40] sm:$0xff]  }
 0x6ba   :  { %3997 = vmatpush1.bf16.msra.mxu0 %v6188_v29  ;;  %v5258_v29 = vld [vmem:[#allocation4 + $0x170] ss:$12 sps:$4 sm:$0xff]   ;;  %4936 = vmatpush3.bf16.msra.mxu1 %v5257_v16 }
 0x6bb   :  { %3998 = vmatprep.subr.bf16.mxu0 %v6192_v5  ;;  %v5259_v5 = vld [vmem:[#allocation4 + $0xb0] ss:$12 sps:$4 sm:$0xff]   ;;  %4937 = vmatprep.subr.bf16.mxu1 %v5258_v29 }
 0x6bc   :  { %v5264_v16 = vld [vmem:[#allocation7 + $0x50] sm:$0xff]  }
 0x6bd   :  { %v5265_v29 = vld [vmem:[#allocation7 + $0x10] sm:$0xff]  }
 0x6be   :  { %3999 = vmatpush1.bf16.msra.mxu0 %v6194_v11  ;;  %4938 = vmatpush3.bf16.msra.mxu1 %v5259_v5  ;;  %v5266_v5 = vld [vmem:[#allocation7 + $0x58] sm:$0xff]  }
 0x6bf   :  { %4000 = vmatprep.subr.bf16.mxu0 %v6198_v9  ;;  %4945 = vmatprep.subr.bf16.mxu1 %v5260_v52 }
 0x6c2   :  { %4001 = vmatpush1.bf16.msra.mxu0 %v6200_v31  ;;  %v6387_v31 = vld [vmem:[#allocation25_spill] sm:$0xff] }
 0x6c3   :  { %4002 = vmatprep.subr.bf16.mxu0 %v6204_v2 }
 0x6c6   :  { %4003 = vmatpush1.bf16.msra.mxu0 %v6206_v33 }
 0x6c7   :  { %4004 = vmatprep.subr.bf16.mxu0 %v6210_v58 }
 0x6ca   :  { %4005 = vmatpush1.bf16.msra.mxu0 %v6212_v1  ;;  %v6388_v1 = vld [vmem:[#allocation26_spill] sm:$0xff] }
 0x6cb   :  { %4006 = vmatprep.subr.bf16.mxu0 %v6216_v53 }
 0x6ce   :  { %4007 = vmatpush1.bf16.msra.mxu0 %v6218_v4 }
 0x6cf   :  { %4008 = vmatprep.subr.bf16.mxu0 %v6224_v61 }
 0x6d2   :  { %4009 = vmatpush1.bf16.msra.mxu0 %v6222_v43 }
 0x6d3   :  { %4010 = vmatprep.subr.bf16.mxu0 %v6226_v27 }
 0x6d6   :  { %4011 = vmatpush1.bf16.msra.mxu0 %v6230_v36  ;;  %v6389_v36 = vld [vmem:[#allocation14_spill] sm:$0xff] }
 0x6d7   :  { %4012 = vmatprep.subr.bf16.mxu0 %v6233_v48 }
 0x6da   :  { %4013 = vmatpush1.bf16.msra.mxu0 %v6236_v32 }
 0x6db   :  { %4014 = vmatprep.subr.bf16.mxu0 %v6239_v18 }
 0x6de   :  { %4015 = vmatpush1.bf16.msra.mxu0 %v6242_v51  ;;  %v6390_v51 = vld [vmem:[#allocation31_spill] sm:$0xff] }
 0x774   :  { %v3556_v11 = vpop.f32.mrb[40].mxu1  ;;  %v4917_v9 = vpop.f32.mrb[56].mxu0 }
 0x775   :  { %v3612_v2 = vadd.f32 %v3556_v11, %v6387_v31  ;;  %v3558_v33 = vpop.f32.mrb[41].mxu1  ;;  %v4918_v58 = vpop.f32.mrb[57].mxu0  ;;  %v5267_v11 = vld [vmem:[#allocation7 + $0x18] sm:$0xff]   ;;  %v5270_v31 = vld [vmem:[#allocation7 + $0x68] sm:$0xff]  }
 0x776   :  { %v3619_v53 = vadd.f32 %v3558_v33, %v6388_v1  ;;  %v4919_v4 = vadd.f32 %v4918_v58, %v4917_v9  ;;  %v3560_v43 = vpop.f32.mrb[42].mxu1  ;;  %v4920_v61 = vpop.f32.mrb[58].mxu0  ;;  %v5269_v9 = vld [vmem:[#allocation7 + $0x20] sm:$0xff]   ;;  %v5272_v33 = vld [vmem:[#allocation7 + $0x70] sm:$0xff]   ;;  %v5274_v1 = vld [vmem:[#allocation7 + $0x78] sm:$0xff]  }
 0x777   :  { %v4696_v27 = vmul.f32 -1.442695, %v3612_v2  ;;  %v3634_v48 = vadd.f32 %v3560_v43, %v6389_v36  ;;  %v3562_v32 = vpop.f32.mrb[43].mxu1  ;;  %v4921_v18 = vpop.f32.mrb[59].mxu0  ;;  %v5271_v2 = vld [vmem:[#allocation7 + $0x28] sm:$0xff]   ;;  %v5273_v58 = vld [vmem:[#allocation7 + $0x30] sm:$0xff]  }
 0x778   :  { %v3641_v6 = vadd.f32 %v3562_v32, %v6390_v51  ;;  %v4922_v39 = vadd.f32 %v4921_v18, %v4920_v61  ;;  %v4697_v57 = vmul.f32 -1.442695, %v3619_v53  ;;  %v3626_v14 = vadd.f32 %v6132_v28, %v4919_v4  ;;  %v5275_v53 = vld [vmem:[#allocation7 + $0x38] sm:$0xff]   ;;  %v6394_v32 = vld [vmem:[#allocation28_spill] sm:$0xff] }
 0x779   :  { %5396 = vpow2.f32 %v4696_v27  ;;  %v4698_v60 = vmul.f32 -1.442695, %v3634_v48  ;;  %v6393_v61 = vld [vmem:[#allocation27_spill] sm:$0xff] }
 0x77a   :  { %v4699_v17 = vmul.f32 -1.442695, %v3641_v6  ;;  %v3648_v37 = vadd.f32 %v6138_v45, %v4922_v39 }
 0x77b   :  { %5398 = vpow2.f32 %v4698_v60 }
 0x77c   :  { %5400 = vpow2.f32 %v4697_v57  ;;  %v6395_v57 = vld [vmem:[#allocation13_spill] sm:$0xff] }
 0x77d   :  { %5402 = vpow2.f32 %v4699_v17 }
 0x783   :  { %v5397_v56 = vpop.eup %5396 }
 0x784   :  { %v3616_v55 = vadd.f32 1.0, %v5397_v56 }
 0x785   :  { %v5399_v15 = vpop.eup %5398 }
 0x786   :  { %5404 = vrcp.f32 %v3616_v55  ;;  %v3638_v49 = vadd.f32 1.0, %v5399_v15  ;;  %v5401_v59 = vpop.eup %5400  ;;  %v6396_v15 = vld [vmem:[#allocation29_spill] sm:$0xff] }
 0x787   :  { %v5403_v19 = vpop.eup %5402  ;;  %v3623_v20 = vadd.f32 1.0, %v5401_v59 }
 0x788   :  { %5406 = vrcp.f32 %v3638_v49  ;;  %v3645_v25 = vadd.f32 1.0, %v5403_v19 }
 0x789   :  { %5408 = vrcp.f32 %v3623_v20 }
 0x78a   :  { %5410 = vrcp.f32 %v3645_v25 }
 0x790   :  { %v5405_v44 = vpop.eup %5404 }
 0x791   :  { %v3627_v40 = vmul.f32 %v5405_v44, %v3626_v14 }
 0x792   :  { %v5407_v42 = vpop.eup %5406 }
 0x793   :  { %v3628_v38 = vadd.f32 %v3627_v40, %v6391_v26  ;;  %v3649_v23 = vmul.f32 %v5407_v42, %v3648_v37  ;;  %v5409_v34 = vpop.eup %5408 }
 0x794   :  { %v5411_v13 = vpop.eup %5410  ;;  %v3630_v63 = vsub.f32 1.0, %v5409_v34  ;;  %v3632_v0 = vmul.f32 %v5409_v34, %v6257_v7  ;;  %v5261_v7 = vld [vmem:[#allocation7] sm:$0xff]  }
 0x795   :  { %5412 = vtanh.f32 %v3628_v38  ;;  %v3650_v8 = vadd.f32 %v3649_v23, %v6392_v46  ;;  %v3652_v50 = vsub.f32 1.0, %v5411_v13  ;;  %v3654_v21 = vmul.f32 %v5411_v13, %v6259_v41  ;;  %v5263_v41 = vld [vmem:[#allocation7 + $0x8] sm:$0xff]  }
 0x797   :  { %5414 = vtanh.f32 %v3650_v8 }
 0x79f   :  { %v5413_v54 = vpop.eup %5412 }
 0x7a0   :  { %v3631_v62 = vmul.f32 %v5413_v54, %v3630_v63  ;;  %v6397_v54 = vld [vmem:[#allocation24_spill] sm:$0xff] }
 0x7a1   :  { %v5415_v3 = vpop.eup %5414 }
 0x7a2   :  { %v3653_v35 = vmul.f32 %v5415_v3, %v3652_v50  ;;  %v6306_v22 = vadd.f32 %v3632_v0, %v3631_v62  ;;  %v6398_v0 = vld [vmem:[#allocation30_spill] sm:$0xff] }
 0x7a4   :  { %v6308_v24 = vadd.f32 %v3654_v21, %v3653_v35  ;;  %v3662_v12 = vpack.c.bf16 %v6373_v47, %v6306_v22 }
 0x7a6   :  { %v3663_v30 = vpack.c.bf16 %v6308_v24, %v6373_v47  ;;  %v5268_v47 = vld [vmem:[#allocation7 + $0x60] sm:$0xff]  }
 0x7a8   :  { %4016 = vmatprep.mubr.bf16.mxu0 %v3663_v30  ;;  %4059 = vmatprep.mubr.bf16.mxu1 %v3663_v30 }
 0x7a9   :  { %4017 = vmatmul.mubr.bf16.vlgmr.msra.gmra.mrb[60].mxu0 %v3662_v12  ;;  %4060 = vmatmul.mubr.bf16.vlgmr.msra.gmra.mrb[44].mxu1 %v3662_v12 }
 0x7aa   :  { %4946 = vmatpush3.bf16.msra.mxu1 %v5261_v7 }
 0x7ab   :  { %4947 = vmatprep.subr.bf16.mxu1 %v5262_v10 }
 0x7ae   :  { %4948 = vmatpush3.bf16.msra.mxu1 %v5263_v41 }
 0x7af   :  { %4949 = vmatprep.subr.bf16.mxu1 %v5264_v16 }
 0x7b2   :  { %4950 = vmatpush3.bf16.msra.mxu1 %v5265_v29 }
 0x7b3   :  { %4951 = vmatprep.subr.bf16.mxu1 %v5266_v5 }
 0x7b6   :  { %4952 = vmatpush3.bf16.msra.mxu1 %v5267_v11 }
 0x7b7   :  { %4953 = vmatprep.subr.bf16.mxu1 %v5268_v47 }
 0x7ba   :  { %4954 = vmatpush3.bf16.msra.mxu1 %v5269_v9  ;;  %v4752_v9 = vld [vmem:[%s6344_s5] ss:$0 sm:$0xff] }
 0x7bb   :  { %4955 = vmatprep.subr.bf16.mxu1 %v5270_v31 }
 0x7be   :  { %4956 = vmatpush3.bf16.msra.mxu1 %v5271_v2 }
 0x7bf   :  { %4957 = vmatprep.subr.bf16.mxu1 %v5272_v33 }
 0x7c2   :  { %4958 = vmatpush3.bf16.msra.mxu1 %v5273_v58 }
 0x7c3   :  { %4959 = vmatprep.subr.bf16.mxu1 %v5274_v1 }
 0x7c6   :  { %4960 = vmatpush3.bf16.msra.mxu1 %v5275_v53 }
 0x87c   :  { %v4018_v4 = vpop.f32.mrb[60].mxu0  ;;  %v4939_v43 = vpop.f32.mrb[44].mxu1 }
 0x87d   :  { %v4074_v27 = vadd.f32 %v4018_v4, %v6393_v61  ;;  %v4020_v36 = vpop.f32.mrb[61].mxu0  ;;  %v4940_v48 = vpop.f32.mrb[45].mxu1 }
 0x87e   :  { %v4081_v18 = vadd.f32 %v4020_v36, %v6394_v32  ;;  %v4941_v51 = vadd.f32 %v4940_v48, %v4939_v43  ;;  %v4022_v6 = vpop.f32.mrb[62].mxu0  ;;  %v4942_v39 = vpop.f32.mrb[46].mxu1 }
 0x87f   :  { %v4748_v60 = vmul.f32 -1.442695, %v4074_v27  ;;  %v4096_v17 = vadd.f32 %v4022_v6, %v6395_v57  ;;  %v4024_v56 = vpop.f32.mrb[63].mxu0  ;;  %v4943_v55 = vpop.f32.mrb[47].mxu1 }
 0x880   :  { %v4103_v49 = vadd.f32 %v4024_v56, %v6396_v15  ;;  %v4944_v59 = vadd.f32 %v4943_v55, %v4942_v39  ;;  %v4749_v20 = vmul.f32 -1.442695, %v4081_v18  ;;  %v4088_v23 = vadd.f32 %v6132_v28, %v4941_v51 }
 0x881   :  { %5416 = vpow2.f32 %v4748_v60  ;;  %v4750_v19 = vmul.f32 -1.442695, %v4096_v17 }
 0x882   :  { %v4751_v14 = vmul.f32 -1.442695, %v4103_v49  ;;  %v4110_v13 = vadd.f32 %v6138_v45, %v4944_v59 }
 0x883   :  { %5418 = vpow2.f32 %v4750_v19 }
 0x884   :  { %5420 = vpow2.f32 %v4749_v20 }
 0x885   :  { %5422 = vpow2.f32 %v4751_v14 }
 0x88b   :  { %v5417_v25 = vpop.eup %5416 }
 0x88c   :  { %v4078_v44 = vadd.f32 1.0, %v5417_v25 }
 0x88d   :  { %v5419_v40 = vpop.eup %5418 }
 0x88e   :  { %5424 = vrcp.f32 %v4078_v44  ;;  %v4100_v37 = vadd.f32 1.0, %v5419_v40  ;;  %v5421_v42 = vpop.eup %5420 }
 0x88f   :  { %v5423_v26 = vpop.eup %5422  ;;  %v4085_v38 = vadd.f32 1.0, %v5421_v42 }
 0x890   :  { %5426 = vrcp.f32 %v4100_v37  ;;  %v4107_v46 = vadd.f32 1.0, %v5423_v26 }
 0x891   :  { %5428 = vrcp.f32 %v4085_v38 }
 0x892   :  { %5430 = vrcp.f32 %v4107_v46 }
 0x898   :  { %v5425_v8 = vpop.eup %5424 }
 0x899   :  { %v4089_v34 = vmul.f32 %v5425_v8, %v4088_v23 }
 0x89a   :  { %v5427_v63 = vpop.eup %5426 }
 0x89b   :  { %v4090_v50 = vadd.f32 %v4089_v34, %v6397_v54  ;;  %v4111_v62 = vmul.f32 %v5427_v63, %v4110_v13  ;;  %v5429_v35 = vpop.eup %5428 }
 0x89c   :  { %v5431_v21 = vpop.eup %5430  ;;  %v4092_v30 = vsub.f32 1.0, %v5429_v35  ;;  %v4094_v7 = vmul.f32 %v5429_v35, %v6306_v22 }
 0x89d   :  { %5432 = vtanh.f32 %v4090_v50  ;;  %v4112_v3 = vadd.f32 %v4111_v62, %v6398_v0  ;;  %v4114_v28 = vsub.f32 1.0, %v5431_v21  ;;  %v4116_v45 = vmul.f32 %v5431_v21, %v6308_v24 }
 0x89f   :  { %5434 = vtanh.f32 %v4112_v3 }
 0x8a7   :  { %v5433_v12 = vpop.eup %5432 }
 0x8a8   :  { %v4093_v52 = vmul.f32 %v5433_v12, %v4092_v30 }
 0x8a9   :  { %v5435_v10 = vpop.eup %5434 }
 0x8aa   :  { %v4115_v41 = vmul.f32 %v5435_v10, %v4114_v28  ;;  %v4095_v16 = vadd.f32 %v4094_v7, %v4093_v52 }
 0x8ac   :  { %v4117_v29 = vadd.f32 %v4116_v45, %v4115_v41  ;;  %v4118_v11 = vpack.c.bf16 %v4095_v16, %v4095_v16 }
 0x8ae   :  { %v4119_v5 = vpack.c.bf16 %v4117_v29, %v4117_v29 }
 0x8b0   :  { %4287 = vmatprep.mubr.bf16.mxu1 %v4119_v5 }
 0x8b1   :  { %4288 = vmatmul.mubr.bf16.vlgmr.msra.gmra.mrb[48].mxu1 %v4118_v11 }
 0x984   :  { %v4961_v47 = vpop.f32.mrb[48].mxu1 }
 0x985   :  { %v4962_v31 = vpop.f32.mrb[49].mxu1 }
 0x986   :  { %v4963_v2 = vadd.f32 %v4962_v31, %v4961_v47  ;;  %v4964_v22 = vpop.f32.mrb[50].mxu1 }
 0x987   :  { %v4965_v33 = vpop.f32.mrb[51].mxu1 }
 0x988   :  { %v4290_v58 = vadd.f32 %v4963_v2, %v4752_v9 }
 0x98a   :  { %4295 = vst [vmem:[#allocation9] sm:$0xff] %v4290_v58 }
 0x98b   :  { %5522 = shalt.err (!%p5519_p6)
}
 0x98c   :  { %s5523_s5 = scalar_lea.hbm %s6345_s6, 128 }
 0x98d   :  { %p5524_p7 = scmp.ne.s32.totalorder %s6345_s6, %s5523_s5  ;;  %p5527_p8 = scmp.lt.u32.totalorder %s5523_s5, %s6345_s6 }
 0x98f   :  { %p5529_p9 = pnand %p5527_p8, %p5524_p7 }
 0x991   :  { %5532 = shalt.err (!%p5529_p9)
}
 0x992   :  { %4305 = dma.vmem_to_hbm [thread:$0]  %s4303_s2, 128, %s6345_s6, [#allocation6]  }
 0x993   :  { %5537 = dma.done.wait [#allocation6], 128  }
 0x994   :  { %5538 = vsyncadd [#allocation6], 4294967168 }
 0x995   :  { %4309 = vsyncpa [#allocation5], 1 }
 0x996   :  { %4310 = vsyncpa [#allocation8], 1 }
 0x997   :  { %4311 = vsyncpa [#allocation6], 1 }

</bundles_post_ra>
